<compile_context>
chip_gen: v7x
topology: tpu7x:2x2x1
jax: 0.10.0
libtpu: 0.0.40
codegen_flags: <defaults>
</compile_context>

<pallas_src>
import functools

import jax
import jax.numpy as jnp
from jax.experimental import pallas as pl
from jax.experimental.pallas import tpu as pltpu

NUM_MLPS = 8  # unfused parameter stack order: s1..s4, t1..t4


# ---------------------------------------------------------------------------
# Kernel (feature-major: every activation is (features, batch_tile))
# ---------------------------------------------------------------------------
def _nvp_kernel(x1_ref, x2_ref,
                w1_ref, b1_ref, w2_ref, b2_ref, w3_ref, b3_ref,
                w4_ref, b4_ref, w5s_ref, b5s_ref, w5t_ref, b5t_ref,
                h1_ref, h2_ref, logp_ref):
    """One batch tile of NVPModel.forward (all 4 coupling layers)."""
    f32 = jnp.float32
    mm = w1_ref.dtype  # MXU operand dtype (float32 or bfloat16)

    def coupling(k, h):
        # Fused s_k / t_k MLP; h is (d, TB), z is (2W, TB), s/t are (d, TB).
        z = jnp.maximum(
            jnp.dot(w1_ref[k], h.astype(mm),
                    preferred_element_type=f32) + b1_ref[k], 0.0)
        z = jnp.maximum(
            jnp.dot(w2_ref[k], z.astype(mm),
                    preferred_element_type=f32) + b2_ref[k], 0.0)
        z = jnp.maximum(
            jnp.dot(w3_ref[k], z.astype(mm),
                    preferred_element_type=f32) + b3_ref[k], 0.0)
        z = jnp.maximum(
            jnp.dot(w4_ref[k], z.astype(mm),
                    preferred_element_type=f32) + b4_ref[k], 0.0)
        zm = z.astype(mm)
        s = 3.0 * jnp.tanh(
            jnp.dot(w5s_ref[k], zm, preferred_element_type=f32) + b5s_ref[k])
        t = 3.0 * (
            jnp.dot(w5t_ref[k], zm, preferred_element_type=f32) + b5t_ref[k])
        return s, t

    h1 = x1_ref[...].astype(f32)          # (d, TB)
    h2 = x2_ref[...].astype(f32)          # (d, TB)

    # Coupling 1: h2 = x2 * exp(s1(h1)) + t1(h1)
    s, t = coupling(0, h1)
    h2 = h2 * jnp.exp(s) + t
    s_acc = s                              # sum(log(exp(s))) == sum(s)

    # Coupling 2: h1 = h1 * exp(s2(h2)) + t2(h2)
    s, t = coupling(1, h2)
    h1 = h1 * jnp.exp(s) + t
    s_acc = s_acc + s

    # Coupling 3: h2 = h2 * exp(s3(h1)) + t3(h1)
    s, t = coupling(2, h1)
    h2 = h2 * jnp.exp(s) + t
    s_acc = s_acc + s

    # Coupling 4: h1 = h1 * exp(s4(h2)) + t4(h2)
    s, t = coupling(3, h2)
    h1 = h1 * jnp.exp(s) + t
    s_acc = s_acc + s

    # Lane-dense writes (batch on lanes).  Re-interleave happens in wrapper.
    h1_ref[...] = h1
    h2_ref[...] = h2
    logp_ref[...] = jnp.sum(s_acc, axis=0, keepdims=True)   # (1, TB)


# ---------------------------------------------------------------------------
# Parameter handling
# ---------------------------------------------------------------------------
def init_params(key, d, width):
    """Unfused (torch-like) params: each tensor stacked over 8 MLPs."""
    def linear(key, fan_in, fan_out):
        kw, kb = jax.random.split(key)
        bound = 1.0 / jnp.sqrt(fan_in)
        w = jax.random.uniform(kw, (NUM_MLPS, fan_in, fan_out),
                               jnp.float32, -bound, bound)
        b = jax.random.uniform(kb, (NUM_MLPS, 1, fan_out),
                               jnp.float32, -bound, bound)
        return w, b

    k1, k2, k3, k4, k5 = jax.random.split(key, 5)
    w1, b1 = linear(k1, d, width)
    w2, b2 = linear(k2, width, width)
    w3, b3 = linear(k3, width, width)
    w4, b4 = linear(k4, width, width)
    w5, b5 = linear(k5, width, d)
    return (w1, b1, w2, b2, w3, b3, w4, b4, w5, b5)


def pack_params(params, *, d, width, matmul_dtype=jnp.bfloat16):
    """Fuse the 8 MLPs (s1..s4, t1..t4) into 4 per-coupling-layer MLPs,
    transposed to feature-major (out, in).  Weights cast to `matmul_dtype`
    (MXU operands); biases stay float32 (added post-accumulation)."""
    w1, b1, w2, b2, w3, b3, w4, b4, w5, b5 = params
    W = width
    mm = matmul_dtype

    def fm(w):          # (4, fan_in, fan_out) -> (4, fan_out, fan_in)
        return jnp.swapaxes(w, 1, 2)

    def colb(b):        # (4, 1, fan_out) -> (4, fan_out, 1)
        return jnp.swapaxes(b, 1, 2)

    # Layer 1: (4, 2W, d) — s-head rows on top, t-head rows on the bottom.
    wf1 = jnp.concatenate([fm(w1[:4]), fm(w1[4:])], axis=1).astype(mm)
    bf1 = jnp.concatenate([colb(b1[:4]), colb(b1[4:])], axis=1)

    def hidden(w, b):   # (8, W, W) -> block-diagonal (4, 2W, 2W)
        ws, wt = fm(w[:4]), fm(w[4:])
        z = jnp.zeros((4, W, W), w.dtype)
        top = jnp.concatenate([ws, z], axis=2)
        bot = jnp.concatenate([z, wt], axis=2)
        wf = jnp.concatenate([top, bot], axis=1).astype(mm)
        bf = jnp.concatenate([colb(b[:4]), colb(b[4:])], axis=1)
        return wf, bf

    wf2, bf2 = hidden(w2, b2)
    wf3, bf3 = hidden(w3, b3)
    wf4, bf4 = hidden(w4, b4)

    # Layer 5 heads: (4, d, 2W).  s-head reads rows 0..W-1 of z, t-head the rest.
    zpad = jnp.zeros((4, d, W), w5.dtype)
    w5s = jnp.concatenate([fm(w5[:4]), zpad], axis=2).astype(mm)
    w5t = jnp.concatenate([zpad, fm(w5[4:])], axis=2).astype(mm)
    b5s = colb(b5[:4])
    b5t = colb(b5[4:])
    return (wf1, bf1, wf2, bf2, wf3, bf3, wf4, bf4, w5s, b5s, w5t, b5t)


# ---------------------------------------------------------------------------
# Wrapper
# ---------------------------------------------------------------------------
def nvp_forward(x, packed, *, d, batch_tile=512):
    """NVPModel.forward.  x: (B, 2*d) f32 -> (h: (B, 2*d), logph: (B,))."""
    B, D = x.shape
    assert D == 2 * d
    assert batch_tile % 128 == 0
    # Don't over-pad tiny batches; keep tile a multiple of 128.
    batch_tile = min(batch_tile, max(128, 128 * pl.cdiv(B, 128)))

    # De-interleave (torch: x.view(B,d,2)[:,:,0/1]) and go feature-major
    # in the wrapper — plain XLA slices/transpose, done once.
    x1t = x[:, 0::2].T                    # (d, B)  even features
    x2t = x[:, 1::2].T                    # (d, B)  odd features

    Bp = pl.cdiv(B, batch_tile) * batch_tile
    if Bp != B:
        pad = ((0, 0), (0, Bp - B))
        x1t = jnp.pad(x1t, pad)
        x2t = jnp.pad(x2t, pad)

    grid = (Bp // batch_tile,)

    def batch_spec(rows):
        return pl.BlockSpec((rows, batch_tile), lambda i: (0, i))

    def full_spec(a):                     # grid-invariant, fully-resident
        nd = a.ndim
        return pl.BlockSpec(a.shape, lambda i, _nd=nd: (0,) * _nd)

    in_specs = [batch_spec(d), batch_spec(d)] + [full_spec(p) for p in packed]

    h1_slab, h2_slab, logp = pl.pallas_call(
        _nvp_kernel,
        grid_spec=pl.GridSpec(
            grid=grid,
            in_specs=in_specs,
            out_specs=[batch_spec(d), batch_spec(d), batch_spec(1)],
        ),
        out_shape=[
            jax.ShapeDtypeStruct((d, Bp), jnp.float32),
            jax.ShapeDtypeStruct((d, Bp), jnp.float32),
            jax.ShapeDtypeStruct((1, Bp), jnp.float32),
        ],
        compiler_params=pltpu.CompilerParams(
            dimension_semantics=("parallel",)),
    )(x1t, x2t, *packed)

    # Re-interleave (torch: stack([h1,h2],dim=2).view(B,D)) in the wrapper.
    h1 = h1_slab[:, :B].T                 # (B, d)
    h2 = h2_slab[:, :B].T                 # (B, d)
    h = jnp.stack([h1, h2], axis=2).reshape(B, D)
    return h, logp[0, :B]


# ---------------------------------------------------------------------------
# Pure-JAX reference (unfused, mirrors the PyTorch module)
# ---------------------------------------------------------------------------
def nvp_forward_ref(x, params, *, d):
    w1, b1, w2, b2, w3, b3, w4, b4, w5, b5 = params
    S1, S2, S3, S4, T1, T2, T3, T4 = range(8)

    def mlp(idx, x, use_tanh):
        h = jnp.maximum(x @ w1[idx] + b1[idx], 0.0)
        h = jnp.maximum(h @ w2[idx] + b2[idx], 0.0)
        h = jnp.maximum(h @ w3[idx] + b3[idx], 0.0)
        h = jnp.maximum(h @ w4[idx] + b4[idx], 0.0)
        out = h @ w5[idx] + b5[idx]
        if use_tanh:
            out = jnp.tanh(out)
        return 3.0 * out

    B, D = x.shape
    xr = x.reshape(B, d, 2)
    x1, x2 = xr[:, :, 0], xr[:, :, 1]
    h1, h2 = x1, x2
    logp = jnp.zeros((B,), jnp.float32)

    scale = jnp.exp(mlp(S1, h1, True))
    h2 = x2 * scale + mlp(T1, h1, False)
    logp += jnp.sum(jnp.log(scale), axis=1)
    scale = jnp.exp(mlp(S2, h2, True))
    h1 = h1 * scale + mlp(T2, h2, False)
    logp += jnp.sum(jnp.log(scale), axis=1)
    scale = jnp.exp(mlp(S3, h1, True))
    h2 = h2 * scale + mlp(T3, h1, False)
    logp += jnp.sum(jnp.log(scale), axis=1)
    scale = jnp.exp(mlp(S4, h2, True))
    h1 = h1 * scale + mlp(T4, h2, False)
    logp += jnp.sum(jnp.log(scale), axis=1)

    h = jnp.stack([h1, h2], axis=2).reshape(B, D)
    return h, logp


if __name__ == "__main__":
    # Shapes consistent with the module: d=4 -> input dim D=8, width=32.
    d = 4
    width = 32
    B = 1024          # 2 grid steps of 512 rows -> both v7x TCs get work.

    key = jax.random.PRNGKey(0)
    kx, kp = jax.random.split(key)
    x = jax.random.normal(kx, (B, 2 * d), jnp.float32)
    params = init_params(kp, d, width)

    h_ref, logph_ref = nvp_forward_ref(x, params, d=d)
    fwd = jax.jit(functools.partial(nvp_forward, d=d, batch_tile=512))

    # --- f32 MXU operands: strict correctness check -------------------------
    packed_f32 = pack_params(params, d=d, width=width, matmul_dtype=jnp.float32)
    h32, lp32 = fwd(x, packed_f32)
    jax.block_until_ready((h32, lp32))
    assert h32.shape == (B, 2 * d) and lp32.shape == (B,)
    assert jnp.allclose(h32, h_ref, atol=1e-4, rtol=1e-4), \
        float(jnp.max(jnp.abs(h32 - h_ref)))
    assert jnp.allclose(lp32, logph_ref, atol=1e-4, rtol=1e-4), \
        float(jnp.max(jnp.abs(lp32 - logph_ref)))

    # --- bf16 MXU operands (v6e/v7x recommendation): loose sanity check -----
    packed_bf16 = pack_params(params, d=d, width=width,
                              matmul_dtype=jnp.bfloat16)
    h16, lp16 = fwd(x, packed_bf16)
    jax.block_until_ready((h16, lp16))
    rel_h = jnp.max(jnp.abs(h16 - h32) / (1.0 + jnp.abs(h32)))
    rel_l = jnp.max(jnp.abs(lp16 - lp32) / (1.0 + jnp.abs(lp32)))
    assert bool(rel_h < 0.5) and bool(rel_l < 0.5), (float(rel_h), float(rel_l))

    print("KERNEL_OK")
</pallas_src>

<mosaic_0001>
module attributes {stable_mosaic.version = 11 : i64} {
  func.func @_nvp_kernel(%arg0: i32, %arg1: memref<4x512xf32, #tpu.memory_space<vmem>>, %arg2: memref<4x512xf32, #tpu.memory_space<vmem>>, %arg3: memref<4x64x4xf32, #tpu.memory_space<vmem>>, %arg4: memref<4x64x1xf32, #tpu.memory_space<vmem>>, %arg5: memref<4x64x64xf32, #tpu.memory_space<vmem>>, %arg6: memref<4x64x1xf32, #tpu.memory_space<vmem>>, %arg7: memref<4x64x64xf32, #tpu.memory_space<vmem>>, %arg8: memref<4x64x1xf32, #tpu.memory_space<vmem>>, %arg9: memref<4x64x64xf32, #tpu.memory_space<vmem>>, %arg10: memref<4x64x1xf32, #tpu.memory_space<vmem>>, %arg11: memref<4x4x64xf32, #tpu.memory_space<vmem>>, %arg12: memref<4x4x1xf32, #tpu.memory_space<vmem>>, %arg13: memref<4x4x64xf32, #tpu.memory_space<vmem>>, %arg14: memref<4x4x1xf32, #tpu.memory_space<vmem>>, %arg15: memref<4x512xf32, #tpu.memory_space<vmem>>, %arg16: memref<4x512xf32, #tpu.memory_space<vmem>>, %arg17: memref<1x512xf32, #tpu.memory_space<vmem>>) attributes {dimension_semantics = [#tpu.dimension_semantics<parallel>], iteration_bounds = array<i64: 2>, scalar_prefetch = 0 : i64, scratch_operands = 0 : i64, tpu.core_type = #tpu.core_type<tc>, window_params = [{transform_indices = @transform_0, window_bounds = array<i64: 4, 512>}, {transform_indices = @transform_1, window_bounds = array<i64: 4, 512>}, {pipeline_mode = #tpu.pipeline_mode<synchronous>, transform_indices = @transform_2, window_bounds = array<i64: 4, 64, 4>}, {pipeline_mode = #tpu.pipeline_mode<synchronous>, transform_indices = @transform_3, window_bounds = array<i64: 4, 64, 1>}, {pipeline_mode = #tpu.pipeline_mode<synchronous>, transform_indices = @transform_4, window_bounds = array<i64: 4, 64, 64>}, {pipeline_mode = #tpu.pipeline_mode<synchronous>, transform_indices = @transform_5, window_bounds = array<i64: 4, 64, 1>}, {pipeline_mode = #tpu.pipeline_mode<synchronous>, transform_indices = @transform_6, window_bounds = array<i64: 4, 64, 64>}, {pipeline_mode = #tpu.pipeline_mode<synchronous>, transform_indices = @transform_7, window_bounds = array<i64: 4, 64, 1>}, {pipeline_mode = #tpu.pipeline_mode<synchronous>, transform_indices = @transform_8, window_bounds = array<i64: 4, 64, 64>}, {pipeline_mode = #tpu.pipeline_mode<synchronous>, transform_indices = @transform_9, window_bounds = array<i64: 4, 64, 1>}, {pipeline_mode = #tpu.pipeline_mode<synchronous>, transform_indices = @transform_10, window_bounds = array<i64: 4, 4, 64>}, {pipeline_mode = #tpu.pipeline_mode<synchronous>, transform_indices = @transform_11, window_bounds = array<i64: 4, 4, 1>}, {pipeline_mode = #tpu.pipeline_mode<synchronous>, transform_indices = @transform_12, window_bounds = array<i64: 4, 4, 64>}, {pipeline_mode = #tpu.pipeline_mode<synchronous>, transform_indices = @transform_13, window_bounds = array<i64: 4, 4, 1>}, {transform_indices = @transform_14, window_bounds = array<i64: 4, 512>}, {transform_indices = @transform_15, window_bounds = array<i64: 4, 512>}, {transform_indices = @transform_16, window_bounds = array<i64: 1, 512>}]} {
    %c0 = arith.constant 0 : index
    %c0_0 = arith.constant 0 : index
    %0 = vector.load %arg1[%c0, %c0_0] : memref<4x512xf32, #tpu.memory_space<vmem>>, vector<4x512xf32>
    %c0_1 = arith.constant 0 : index
    %c0_2 = arith.constant 0 : index
    %1 = vector.load %arg2[%c0_1, %c0_2] : memref<4x512xf32, #tpu.memory_space<vmem>>, vector<4x512xf32>
    %c0_3 = arith.constant 0 : index
    %c0_4 = arith.constant 0 : index
    %c0_5 = arith.constant 0 : index
    %2 = vector.load %arg3[%c0_3, %c0_4, %c0_5] : memref<4x64x4xf32, #tpu.memory_space<vmem>>, vector<1x64x4xf32>
    %3 = vector.shape_cast %2 : vector<1x64x4xf32> to vector<64x4xf32>
    %cst = arith.constant dense<0.000000e+00> : vector<64x512xf32>
    %4 = tpu.matmul %3, %0, %cst {dimension_numbers = #tpu.dot_dimension_numbers<[1], [0], [0], [1], [0, 0, 1, 1], [], []>} : vector<64x4xf32>, vector<4x512xf32>, vector<64x512xf32> -> vector<64x512xf32>
    %c0_6 = arith.constant 0 : index
    %c0_7 = arith.constant 0 : index
    %c0_8 = arith.constant 0 : index
    %5 = vector.load %arg4[%c0_6, %c0_7, %c0_8] : memref<4x64x1xf32, #tpu.memory_space<vmem>>, vector<1x64x1xf32>
    %6 = vector.shape_cast %5 : vector<1x64x1xf32> to vector<64x1xf32>
    %7 = vector.broadcast %6 : vector<64x1xf32> to vector<64x512xf32>
    %8 = arith.addf %4, %7 : vector<64x512xf32>
    %cst_9 = arith.constant 0.000000e+00 : f32
    %9 = vector.broadcast %cst_9 : f32 to vector<64x512xf32>
    %10 = arith.maximumf %8, %9 : vector<64x512xf32>
    %c0_10 = arith.constant 0 : index
    %c0_11 = arith.constant 0 : index
    %c0_12 = arith.constant 0 : index
    %11 = vector.load %arg5[%c0_10, %c0_11, %c0_12] : memref<4x64x64xf32, #tpu.memory_space<vmem>>, vector<1x64x64xf32>
    %12 = vector.shape_cast %11 : vector<1x64x64xf32> to vector<64x64xf32>
    %cst_13 = arith.constant dense<0.000000e+00> : vector<64x512xf32>
    %13 = tpu.matmul %12, %10, %cst_13 {dimension_numbers = #tpu.dot_dimension_numbers<[1], [0], [0], [1], [0, 0, 1, 1], [], []>} : vector<64x64xf32>, vector<64x512xf32>, vector<64x512xf32> -> vector<64x512xf32>
    %c0_14 = arith.constant 0 : index
    %c0_15 = arith.constant 0 : index
    %c0_16 = arith.constant 0 : index
    %14 = vector.load %arg6[%c0_14, %c0_15, %c0_16] : memref<4x64x1xf32, #tpu.memory_space<vmem>>, vector<1x64x1xf32>
    %15 = vector.shape_cast %14 : vector<1x64x1xf32> to vector<64x1xf32>
    %16 = vector.broadcast %15 : vector<64x1xf32> to vector<64x512xf32>
    %17 = arith.addf %13, %16 : vector<64x512xf32>
    %cst_17 = arith.constant 0.000000e+00 : f32
    %18 = vector.broadcast %cst_17 : f32 to vector<64x512xf32>
    %19 = arith.maximumf %17, %18 : vector<64x512xf32>
    %c0_18 = arith.constant 0 : index
    %c0_19 = arith.constant 0 : index
    %c0_20 = arith.constant 0 : index
    %20 = vector.load %arg7[%c0_18, %c0_19, %c0_20] : memref<4x64x64xf32, #tpu.memory_space<vmem>>, vector<1x64x64xf32>
    %21 = vector.shape_cast %20 : vector<1x64x64xf32> to vector<64x64xf32>
    %cst_21 = arith.constant dense<0.000000e+00> : vector<64x512xf32>
    %22 = tpu.matmul %21, %19, %cst_21 {dimension_numbers = #tpu.dot_dimension_numbers<[1], [0], [0], [1], [0, 0, 1, 1], [], []>} : vector<64x64xf32>, vector<64x512xf32>, vector<64x512xf32> -> vector<64x512xf32>
    %c0_22 = arith.constant 0 : index
    %c0_23 = arith.constant 0 : index
    %c0_24 = arith.constant 0 : index
    %23 = vector.load %arg8[%c0_22, %c0_23, %c0_24] : memref<4x64x1xf32, #tpu.memory_space<vmem>>, vector<1x64x1xf32>
    %24 = vector.shape_cast %23 : vector<1x64x1xf32> to vector<64x1xf32>
    %25 = vector.broadcast %24 : vector<64x1xf32> to vector<64x512xf32>
    %26 = arith.addf %22, %25 : vector<64x512xf32>
    %cst_25 = arith.constant 0.000000e+00 : f32
    %27 = vector.broadcast %cst_25 : f32 to vector<64x512xf32>
    %28 = arith.maximumf %26, %27 : vector<64x512xf32>
    %c0_26 = arith.constant 0 : index
    %c0_27 = arith.constant 0 : index
    %c0_28 = arith.constant 0 : index
    %29 = vector.load %arg9[%c0_26, %c0_27, %c0_28] : memref<4x64x64xf32, #tpu.memory_space<vmem>>, vector<1x64x64xf32>
    %30 = vector.shape_cast %29 : vector<1x64x64xf32> to vector<64x64xf32>
    %cst_29 = arith.constant dense<0.000000e+00> : vector<64x512xf32>
    %31 = tpu.matmul %30, %28, %cst_29 {dimension_numbers = #tpu.dot_dimension_numbers<[1], [0], [0], [1], [0, 0, 1, 1], [], []>} : vector<64x64xf32>, vector<64x512xf32>, vector<64x512xf32> -> vector<64x512xf32>
    %c0_30 = arith.constant 0 : index
    %c0_31 = arith.constant 0 : index
    %c0_32 = arith.constant 0 : index
    %32 = vector.load %arg10[%c0_30, %c0_31, %c0_32] : memref<4x64x1xf32, #tpu.memory_space<vmem>>, vector<1x64x1xf32>
    %33 = vector.shape_cast %32 : vector<1x64x1xf32> to vector<64x1xf32>
    %34 = vector.broadcast %33 : vector<64x1xf32> to vector<64x512xf32>
    %35 = arith.addf %31, %34 : vector<64x512xf32>
    %cst_33 = arith.constant 0.000000e+00 : f32
    %36 = vector.broadcast %cst_33 : f32 to vector<64x512xf32>
    %37 = arith.maximumf %35, %36 : vector<64x512xf32>
    %c0_34 = arith.constant 0 : index
    %c0_35 = arith.constant 0 : index
    %c0_36 = arith.constant 0 : index
    %38 = vector.load %arg11[%c0_34, %c0_35, %c0_36] : memref<4x4x64xf32, #tpu.memory_space<vmem>>, vector<1x4x64xf32>
    %39 = vector.shape_cast %38 : vector<1x4x64xf32> to vector<4x64xf32>
    %cst_37 = arith.constant dense<0.000000e+00> : vector<4x512xf32>
    %40 = tpu.matmul %39, %37, %cst_37 {dimension_numbers = #tpu.dot_dimension_numbers<[1], [0], [0], [1], [0, 0, 1, 1], [], []>} : vector<4x64xf32>, vector<64x512xf32>, vector<4x512xf32> -> vector<4x512xf32>
    %c0_38 = arith.constant 0 : index
    %c0_39 = arith.constant 0 : index
    %c0_40 = arith.constant 0 : index
    %41 = vector.load %arg12[%c0_38, %c0_39, %c0_40] : memref<4x4x1xf32, #tpu.memory_space<vmem>>, vector<1x4x1xf32>
    %42 = vector.shape_cast %41 : vector<1x4x1xf32> to vector<4x1xf32>
    %43 = vector.broadcast %42 : vector<4x1xf32> to vector<4x512xf32>
    %44 = arith.addf %40, %43 : vector<4x512xf32>
    %45 = math.tanh %44 : vector<4x512xf32>
    %cst_41 = arith.constant 3.000000e+00 : f32
    %46 = vector.broadcast %cst_41 : f32 to vector<4x512xf32>
    %47 = arith.mulf %46, %45 : vector<4x512xf32>
    %c0_42 = arith.constant 0 : index
    %c0_43 = arith.constant 0 : index
    %c0_44 = arith.constant 0 : index
    %48 = vector.load %arg13[%c0_42, %c0_43, %c0_44] : memref<4x4x64xf32, #tpu.memory_space<vmem>>, vector<1x4x64xf32>
    %49 = vector.shape_cast %48 : vector<1x4x64xf32> to vector<4x64xf32>
    %cst_45 = arith.constant dense<0.000000e+00> : vector<4x512xf32>
    %50 = tpu.matmul %49, %37, %cst_45 {dimension_numbers = #tpu.dot_dimension_numbers<[1], [0], [0], [1], [0, 0, 1, 1], [], []>} : vector<4x64xf32>, vector<64x512xf32>, vector<4x512xf32> -> vector<4x512xf32>
    %c0_46 = arith.constant 0 : index
    %c0_47 = arith.constant 0 : index
    %c0_48 = arith.constant 0 : index
    %51 = vector.load %arg14[%c0_46, %c0_47, %c0_48] : memref<4x4x1xf32, #tpu.memory_space<vmem>>, vector<1x4x1xf32>
    %52 = vector.shape_cast %51 : vector<1x4x1xf32> to vector<4x1xf32>
    %53 = vector.broadcast %52 : vector<4x1xf32> to vector<4x512xf32>
    %54 = arith.addf %50, %53 : vector<4x512xf32>
    %cst_49 = arith.constant 3.000000e+00 : f32
    %55 = vector.broadcast %cst_49 : f32 to vector<4x512xf32>
    %56 = arith.mulf %55, %54 : vector<4x512xf32>
    %57 = math.exp %47 : vector<4x512xf32>
    %58 = arith.mulf %1, %57 : vector<4x512xf32>
    %59 = arith.addf %58, %56 : vector<4x512xf32>
    %c1 = arith.constant 1 : index
    %c0_50 = arith.constant 0 : index
    %c0_51 = arith.constant 0 : index
    %60 = vector.load %arg3[%c1, %c0_50, %c0_51] : memref<4x64x4xf32, #tpu.memory_space<vmem>>, vector<1x64x4xf32>
    %61 = vector.shape_cast %60 : vector<1x64x4xf32> to vector<64x4xf32>
    %cst_52 = arith.constant dense<0.000000e+00> : vector<64x512xf32>
    %62 = tpu.matmul %61, %59, %cst_52 {dimension_numbers = #tpu.dot_dimension_numbers<[1], [0], [0], [1], [0, 0, 1, 1], [], []>} : vector<64x4xf32>, vector<4x512xf32>, vector<64x512xf32> -> vector<64x512xf32>
    %c1_53 = arith.constant 1 : index
    %c0_54 = arith.constant 0 : index
    %c0_55 = arith.constant 0 : index
    %63 = vector.load %arg4[%c1_53, %c0_54, %c0_55] : memref<4x64x1xf32, #tpu.memory_space<vmem>>, vector<1x64x1xf32>
    %64 = vector.shape_cast %63 : vector<1x64x1xf32> to vector<64x1xf32>
    %65 = vector.broadcast %64 : vector<64x1xf32> to vector<64x512xf32>
    %66 = arith.addf %62, %65 : vector<64x512xf32>
    %cst_56 = arith.constant 0.000000e+00 : f32
    %67 = vector.broadcast %cst_56 : f32 to vector<64x512xf32>
    %68 = arith.maximumf %66, %67 : vector<64x512xf32>
    %c1_57 = arith.constant 1 : index
    %c0_58 = arith.constant 0 : index
    %c0_59 = arith.constant 0 : index
    %69 = vector.load %arg5[%c1_57, %c0_58, %c0_59] : memref<4x64x64xf32, #tpu.memory_space<vmem>>, vector<1x64x64xf32>
    %70 = vector.shape_cast %69 : vector<1x64x64xf32> to vector<64x64xf32>
    %cst_60 = arith.constant dense<0.000000e+00> : vector<64x512xf32>
    %71 = tpu.matmul %70, %68, %cst_60 {dimension_numbers = #tpu.dot_dimension_numbers<[1], [0], [0], [1], [0, 0, 1, 1], [], []>} : vector<64x64xf32>, vector<64x512xf32>, vector<64x512xf32> -> vector<64x512xf32>
    %c1_61 = arith.constant 1 : index
    %c0_62 = arith.constant 0 : index
    %c0_63 = arith.constant 0 : index
    %72 = vector.load %arg6[%c1_61, %c0_62, %c0_63] : memref<4x64x1xf32, #tpu.memory_space<vmem>>, vector<1x64x1xf32>
    %73 = vector.shape_cast %72 : vector<1x64x1xf32> to vector<64x1xf32>
    %74 = vector.broadcast %73 : vector<64x1xf32> to vector<64x512xf32>
    %75 = arith.addf %71, %74 : vector<64x512xf32>
    %cst_64 = arith.constant 0.000000e+00 : f32
    %76 = vector.broadcast %cst_64 : f32 to vector<64x512xf32>
    %77 = arith.maximumf %75, %76 : vector<64x512xf32>
    %c1_65 = arith.constant 1 : index
    %c0_66 = arith.constant 0 : index
    %c0_67 = arith.constant 0 : index
    %78 = vector.load %arg7[%c1_65, %c0_66, %c0_67] : memref<4x64x64xf32, #tpu.memory_space<vmem>>, vector<1x64x64xf32>
    %79 = vector.shape_cast %78 : vector<1x64x64xf32> to vector<64x64xf32>
    %cst_68 = arith.constant dense<0.000000e+00> : vector<64x512xf32>
    %80 = tpu.matmul %79, %77, %cst_68 {dimension_numbers = #tpu.dot_dimension_numbers<[1], [0], [0], [1], [0, 0, 1, 1], [], []>} : vector<64x64xf32>, vector<64x512xf32>, vector<64x512xf32> -> vector<64x512xf32>
    %c1_69 = arith.constant 1 : index
    %c0_70 = arith.constant 0 : index
    %c0_71 = arith.constant 0 : index
    %81 = vector.load %arg8[%c1_69, %c0_70, %c0_71] : memref<4x64x1xf32, #tpu.memory_space<vmem>>, vector<1x64x1xf32>
    %82 = vector.shape_cast %81 : vector<1x64x1xf32> to vector<64x1xf32>
    %83 = vector.broadcast %82 : vector<64x1xf32> to vector<64x512xf32>
    %84 = arith.addf %80, %83 : vector<64x512xf32>
    %cst_72 = arith.constant 0.000000e+00 : f32
    %85 = vector.broadcast %cst_72 : f32 to vector<64x512xf32>
    %86 = arith.maximumf %84, %85 : vector<64x512xf32>
    %c1_73 = arith.constant 1 : index
    %c0_74 = arith.constant 0 : index
    %c0_75 = arith.constant 0 : index
    %87 = vector.load %arg9[%c1_73, %c0_74, %c0_75] : memref<4x64x64xf32, #tpu.memory_space<vmem>>, vector<1x64x64xf32>
    %88 = vector.shape_cast %87 : vector<1x64x64xf32> to vector<64x64xf32>
    %cst_76 = arith.constant dense<0.000000e+00> : vector<64x512xf32>
    %89 = tpu.matmul %88, %86, %cst_76 {dimension_numbers = #tpu.dot_dimension_numbers<[1], [0], [0], [1], [0, 0, 1, 1], [], []>} : vector<64x64xf32>, vector<64x512xf32>, vector<64x512xf32> -> vector<64x512xf32>
    %c1_77 = arith.constant 1 : index
    %c0_78 = arith.constant 0 : index
    %c0_79 = arith.constant 0 : index
    %90 = vector.load %arg10[%c1_77, %c0_78, %c0_79] : memref<4x64x1xf32, #tpu.memory_space<vmem>>, vector<1x64x1xf32>
    %91 = vector.shape_cast %90 : vector<1x64x1xf32> to vector<64x1xf32>
    %92 = vector.broadcast %91 : vector<64x1xf32> to vector<64x512xf32>
    %93 = arith.addf %89, %92 : vector<64x512xf32>
    %cst_80 = arith.constant 0.000000e+00 : f32
    %94 = vector.broadcast %cst_80 : f32 to vector<64x512xf32>
    %95 = arith.maximumf %93, %94 : vector<64x512xf32>
    %c1_81 = arith.constant 1 : index
    %c0_82 = arith.constant 0 : index
    %c0_83 = arith.constant 0 : index
    %96 = vector.load %arg11[%c1_81, %c0_82, %c0_83] : memref<4x4x64xf32, #tpu.memory_space<vmem>>, vector<1x4x64xf32>
    %97 = vector.shape_cast %96 : vector<1x4x64xf32> to vector<4x64xf32>
    %cst_84 = arith.constant dense<0.000000e+00> : vector<4x512xf32>
    %98 = tpu.matmul %97, %95, %cst_84 {dimension_numbers = #tpu.dot_dimension_numbers<[1], [0], [0], [1], [0, 0, 1, 1], [], []>} : vector<4x64xf32>, vector<64x512xf32>, vector<4x512xf32> -> vector<4x512xf32>
    %c1_85 = arith.constant 1 : index
    %c0_86 = arith.constant 0 : index
    %c0_87 = arith.constant 0 : index
    %99 = vector.load %arg12[%c1_85, %c0_86, %c0_87] : memref<4x4x1xf32, #tpu.memory_space<vmem>>, vector<1x4x1xf32>
    %100 = vector.shape_cast %99 : vector<1x4x1xf32> to vector<4x1xf32>
    %101 = vector.broadcast %100 : vector<4x1xf32> to vector<4x512xf32>
    %102 = arith.addf %98, %101 : vector<4x512xf32>
    %103 = math.tanh %102 : vector<4x512xf32>
    %cst_88 = arith.constant 3.000000e+00 : f32
    %104 = vector.broadcast %cst_88 : f32 to vector<4x512xf32>
    %105 = arith.mulf %104, %103 : vector<4x512xf32>
    %c1_89 = arith.constant 1 : index
    %c0_90 = arith.constant 0 : index
    %c0_91 = arith.constant 0 : index
    %106 = vector.load %arg13[%c1_89, %c0_90, %c0_91] : memref<4x4x64xf32, #tpu.memory_space<vmem>>, vector<1x4x64xf32>
    %107 = vector.shape_cast %106 : vector<1x4x64xf32> to vector<4x64xf32>
    %cst_92 = arith.constant dense<0.000000e+00> : vector<4x512xf32>
    %108 = tpu.matmul %107, %95, %cst_92 {dimension_numbers = #tpu.dot_dimension_numbers<[1], [0], [0], [1], [0, 0, 1, 1], [], []>} : vector<4x64xf32>, vector<64x512xf32>, vector<4x512xf32> -> vector<4x512xf32>
    %c1_93 = arith.constant 1 : index
    %c0_94 = arith.constant 0 : index
    %c0_95 = arith.constant 0 : index
    %109 = vector.load %arg14[%c1_93, %c0_94, %c0_95] : memref<4x4x1xf32, #tpu.memory_space<vmem>>, vector<1x4x1xf32>
    %110 = vector.shape_cast %109 : vector<1x4x1xf32> to vector<4x1xf32>
    %111 = vector.broadcast %110 : vector<4x1xf32> to vector<4x512xf32>
    %112 = arith.addf %108, %111 : vector<4x512xf32>
    %cst_96 = arith.constant 3.000000e+00 : f32
    %113 = vector.broadcast %cst_96 : f32 to vector<4x512xf32>
    %114 = arith.mulf %113, %112 : vector<4x512xf32>
    %115 = math.exp %105 : vector<4x512xf32>
    %116 = arith.mulf %0, %115 : vector<4x512xf32>
    %117 = arith.addf %116, %114 : vector<4x512xf32>
    %118 = arith.addf %47, %105 : vector<4x512xf32>
    %c2 = arith.constant 2 : index
    %c0_97 = arith.constant 0 : index
    %c0_98 = arith.constant 0 : index
    %119 = vector.load %arg3[%c2, %c0_97, %c0_98] : memref<4x64x4xf32, #tpu.memory_space<vmem>>, vector<1x64x4xf32>
    %120 = vector.shape_cast %119 : vector<1x64x4xf32> to vector<64x4xf32>
    %cst_99 = arith.constant dense<0.000000e+00> : vector<64x512xf32>
    %121 = tpu.matmul %120, %117, %cst_99 {dimension_numbers = #tpu.dot_dimension_numbers<[1], [0], [0], [1], [0, 0, 1, 1], [], []>} : vector<64x4xf32>, vector<4x512xf32>, vector<64x512xf32> -> vector<64x512xf32>
    %c2_100 = arith.constant 2 : index
    %c0_101 = arith.constant 0 : index
    %c0_102 = arith.constant 0 : index
    %122 = vector.load %arg4[%c2_100, %c0_101, %c0_102] : memref<4x64x1xf32, #tpu.memory_space<vmem>>, vector<1x64x1xf32>
    %123 = vector.shape_cast %122 : vector<1x64x1xf32> to vector<64x1xf32>
    %124 = vector.broadcast %123 : vector<64x1xf32> to vector<64x512xf32>
    %125 = arith.addf %121, %124 : vector<64x512xf32>
    %cst_103 = arith.constant 0.000000e+00 : f32
    %126 = vector.broadcast %cst_103 : f32 to vector<64x512xf32>
    %127 = arith.maximumf %125, %126 : vector<64x512xf32>
    %c2_104 = arith.constant 2 : index
    %c0_105 = arith.constant 0 : index
    %c0_106 = arith.constant 0 : index
    %128 = vector.load %arg5[%c2_104, %c0_105, %c0_106] : memref<4x64x64xf32, #tpu.memory_space<vmem>>, vector<1x64x64xf32>
    %129 = vector.shape_cast %128 : vector<1x64x64xf32> to vector<64x64xf32>
    %cst_107 = arith.constant dense<0.000000e+00> : vector<64x512xf32>
    %130 = tpu.matmul %129, %127, %cst_107 {dimension_numbers = #tpu.dot_dimension_numbers<[1], [0], [0], [1], [0, 0, 1, 1], [], []>} : vector<64x64xf32>, vector<64x512xf32>, vector<64x512xf32> -> vector<64x512xf32>
    %c2_108 = arith.constant 2 : index
    %c0_109 = arith.constant 0 : index
    %c0_110 = arith.constant 0 : index
    %131 = vector.load %arg6[%c2_108, %c0_109, %c0_110] : memref<4x64x1xf32, #tpu.memory_space<vmem>>, vector<1x64x1xf32>
    %132 = vector.shape_cast %131 : vector<1x64x1xf32> to vector<64x1xf32>
    %133 = vector.broadcast %132 : vector<64x1xf32> to vector<64x512xf32>
    %134 = arith.addf %130, %133 : vector<64x512xf32>
    %cst_111 = arith.constant 0.000000e+00 : f32
    %135 = vector.broadcast %cst_111 : f32 to vector<64x512xf32>
    %136 = arith.maximumf %134, %135 : vector<64x512xf32>
    %c2_112 = arith.constant 2 : index
    %c0_113 = arith.constant 0 : index
    %c0_114 = arith.constant 0 : index
    %137 = vector.load %arg7[%c2_112, %c0_113, %c0_114] : memref<4x64x64xf32, #tpu.memory_space<vmem>>, vector<1x64x64xf32>
    %138 = vector.shape_cast %137 : vector<1x64x64xf32> to vector<64x64xf32>
    %cst_115 = arith.constant dense<0.000000e+00> : vector<64x512xf32>
    %139 = tpu.matmul %138, %136, %cst_115 {dimension_numbers = #tpu.dot_dimension_numbers<[1], [0], [0], [1], [0, 0, 1, 1], [], []>} : vector<64x64xf32>, vector<64x512xf32>, vector<64x512xf32> -> vector<64x512xf32>
    %c2_116 = arith.constant 2 : index
    %c0_117 = arith.constant 0 : index
    %c0_118 = arith.constant 0 : index
    %140 = vector.load %arg8[%c2_116, %c0_117, %c0_118] : memref<4x64x1xf32, #tpu.memory_space<vmem>>, vector<1x64x1xf32>
    %141 = vector.shape_cast %140 : vector<1x64x1xf32> to vector<64x1xf32>
    %142 = vector.broadcast %141 : vector<64x1xf32> to vector<64x512xf32>
    %143 = arith.addf %139, %142 : vector<64x512xf32>
    %cst_119 = arith.constant 0.000000e+00 : f32
    %144 = vector.broadcast %cst_119 : f32 to vector<64x512xf32>
    %145 = arith.maximumf %143, %144 : vector<64x512xf32>
    %c2_120 = arith.constant 2 : index
    %c0_121 = arith.constant 0 : index
    %c0_122 = arith.constant 0 : index
    %146 = vector.load %arg9[%c2_120, %c0_121, %c0_122] : memref<4x64x64xf32, #tpu.memory_space<vmem>>, vector<1x64x64xf32>
    %147 = vector.shape_cast %146 : vector<1x64x64xf32> to vector<64x64xf32>
    %cst_123 = arith.constant dense<0.000000e+00> : vector<64x512xf32>
    %148 = tpu.matmul %147, %145, %cst_123 {dimension_numbers = #tpu.dot_dimension_numbers<[1], [0], [0], [1], [0, 0, 1, 1], [], []>} : vector<64x64xf32>, vector<64x512xf32>, vector<64x512xf32> -> vector<64x512xf32>
    %c2_124 = arith.constant 2 : index
    %c0_125 = arith.constant 0 : index
    %c0_126 = arith.constant 0 : index
    %149 = vector.load %arg10[%c2_124, %c0_125, %c0_126] : memref<4x64x1xf32, #tpu.memory_space<vmem>>, vector<1x64x1xf32>
    %150 = vector.shape_cast %149 : vector<1x64x1xf32> to vector<64x1xf32>
    %151 = vector.broadcast %150 : vector<64x1xf32> to vector<64x512xf32>
    %152 = arith.addf %148, %151 : vector<64x512xf32>
    %cst_127 = arith.constant 0.000000e+00 : f32
    %153 = vector.broadcast %cst_127 : f32 to vector<64x512xf32>
    %154 = arith.maximumf %152, %153 : vector<64x512xf32>
    %c2_128 = arith.constant 2 : index
    %c0_129 = arith.constant 0 : index
    %c0_130 = arith.constant 0 : index
    %155 = vector.load %arg11[%c2_128, %c0_129, %c0_130] : memref<4x4x64xf32, #tpu.memory_space<vmem>>, vector<1x4x64xf32>
    %156 = vector.shape_cast %155 : vector<1x4x64xf32> to vector<4x64xf32>
    %cst_131 = arith.constant dense<0.000000e+00> : vector<4x512xf32>
    %157 = tpu.matmul %156, %154, %cst_131 {dimension_numbers = #tpu.dot_dimension_numbers<[1], [0], [0], [1], [0, 0, 1, 1], [], []>} : vector<4x64xf32>, vector<64x512xf32>, vector<4x512xf32> -> vector<4x512xf32>
    %c2_132 = arith.constant 2 : index
    %c0_133 = arith.constant 0 : index
    %c0_134 = arith.constant 0 : index
    %158 = vector.load %arg12[%c2_132, %c0_133, %c0_134] : memref<4x4x1xf32, #tpu.memory_space<vmem>>, vector<1x4x1xf32>
    %159 = vector.shape_cast %158 : vector<1x4x1xf32> to vector<4x1xf32>
    %160 = vector.broadcast %159 : vector<4x1xf32> to vector<4x512xf32>
    %161 = arith.addf %157, %160 : vector<4x512xf32>
    %162 = math.tanh %161 : vector<4x512xf32>
    %cst_135 = arith.constant 3.000000e+00 : f32
    %163 = vector.broadcast %cst_135 : f32 to vector<4x512xf32>
    %164 = arith.mulf %163, %162 : vector<4x512xf32>
    %c2_136 = arith.constant 2 : index
    %c0_137 = arith.constant 0 : index
    %c0_138 = arith.constant 0 : index
    %165 = vector.load %arg13[%c2_136, %c0_137, %c0_138] : memref<4x4x64xf32, #tpu.memory_space<vmem>>, vector<1x4x64xf32>
    %166 = vector.shape_cast %165 : vector<1x4x64xf32> to vector<4x64xf32>
    %cst_139 = arith.constant dense<0.000000e+00> : vector<4x512xf32>
    %167 = tpu.matmul %166, %154, %cst_139 {dimension_numbers = #tpu.dot_dimension_numbers<[1], [0], [0], [1], [0, 0, 1, 1], [], []>} : vector<4x64xf32>, vector<64x512xf32>, vector<4x512xf32> -> vector<4x512xf32>
    %c2_140 = arith.constant 2 : index
    %c0_141 = arith.constant 0 : index
    %c0_142 = arith.constant 0 : index
    %168 = vector.load %arg14[%c2_140, %c0_141, %c0_142] : memref<4x4x1xf32, #tpu.memory_space<vmem>>, vector<1x4x1xf32>
    %169 = vector.shape_cast %168 : vector<1x4x1xf32> to vector<4x1xf32>
    %170 = vector.broadcast %169 : vector<4x1xf32> to vector<4x512xf32>
    %171 = arith.addf %167, %170 : vector<4x512xf32>
    %cst_143 = arith.constant 3.000000e+00 : f32
    %172 = vector.broadcast %cst_143 : f32 to vector<4x512xf32>
    %173 = arith.mulf %172, %171 : vector<4x512xf32>
    %174 = math.exp %164 : vector<4x512xf32>
    %175 = arith.mulf %59, %174 : vector<4x512xf32>
    %176 = arith.addf %175, %173 : vector<4x512xf32>
    %177 = arith.addf %118, %164 : vector<4x512xf32>
    %c3 = arith.constant 3 : index
    %c0_144 = arith.constant 0 : index
    %c0_145 = arith.constant 0 : index
    %178 = vector.load %arg3[%c3, %c0_144, %c0_145] : memref<4x64x4xf32, #tpu.memory_space<vmem>>, vector<1x64x4xf32>
    %179 = vector.shape_cast %178 : vector<1x64x4xf32> to vector<64x4xf32>
    %cst_146 = arith.constant dense<0.000000e+00> : vector<64x512xf32>
    %180 = tpu.matmul %179, %176, %cst_146 {dimension_numbers = #tpu.dot_dimension_numbers<[1], [0], [0], [1], [0, 0, 1, 1], [], []>} : vector<64x4xf32>, vector<4x512xf32>, vector<64x512xf32> -> vector<64x512xf32>
    %c3_147 = arith.constant 3 : index
    %c0_148 = arith.constant 0 : index
    %c0_149 = arith.constant 0 : index
    %181 = vector.load %arg4[%c3_147, %c0_148, %c0_149] : memref<4x64x1xf32, #tpu.memory_space<vmem>>, vector<1x64x1xf32>
    %182 = vector.shape_cast %181 : vector<1x64x1xf32> to vector<64x1xf32>
    %183 = vector.broadcast %182 : vector<64x1xf32> to vector<64x512xf32>
    %184 = arith.addf %180, %183 : vector<64x512xf32>
    %cst_150 = arith.constant 0.000000e+00 : f32
    %185 = vector.broadcast %cst_150 : f32 to vector<64x512xf32>
    %186 = arith.maximumf %184, %185 : vector<64x512xf32>
    %c3_151 = arith.constant 3 : index
    %c0_152 = arith.constant 0 : index
    %c0_153 = arith.constant 0 : index
    %187 = vector.load %arg5[%c3_151, %c0_152, %c0_153] : memref<4x64x64xf32, #tpu.memory_space<vmem>>, vector<1x64x64xf32>
    %188 = vector.shape_cast %187 : vector<1x64x64xf32> to vector<64x64xf32>
    %cst_154 = arith.constant dense<0.000000e+00> : vector<64x512xf32>
    %189 = tpu.matmul %188, %186, %cst_154 {dimension_numbers = #tpu.dot_dimension_numbers<[1], [0], [0], [1], [0, 0, 1, 1], [], []>} : vector<64x64xf32>, vector<64x512xf32>, vector<64x512xf32> -> vector<64x512xf32>
    %c3_155 = arith.constant 3 : index
    %c0_156 = arith.constant 0 : index
    %c0_157 = arith.constant 0 : index
    %190 = vector.load %arg6[%c3_155, %c0_156, %c0_157] : memref<4x64x1xf32, #tpu.memory_space<vmem>>, vector<1x64x1xf32>
    %191 = vector.shape_cast %190 : vector<1x64x1xf32> to vector<64x1xf32>
    %192 = vector.broadcast %191 : vector<64x1xf32> to vector<64x512xf32>
    %193 = arith.addf %189, %192 : vector<64x512xf32>
    %cst_158 = arith.constant 0.000000e+00 : f32
    %194 = vector.broadcast %cst_158 : f32 to vector<64x512xf32>
    %195 = arith.maximumf %193, %194 : vector<64x512xf32>
    %c3_159 = arith.constant 3 : index
    %c0_160 = arith.constant 0 : index
    %c0_161 = arith.constant 0 : index
    %196 = vector.load %arg7[%c3_159, %c0_160, %c0_161] : memref<4x64x64xf32, #tpu.memory_space<vmem>>, vector<1x64x64xf32>
    %197 = vector.shape_cast %196 : vector<1x64x64xf32> to vector<64x64xf32>
    %cst_162 = arith.constant dense<0.000000e+00> : vector<64x512xf32>
    %198 = tpu.matmul %197, %195, %cst_162 {dimension_numbers = #tpu.dot_dimension_numbers<[1], [0], [0], [1], [0, 0, 1, 1], [], []>} : vector<64x64xf32>, vector<64x512xf32>, vector<64x512xf32> -> vector<64x512xf32>
    %c3_163 = arith.constant 3 : index
    %c0_164 = arith.constant 0 : index
    %c0_165 = arith.constant 0 : index
    %199 = vector.load %arg8[%c3_163, %c0_164, %c0_165] : memref<4x64x1xf32, #tpu.memory_space<vmem>>, vector<1x64x1xf32>
    %200 = vector.shape_cast %199 : vector<1x64x1xf32> to vector<64x1xf32>
    %201 = vector.broadcast %200 : vector<64x1xf32> to vector<64x512xf32>
    %202 = arith.addf %198, %201 : vector<64x512xf32>
    %cst_166 = arith.constant 0.000000e+00 : f32
    %203 = vector.broadcast %cst_166 : f32 to vector<64x512xf32>
    %204 = arith.maximumf %202, %203 : vector<64x512xf32>
    %c3_167 = arith.constant 3 : index
    %c0_168 = arith.constant 0 : index
    %c0_169 = arith.constant 0 : index
    %205 = vector.load %arg9[%c3_167, %c0_168, %c0_169] : memref<4x64x64xf32, #tpu.memory_space<vmem>>, vector<1x64x64xf32>
    %206 = vector.shape_cast %205 : vector<1x64x64xf32> to vector<64x64xf32>
    %cst_170 = arith.constant dense<0.000000e+00> : vector<64x512xf32>
    %207 = tpu.matmul %206, %204, %cst_170 {dimension_numbers = #tpu.dot_dimension_numbers<[1], [0], [0], [1], [0, 0, 1, 1], [], []>} : vector<64x64xf32>, vector<64x512xf32>, vector<64x512xf32> -> vector<64x512xf32>
    %c3_171 = arith.constant 3 : index
    %c0_172 = arith.constant 0 : index
    %c0_173 = arith.constant 0 : index
    %208 = vector.load %arg10[%c3_171, %c0_172, %c0_173] : memref<4x64x1xf32, #tpu.memory_space<vmem>>, vector<1x64x1xf32>
    %209 = vector.shape_cast %208 : vector<1x64x1xf32> to vector<64x1xf32>
    %210 = vector.broadcast %209 : vector<64x1xf32> to vector<64x512xf32>
    %211 = arith.addf %207, %210 : vector<64x512xf32>
    %cst_174 = arith.constant 0.000000e+00 : f32
    %212 = vector.broadcast %cst_174 : f32 to vector<64x512xf32>
    %213 = arith.maximumf %211, %212 : vector<64x512xf32>
    %c3_175 = arith.constant 3 : index
    %c0_176 = arith.constant 0 : index
    %c0_177 = arith.constant 0 : index
    %214 = vector.load %arg11[%c3_175, %c0_176, %c0_177] : memref<4x4x64xf32, #tpu.memory_space<vmem>>, vector<1x4x64xf32>
    %215 = vector.shape_cast %214 : vector<1x4x64xf32> to vector<4x64xf32>
    %cst_178 = arith.constant dense<0.000000e+00> : vector<4x512xf32>
    %216 = tpu.matmul %215, %213, %cst_178 {dimension_numbers = #tpu.dot_dimension_numbers<[1], [0], [0], [1], [0, 0, 1, 1], [], []>} : vector<4x64xf32>, vector<64x512xf32>, vector<4x512xf32> -> vector<4x512xf32>
    %c3_179 = arith.constant 3 : index
    %c0_180 = arith.constant 0 : index
    %c0_181 = arith.constant 0 : index
    %217 = vector.load %arg12[%c3_179, %c0_180, %c0_181] : memref<4x4x1xf32, #tpu.memory_space<vmem>>, vector<1x4x1xf32>
    %218 = vector.shape_cast %217 : vector<1x4x1xf32> to vector<4x1xf32>
    %219 = vector.broadcast %218 : vector<4x1xf32> to vector<4x512xf32>
    %220 = arith.addf %216, %219 : vector<4x512xf32>
    %221 = math.tanh %220 : vector<4x512xf32>
    %cst_182 = arith.constant 3.000000e+00 : f32
    %222 = vector.broadcast %cst_182 : f32 to vector<4x512xf32>
    %223 = arith.mulf %222, %221 : vector<4x512xf32>
    %c3_183 = arith.constant 3 : index
    %c0_184 = arith.constant 0 : index
    %c0_185 = arith.constant 0 : index
    %224 = vector.load %arg13[%c3_183, %c0_184, %c0_185] : memref<4x4x64xf32, #tpu.memory_space<vmem>>, vector<1x4x64xf32>
    %225 = vector.shape_cast %224 : vector<1x4x64xf32> to vector<4x64xf32>
    %cst_186 = arith.constant dense<0.000000e+00> : vector<4x512xf32>
    %226 = tpu.matmul %225, %213, %cst_186 {dimension_numbers = #tpu.dot_dimension_numbers<[1], [0], [0], [1], [0, 0, 1, 1], [], []>} : vector<4x64xf32>, vector<64x512xf32>, vector<4x512xf32> -> vector<4x512xf32>
    %c3_187 = arith.constant 3 : index
    %c0_188 = arith.constant 0 : index
    %c0_189 = arith.constant 0 : index
    %227 = vector.load %arg14[%c3_187, %c0_188, %c0_189] : memref<4x4x1xf32, #tpu.memory_space<vmem>>, vector<1x4x1xf32>
    %228 = vector.shape_cast %227 : vector<1x4x1xf32> to vector<4x1xf32>
    %229 = vector.broadcast %228 : vector<4x1xf32> to vector<4x512xf32>
    %230 = arith.addf %226, %229 : vector<4x512xf32>
    %cst_190 = arith.constant 3.000000e+00 : f32
    %231 = vector.broadcast %cst_190 : f32 to vector<4x512xf32>
    %232 = arith.mulf %231, %230 : vector<4x512xf32>
    %233 = math.exp %223 : vector<4x512xf32>
    %234 = arith.mulf %117, %233 : vector<4x512xf32>
    %235 = arith.addf %234, %232 : vector<4x512xf32>
    %236 = arith.addf %177, %223 : vector<4x512xf32>
    %c0_191 = arith.constant 0 : index
    %c0_192 = arith.constant 0 : index
    %237 = vector.load %arg15[%c0_191, %c0_192] : memref<4x512xf32, #tpu.memory_space<vmem>>, vector<4x512xf32>
    tpu.vector_store %arg15[%c0_191, %c0_192], %235 {strides = array<i32>} : memref<4x512xf32, #tpu.memory_space<vmem>>, vector<4x512xf32>,
    %c0_193 = arith.constant 0 : index
    %c0_194 = arith.constant 0 : index
    %238 = vector.load %arg16[%c0_193, %c0_194] : memref<4x512xf32, #tpu.memory_space<vmem>>, vector<4x512xf32>
    tpu.vector_store %arg16[%c0_193, %c0_194], %176 {strides = array<i32>} : memref<4x512xf32, #tpu.memory_space<vmem>>, vector<4x512xf32>,
    %cst_195 = arith.constant dense<0.000000e+00> : vector<512xf32>
    %239 = vector.multi_reduction <add>, %236, %cst_195 [0] : vector<4x512xf32> to vector<512xf32>
    %240 = vector.shape_cast %239 : vector<512xf32> to vector<1x512xf32>
    %c0_196 = arith.constant 0 : index
    %c0_197 = arith.constant 0 : index
    %241 = vector.load %arg17[%c0_196, %c0_197] : memref<1x512xf32, #tpu.memory_space<vmem>>, vector<1x512xf32>
    tpu.vector_store %arg17[%c0_196, %c0_197], %240 {strides = array<i32>} : memref<1x512xf32, #tpu.memory_space<vmem>>, vector<1x512xf32>,
    return
  }
  func.func @transform_0(%arg0: i32) -> (i32, i32) {
    %c0_i32 = arith.constant 0 : i32
    %c0_i32_0 = arith.constant 0 : i32
    return %c0_i32, %arg0 : i32, i32
  }
  func.func @transform_1(%arg0: i32) -> (i32, i32) {
    %c0_i32 = arith.constant 0 : i32
    %c0_i32_0 = arith.constant 0 : i32
    return %c0_i32, %arg0 : i32, i32
  }
  func.func @transform_2(%arg0: i32) -> (i32, i32, i32) {
    %c0_i32 = arith.constant 0 : i32
    %c0_i32_0 = arith.constant 0 : i32
    %c0_i32_1 = arith.constant 0 : i32
    %c0_i32_2 = arith.constant 0 : i32
    return %c0_i32, %c0_i32_0, %c0_i32_1 : i32, i32, i32
  }
  func.func @transform_3(%arg0: i32) -> (i32, i32, i32) {
    %c0_i32 = arith.constant 0 : i32
    %c0_i32_0 = arith.constant 0 : i32
    %c0_i32_1 = arith.constant 0 : i32
    %c0_i32_2 = arith.constant 0 : i32
    return %c0_i32, %c0_i32_0, %c0_i32_1 : i32, i32, i32
  }
  func.func @transform_4(%arg0: i32) -> (i32, i32, i32) {
    %c0_i32 = arith.constant 0 : i32
    %c0_i32_0 = arith.constant 0 : i32
    %c0_i32_1 = arith.constant 0 : i32
    %c0_i32_2 = arith.constant 0 : i32
    return %c0_i32, %c0_i32_0, %c0_i32_1 : i32, i32, i32
  }
  func.func @transform_5(%arg0: i32) -> (i32, i32, i32) {
    %c0_i32 = arith.constant 0 : i32
    %c0_i32_0 = arith.constant 0 : i32
    %c0_i32_1 = arith.constant 0 : i32
    %c0_i32_2 = arith.constant 0 : i32
    return %c0_i32, %c0_i32_0, %c0_i32_1 : i32, i32, i32
  }
  func.func @transform_6(%arg0: i32) -> (i32, i32, i32) {
    %c0_i32 = arith.constant 0 : i32
    %c0_i32_0 = arith.constant 0 : i32
    %c0_i32_1 = arith.constant 0 : i32
    %c0_i32_2 = arith.constant 0 : i32
    return %c0_i32, %c0_i32_0, %c0_i32_1 : i32, i32, i32
  }
  func.func @transform_7(%arg0: i32) -> (i32, i32, i32) {
    %c0_i32 = arith.constant 0 : i32
    %c0_i32_0 = arith.constant 0 : i32
    %c0_i32_1 = arith.constant 0 : i32
    %c0_i32_2 = arith.constant 0 : i32
    return %c0_i32, %c0_i32_0, %c0_i32_1 : i32, i32, i32
  }
  func.func @transform_8(%arg0: i32) -> (i32, i32, i32) {
    %c0_i32 = arith.constant 0 : i32
    %c0_i32_0 = arith.constant 0 : i32
    %c0_i32_1 = arith.constant 0 : i32
    %c0_i32_2 = arith.constant 0 : i32
    return %c0_i32, %c0_i32_0, %c0_i32_1 : i32, i32, i32
  }
  func.func @transform_9(%arg0: i32) -> (i32, i32, i32) {
    %c0_i32 = arith.constant 0 : i32
    %c0_i32_0 = arith.constant 0 : i32
    %c0_i32_1 = arith.constant 0 : i32
    %c0_i32_2 = arith.constant 0 : i32
    return %c0_i32, %c0_i32_0, %c0_i32_1 : i32, i32, i32
  }
  func.func @transform_10(%arg0: i32) -> (i32, i32, i32) {
    %c0_i32 = arith.constant 0 : i32
    %c0_i32_0 = arith.constant 0 : i32
    %c0_i32_1 = arith.constant 0 : i32
    %c0_i32_2 = arith.constant 0 : i32
    return %c0_i32, %c0_i32_0, %c0_i32_1 : i32, i32, i32
  }
  func.func @transform_11(%arg0: i32) -> (i32, i32, i32) {
    %c0_i32 = arith.constant 0 : i32
    %c0_i32_0 = arith.constant 0 : i32
    %c0_i32_1 = arith.constant 0 : i32
    %c0_i32_2 = arith.constant 0 : i32
    return %c0_i32, %c0_i32_0, %c0_i32_1 : i32, i32, i32
  }
  func.func @transform_12(%arg0: i32) -> (i32, i32, i32) {
    %c0_i32 = arith.constant 0 : i32
    %c0_i32_0 = arith.constant 0 : i32
    %c0_i32_1 = arith.constant 0 : i32
    %c0_i32_2 = arith.constant 0 : i32
    return %c0_i32, %c0_i32_0, %c0_i32_1 : i32, i32, i32
  }
  func.func @transform_13(%arg0: i32) -> (i32, i32, i32) {
    %c0_i32 = arith.constant 0 : i32
    %c0_i32_0 = arith.constant 0 : i32
    %c0_i32_1 = arith.constant 0 : i32
    %c0_i32_2 = arith.constant 0 : i32
    return %c0_i32, %c0_i32_0, %c0_i32_1 : i32, i32, i32
  }
  func.func @transform_14(%arg0: i32) -> (i32, i32) {
    %c0_i32 = arith.constant 0 : i32
    %c0_i32_0 = arith.constant 0 : i32
    return %c0_i32, %arg0 : i32, i32
  }
  func.func @transform_15(%arg0: i32) -> (i32, i32) {
    %c0_i32 = arith.constant 0 : i32
    %c0_i32_0 = arith.constant 0 : i32
    return %c0_i32, %arg0 : i32, i32
  }
  func.func @transform_16(%arg0: i32) -> (i32, i32) {
    %c0_i32 = arith.constant 0 : i32
    %c0_i32_0 = arith.constant 0 : i32
    return %c0_i32, %arg0 : i32, i32
  }
}

</mosaic_0001>

<bundles_post_ra>
// kernel: nvp_forward.1
= control target key start
LH: loop header
LB: loop body
LE: loop exit
PB: predicated region body
PF: predicated region fallthrough
CT: control target
= control target key end

     0   :  { %s11028_s0 = inlined_call_operand.vmem [shape: f32[4,1024], index: 0, kind: input, shape index: {}]   ;;  %s11029_s1 = inlined_call_operand.vmem [shape: f32[4,1024], index: 1, kind: input, shape index: {}]   ;;  %s11030_s2 = inlined_call_operand.vmem [shape: f32[4,64,4], index: 2, kind: input, shape index: {}]   ;;  %s11031_s3 = inlined_call_operand.vmem [shape: f32[4,64,1], index: 3, kind: input, shape index: {}]   ;;  %s11032_s4 = inlined_call_operand.vmem [shape: f32[4,64,64], index: 4, kind: input, shape index: {}]   ;;  %s11033_s5 = inlined_call_operand.vmem [shape: f32[4,64,1], index: 5, kind: input, shape index: {}]   ;;  %s11034_s6 = inlined_call_operand.vmem [shape: f32[4,64,64], index: 6, kind: input, shape index: {}]   ;;  %s11035_s7 = inlined_call_operand.vmem [shape: f32[4,64,1], index: 7, kind: input, shape index: {}]   ;;  %s11036_s8 = inlined_call_operand.vmem [shape: f32[4,64,64], index: 8, kind: input, shape index: {}]   ;;  %s11037_s9 = inlined_call_operand.vmem [shape: f32[4,64,1], index: 9, kind: input, shape index: {}]   ;;  %s11038_s10 = inlined_call_operand.vmem [shape: f32[4,4,64], index: 10, kind: input, shape index: {}]   ;;  %s11039_s11 = inlined_call_operand.vmem [shape: f32[4,4,1], index: 11, kind: input, shape index: {}]   ;;  %s11040_s12 = inlined_call_operand.vmem [shape: f32[4,4,64], index: 12, kind: input, shape index: {}]   ;;  %s11041_s13 = inlined_call_operand.vmem [shape: f32[4,4,1], index: 13, kind: input, shape index: {}]   ;;  %s11042_s14 = inlined_call_operand.vmem [shape: f32[4,1024], index: 14, kind: output, shape index: {0}]   ;;  %s11043_s15 = inlined_call_operand.vmem [shape: f32[4,1024], index: 15, kind: output, shape index: {1}]   ;;  %s11044_s16 = inlined_call_operand.hbm [shape: f32[1,1024], index: 16, kind: output, shape index: {2}]  }
   0x1   :  { %11051 = sst [smem:[#allocation11_spill]] %s11028_s0 }
   0x2   :  { %22 = vsyncpa [#allocation3], 0 }
   0x3   :  { %24 = vsyncpa [#allocation3 + $0x1], 0  ;;  %s9095_s21 = smov 0   ;;  %s9097_s22 = smov 0  }
   0x4   :  { %s9099_s23 = smov 0   ;;  %s9101_s24 = smov 0  }
   0x5 LB: > { %11052 = sst [smem:[#allocation5_spill]] %s8992_s21  ;;  %s9116_s25 = sadd.s32 4294967295, %s9004_s24   ;;  %s9004_s24 = sphi %s9101_s24, %s11064_s24   ;;  %s9000_s23 = sphi %s9099_s23, %s11066_s23   ;;  %s8996_s22 = sphi %s9097_s22, %s11068_s22   ;;  %s8992_s21 = sphi %s9095_s21, %s11067_s21  }
   0x6   : > { %11053 = sst [smem:[#allocation6_spill]] %s9000_s23  ;;  %s7679_s26 = sadd.s32 4294967294, %s9004_s24  }
   0x7   : > { %11054 = sst [smem:[#allocation7_spill]] %s9004_s24  ;;  %s9120_s27 = sadd.s32 1, %s9004_s24  }
   0x8   : > { %11055 = sst [smem:[#allocation8_spill]] %s9120_s27  ;;  %s393_s28 = sadd.s32 1, %s9000_s23 }
   0x9   : > { %s390_s29 = ssub.s32 %s9004_s24, %s9120_s27  ;;  %p403_p0 = scmp.ne.s32.totalorder %s9000_s23, %s8996_s22 }
   0xa   : > { %p391_p1 = scmp.eq.s32.totalorder %s390_s29, 0  ;;  %p404_p2 = scmp.eq.s32.totalorder %s9116_s25, 1 }
   0xb   : > { %p409_p3 = scmp.ne.s32.totalorder %s8996_s22, %s8992_s21  ;;  %p410_p4 = scmp.eq.s32.totalorder %s7679_s26, 1 }
   0xc   : > { %s9131_s30 = scalar_select %p391_p1, %s9000_s23, %s393_s28  }
   0xd   : > { %p9133_p5 = por %p404_p2, %p403_p0  ;;  %p9137_p6 = por %p410_p4, %p409_p3 }
   0xe   : > { %11056 = sst [smem:[#allocation9_spill]] %s9131_s30  ;;  %p7682_p7 = scmp.ge.s32.totalorder %s9004_s24, 1 }
   0xf   : > { %s11058_s17 = scalar_select %p9137_p6, 1, 0 }
  0x10   : > { %p482_p8 = scmp.lt.s32.totalorder %s9004_s24, 3 }
  0x11   : > { %11059 = sst [smem:[#allocation10_spill]] %s11058_s17 }
  0x12   : > { %p483_p9 = pnand %p7682_p7, %p482_p8 }
  0x13   : > { %v586_v0 = vld [vmem:[%s11031_s3 + $0x10] sm:$0xff] (!%p483_p9)  ;;  %v584_v1 = vld [vmem:[%s11031_s3] sm:$0xff] (!%p483_p9)  ;;  %s7684_s28 = sshll.u32 (!%p483_p9), %s9116_s25, 2  ;;  %v9006_v2 = vmov (!%p483_p9), 0   ;;  %v587_v3 = vld [vmem:[%s11031_s3 + $0x18] sm:$0xff] (!%p483_p9)  ;;  %v9007_v5 = vmov (!%p483_p9), 0.0  }
  0x14   : > { %486 = sbr.rel (%p483_p9) target bundleno = 5075 (0x13d3), region = 76  ;;  %8873 = vset.pattern.permute.xlu1 (!%p483_p9), %v9006_v2  ;;  %8872 = vset.pattern.permute.xlu0 (!%p483_p9), %v9006_v2  ;;  %p548_p10 = scmp.lt.s32.totalorder (!%p483_p9), %s7684_s28, 7  ;;  %v585_v4 = vld [vmem:[%s11031_s3 + $0x8] sm:$0xff] (!%p483_p9)  ;;  %v588_v7 = vld [vmem:[%s11031_s3 + $0x20] sm:$0xff] (!%p483_p9)  ;;  %vm661_vm0 = vcmask (!%p483_p9), 1043456   ;;  %vm636_vm1 = vcmask (!%p483_p9), 31744  }
  0x15   : > { %604 = vperm.xlu1 (!%p483_p9), %8873, %v586_v0   ;;  %594 = vperm.xlu0 (!%p483_p9), %8872, %v584_v1   ;;  %v589_v6 = vld [vmem:[%s11031_s3 + $0x28] sm:$0xff] (!%p483_p9)  ;;  %s11060_s29 = sld [smem:[#allocation11_spill]] (!%p483_p9)  ;;  %v576_v12 = vld [vmem:[%s11030_s2] sm:$0xff] (!%p483_p9)  ;;  %v591_v13 = vld [vmem:[%s11031_s3 + $0x38] sm:$0xff] (!%p483_p9)  ;;  %vm984_vm2 = vcmask (!%p483_p9), 523264   ;;  %s544_s27 = sand.u32 (!%p483_p9), 1, %s8996_s22  }
  0x16   : > { %734 = vmatprep.mubr.f32.mxu0 (!%p483_p9), %v9007_v5  ;;  %847 = vmatprep.mubr.f32.mxu1 (!%p483_p9), %v9007_v5  ;;  %v590_v14 = vld [vmem:[%s11031_s3 + $0x30] sm:$0xff] (!%p483_p9)  ;;  %v577_v15 = vld [vmem:[%s11030_s2 + $0x8] sm:$0xff] (!%p483_p9)  ;;  %v936_v17 = vld [vmem:[%s11033_s5] sm:$0xff] (!%p483_p9) }
  0x17   : > { %v937_v16 = vld [vmem:[%s11033_s5 + $0x8] sm:$0xff] (!%p483_p9)  ;;  %v578_v18 = vld [vmem:[%s11030_s2 + $0x10] sm:$0xff] (!%p483_p9)  ;;  %v939_v19 = vld [vmem:[%s11033_s5 + $0x18] sm:$0xff] (!%p483_p9) }
  0x18   : > { %v938_v20 = vld [vmem:[%s11033_s5 + $0x10] sm:$0xff] (!%p483_p9)  ;;  %v579_v21 = vld [vmem:[%s11030_s2 + $0x18] sm:$0xff] (!%p483_p9)  ;;  %v941_v22 = vld [vmem:[%s11033_s5 + $0x28] sm:$0xff] (!%p483_p9) }
  0x19   : > { %609 = vperm.xlu1 (!%p483_p9), %8873, %v587_v3   ;;  %599 = vperm.xlu0 (!%p483_p9), %8872, %v585_v4   ;;  %v940_v23 = vld [vmem:[%s11033_s5 + $0x20] sm:$0xff] (!%p483_p9)  ;;  %v943_v25 = vld [vmem:[%s11033_s5 + $0x38] sm:$0xff] (!%p483_p9)  ;;  %v942_v26 = vld [vmem:[%s11033_s5 + $0x30] sm:$0xff] (!%p483_p9) }
  0x1a   : > { %v580_v24 = vld [vmem:[%s11030_s2 + $0x20] sm:$0xff] (!%p483_p9)  ;;  %v581_v27 = vld [vmem:[%s11030_s2 + $0x28] sm:$0xff] (!%p483_p9)  ;;  %v582_v30 = vld [vmem:[%s11030_s2 + $0x30] sm:$0xff] (!%p483_p9) }
  0x1b   : > { %s11070_s28 = smov (!%p548_p10, %s7684_s28), 7  ;;  %v1276_v28 = vld [vmem:[%s11035_s7 + $0x8] sm:$0xff]  ;;  %v1275_v29 = vld [vmem:[%s11035_s7] sm:$0xff]  ;;  %v1278_v31 = vld [vmem:[%s11035_s7 + $0x18] sm:$0xff] }
  0x1c   : > { %s9158_s18 = sshll.u32 %s11070_s28, 2  ;;  %v1277_v32 = vld [vmem:[%s11035_s7 + $0x10] sm:$0xff]  ;;  %v583_v33 = vld [vmem:[%s11030_s2 + $0x38] sm:$0xff]  ;;  %v1280_v34 = vld [vmem:[%s11035_s7 + $0x28] sm:$0xff]  ;;  %s7683_s28 = sshll.u32 %s544_s27, 2 }
  0x1d   : > { %s9167_s23 = scalar_lea.vmem %s11060_s29, %s9158_s18  ;;  %619 = vperm.xlu1 %8873, %v589_v6   ;;  %614 = vperm.xlu0 %8872, %v588_v7   ;;  %v1279_v35 = vld [vmem:[%s11035_s7 + $0x20] sm:$0xff]  ;;  %v1282_v36 = vld [vmem:[%s11035_s7 + $0x38] sm:$0xff]  ;;  %v1281_v37 = vld [vmem:[%s11035_s7 + $0x30] sm:$0xff]  ;;  %s557_s21 = scalar_lea.vmem %s11029_s1, %s9158_s18 }
  0x1e   : > { %v572_v8 = vld [vmem:[%s9167_s23] sm:$0xff]  ;;  %v573_v9 = vld [vmem:[%s9167_s23 + $0x8] sm:$0xff]  ;;  %v1616_v40 = vld [vmem:[%s11037_s9 + $0x18] sm:$0xff]  ;;  %s569_s30 = scalar_lea.vmem %s11043_s15, %s9158_s18  ;;  %s563_s20 = scalar_lea.vmem %s11042_s14, %s9158_s18 }
  0x1f   : > { %v634_v10 = vcombine.high %v572_v8, %v572_v8  ;;  %v635_v11 = vcombine.high %v573_v9, %v573_v9  ;;  %v1614_v38 = vld [vmem:[%s11037_s9 + $0x8] sm:$0xff]  ;;  %v1613_v39 = vld [vmem:[%s11037_s9] sm:$0xff]  ;;  %v1615_v41 = vld [vmem:[%s11037_s9 + $0x10] sm:$0xff]  ;;  %s7536_s29 = scalar_lea.sflag [#allocation3], %s544_s27 }
  0x20   : > { %v1618_v42 = vld [vmem:[%s11037_s9 + $0x28] sm:$0xff]  ;;  %v1617_v43 = vld [vmem:[%s11037_s9 + $0x20] sm:$0xff]  ;;  %v1620_v44 = vld [vmem:[%s11037_s9 + $0x38] sm:$0xff] }
  0x21   : > { %7692 = vmatprep.subr.msk.mxu0 %vm661_vm0, %v634_v10  ;;  %7702 = vmatprep.subr.msk.mxu1 %vm661_vm0, %v635_v11  ;;  %v1619_v45 = vld [vmem:[%s11037_s9 + $0x30] sm:$0xff]  ;;  %v2104_v46 = vld [vmem:[%s11041_s13] sm:$0xf]  ;;  %v7773_v48 = vld [vmem:[%s11031_s3 + $0x48] sm:$0xff] }
  0x22   : > { %7693 = vmatpush1.msk.msra.mxu0 %vm661_vm0, %v572_v8  ;;  %7703 = vmatpush1.msk.msra.mxu1 %vm661_vm0, %v573_v9  ;;  %v1944_v47 = vld [vmem:[%s11039_s11] sm:$0xf]  ;;  %v7775_v50 = vld [vmem:[%s11031_s3 + $0x58] sm:$0xff]  ;;  %v7774_v51 = vld [vmem:[%s11031_s3 + $0x50] sm:$0xff] }
  0x23   : > { %7694 = vmatmul.mubr.msk.f32.vlgmr.msra.gmra.mrb[0].mxu0 %vm636_vm1, %v576_v12  ;;  %7704 = vmatmul.mubr.msk.f32.vlgmr.msra.gmra.mrb[0].mxu1 %vm636_vm1, %v576_v12  ;;  %v7772_v49 = vld [vmem:[%s11031_s3 + $0x40] sm:$0xff]  ;;  %v7777_v52 = vld [vmem:[%s11031_s3 + $0x68] sm:$0xff]  ;;  %v7779_v54 = vld [vmem:[%s11031_s3 + $0x78] sm:$0xff] }
  0x24   : > { %629 = vperm.xlu1 %8873, %v591_v13   ;;  %624 = vperm.xlu0 %8872, %v590_v14   ;;  %v7776_v53 = vld [vmem:[%s11031_s3 + $0x60] sm:$0xff]  ;;  %v7778_v55 = vld [vmem:[%s11031_s3 + $0x70] sm:$0xff]  ;;  %v7809_v56 = vld [vmem:[%s11033_s5 + $0x48] sm:$0xff] }
  0x25   : > { %740 = vmatprep.mubr.f32.mxu0 %v9007_v5  ;;  %853 = vmatprep.mubr.f32.mxu1 %v9007_v5  ;;  %v7808_v57 = vld [vmem:[%s11033_s5 + $0x40] sm:$0xff]  ;;  %v7811_v58 = vld [vmem:[%s11033_s5 + $0x58] sm:$0xff]  ;;  %v7810_v59 = vld [vmem:[%s11033_s5 + $0x50] sm:$0xff] }
  0x26   : > { %v7813_v60 = vld [vmem:[%s11033_s5 + $0x68] sm:$0xff]  ;;  %v7812_v61 = vld [vmem:[%s11033_s5 + $0x60] sm:$0xff]  ;;  %v7815_v62 = vld [vmem:[%s11033_s5 + $0x78] sm:$0xff] }
  0x27   : > { %7695 = vmatmul.mubr.msk.f32.gmra.mrb[2].mxu0 %vm636_vm1, %v577_v15  ;;  %7705 = vmatmul.mubr.msk.f32.gmra.mrb[2].mxu1 %vm636_vm1, %v577_v15  ;;  %v7814_v63 = vld [vmem:[%s11033_s5 + $0x70] sm:$0xff]  ;;  %v7841_v0 = vld [vmem:[%s11035_s7 + $0x48] sm:$0xff]  ;;  %v7840_v1 = vld [vmem:[%s11035_s7 + $0x40] sm:$0xff] }
  0x28   : > { %951 = vperm.xlu1 %8873, %v937_v16   ;;  %946 = vperm.xlu0 %8872, %v936_v17   ;;  %v7843_v2 = vld [vmem:[%s11035_s7 + $0x58] sm:$0xff]  ;;  %v7842_v3 = vld [vmem:[%s11035_s7 + $0x50] sm:$0xff]  ;;  %v7845_v4 = vld [vmem:[%s11035_s7 + $0x68] sm:$0xff] }
  0x29   : > { %746 = vmatprep.mubr.f32.mxu0 %v9007_v5  ;;  %859 = vmatprep.mubr.f32.mxu1 %v9007_v5  ;;  %v7844_v6 = vld [vmem:[%s11035_s7 + $0x60] sm:$0xff]  ;;  %v7847_v7 = vld [vmem:[%s11035_s7 + $0x78] sm:$0xff]  ;;  %v7846_v8 = vld [vmem:[%s11035_s7 + $0x70] sm:$0xff] }
  0x2a   : > { %v7873_v9 = vld [vmem:[%s11037_s9 + $0x48] sm:$0xff]  ;;  %v7872_v10 = vld [vmem:[%s11037_s9 + $0x40] sm:$0xff]  ;;  %v7875_v11 = vld [vmem:[%s11037_s9 + $0x58] sm:$0xff] }
  0x2b   : > { %7696 = vmatmul.mubr.msk.f32.gmra.mrb[4].mxu0 %vm636_vm1, %v578_v18  ;;  %7706 = vmatmul.mubr.msk.f32.gmra.mrb[4].mxu1 %vm636_vm1, %v578_v18  ;;  %v7874_v12 = vld [vmem:[%s11037_s9 + $0x50] sm:$0xff]  ;;  %v7877_v13 = vld [vmem:[%s11037_s9 + $0x68] sm:$0xff]  ;;  %v7876_v14 = vld [vmem:[%s11037_s9 + $0x60] sm:$0xff] }
  0x2c   : > { %961 = vperm.xlu1 %8873, %v939_v19   ;;  %956 = vperm.xlu0 %8872, %v938_v20   ;;  %v7879_v15 = vld [vmem:[%s11037_s9 + $0x78] sm:$0xff]  ;;  %v7878_v16 = vld [vmem:[%s11037_s9 + $0x70] sm:$0xff]  ;;  %v7901_v17 = vld [vmem:[%s11041_s13 + $0x4] sm:$0xf] }
  0x2d   : > { %752 = vmatprep.mubr.f32.mxu0 %v9007_v5  ;;  %865 = vmatprep.mubr.f32.mxu1 %v9007_v5  ;;  %v7897_v18 = vld [vmem:[%s11039_s11 + $0x4] sm:$0xf]  ;;  %v7913_v19 = vld [vmem:[%s11031_s3 + $0x88] sm:$0xff] }
  0x2e   : > { %v7912_v20 = vld [vmem:[%s11031_s3 + $0x80] sm:$0xff] }
  0x2f   : > { %7697 = vmatmul.mubr.msk.f32.gmra.mrb[6].mxu0 %vm636_vm1, %v579_v21  ;;  %7707 = vmatmul.mubr.msk.f32.gmra.mrb[6].mxu1 %vm636_vm1, %v579_v21  ;;  %v7915_v21 = vld [vmem:[%s11031_s3 + $0x98] sm:$0xff] }
  0x30   : > { %971 = vperm.xlu1 %8873, %v941_v22   ;;  %966 = vperm.xlu0 %8872, %v940_v23   ;;  %v7914_v22 = vld [vmem:[%s11031_s3 + $0x90] sm:$0xff]  ;;  %v7917_v23 = vld [vmem:[%s11031_s3 + $0xa8] sm:$0xff] }
  0x31   : > { %758 = vmatprep.mubr.f32.mxu0 %v9007_v5  ;;  %871 = vmatprep.mubr.f32.mxu1 %v9007_v5 }
  0x33   : > { %7698 = vmatmul.mubr.msk.f32.gmra.mrb[8].mxu0 %vm636_vm1, %v580_v24  ;;  %7708 = vmatmul.mubr.msk.f32.gmra.mrb[8].mxu1 %vm636_vm1, %v580_v24  ;;  %v7916_v24 = vld [vmem:[%s11031_s3 + $0xa0] sm:$0xff] }
  0x34   : > { %981 = vperm.xlu1 %8873, %v943_v25   ;;  %976 = vperm.xlu0 %8872, %v942_v26   ;;  %v7919_v25 = vld [vmem:[%s11031_s3 + $0xb8] sm:$0xff]  ;;  %v7918_v26 = vld [vmem:[%s11031_s3 + $0xb0] sm:$0xff] }
  0x35   : > { %764 = vmatprep.mubr.f32.mxu0 %v9007_v5  ;;  %877 = vmatprep.mubr.f32.mxu1 %v9007_v5 }
  0x37   : > { %7699 = vmatmul.mubr.msk.f32.gmra.mrb[10].mxu0 %vm636_vm1, %v581_v27  ;;  %7709 = vmatmul.mubr.msk.f32.gmra.mrb[10].mxu1 %vm636_vm1, %v581_v27  ;;  %v7949_v27 = vld [vmem:[%s11033_s5 + $0x88] sm:$0xff] }
  0x38   : > { %1290 = vperm.xlu1 %8873, %v1276_v28   ;;  %1285 = vperm.xlu0 %8872, %v1275_v29   ;;  %v7948_v28 = vld [vmem:[%s11033_s5 + $0x80] sm:$0xff] }
  0x39   : > { %770 = vmatprep.mubr.f32.mxu0 %v9007_v5  ;;  %883 = vmatprep.mubr.f32.mxu1 %v9007_v5 }
  0x3b   : > { %7700 = vmatmul.mubr.msk.f32.gmra.mrb[12].mxu0 %vm636_vm1, %v582_v30  ;;  %7710 = vmatmul.mubr.msk.f32.gmra.mrb[12].mxu1 %vm636_vm1, %v582_v30 }
  0x3c   : > { %1300 = vperm.xlu1 %8873, %v1278_v31   ;;  %1295 = vperm.xlu0 %8872, %v1277_v32   ;;  %v7951_v31 = vld [vmem:[%s11033_s5 + $0x98] sm:$0xff]  ;;  %v7950_v32 = vld [vmem:[%s11033_s5 + $0x90] sm:$0xff] }
  0x3d   : > { %776 = vmatprep.mubr.f32.mxu0 %v9007_v5  ;;  %889 = vmatprep.mubr.f32.mxu1 %v9007_v5 }
  0x3f   : > { %7701 = vmatmul.mubr.msk.f32.gmra.mrb[14].mxu0 %vm636_vm1, %v583_v33  ;;  %7711 = vmatmul.mubr.msk.f32.gmra.mrb[14].mxu1 %vm636_vm1, %v583_v33  ;;  %v7953_v33 = vld [vmem:[%s11033_s5 + $0xa8] sm:$0xff] }
  0x40   : > { %1310 = vperm.xlu1 %8873, %v1280_v34   ;;  %1305 = vperm.xlu0 %8872, %v1279_v35   ;;  %v7952_v34 = vld [vmem:[%s11033_s5 + $0xa0] sm:$0xff] }
  0x41   : > { %1073 = vmatprep.mubr.f32.mxu0 %v9007_v5  ;;  %1186 = vmatprep.mubr.f32.mxu1 %v9007_v5 }
  0x44   : > { %1320 = vperm.xlu1 %8873, %v1282_v36   ;;  %1315 = vperm.xlu0 %8872, %v1281_v37   ;;  %v7955_v37 = vld [vmem:[%s11033_s5 + $0xb8] sm:$0xff] }
  0x48   : > { %1628 = vperm.xlu1 %8873, %v1614_v38   ;;  %1623 = vperm.xlu0 %8872, %v1613_v39   ;;  %v7954_v38 = vld [vmem:[%s11033_s5 + $0xb0] sm:$0xff] }
  0x4c   : > { %1638 = vperm.xlu1 %8873, %v1616_v40   ;;  %1633 = vperm.xlu0 %8872, %v1615_v41   ;;  %v7981_v41 = vld [vmem:[%s11035_s7 + $0x88] sm:$0xff] }
  0x50   : > { %1648 = vperm.xlu1 %8873, %v1618_v42   ;;  %1643 = vperm.xlu0 %8872, %v1617_v43   ;;  %v7980_v42 = vld [vmem:[%s11035_s7 + $0x80] sm:$0xff]  ;;  %v7983_v43 = vld [vmem:[%s11035_s7 + $0x98] sm:$0xff] }
  0x54   : > { %1658 = vperm.xlu1 %8873, %v1620_v44   ;;  %1653 = vperm.xlu0 %8872, %v1619_v45   ;;  %v7982_v44 = vld [vmem:[%s11035_s7 + $0x90] sm:$0xff] }
  0x58   : > { %2107 = vperm.xlu1 %8873, %v2104_v46   ;;  %1947 = vperm.xlu0 %8872, %v1944_v47   ;;  %v7985_v47 = vld [vmem:[%s11035_s7 + $0xa8] sm:$0xff] }
  0x5c   : > { %2312 = vperm.xlu1 %8873, %v7773_v48   ;;  %2307 = vperm.xlu0 %8872, %v7772_v49   ;;  %v7984_v48 = vld [vmem:[%s11035_s7 + $0xa0] sm:$0xff] }
  0x60   : > { %2322 = vperm.xlu1 %8873, %v7775_v50   ;;  %2317 = vperm.xlu0 %8872, %v7774_v51   ;;  %v7987_v51 = vld [vmem:[%s11035_s7 + $0xb8] sm:$0xff] }
  0x64   : > { %2332 = vperm.xlu1 %8873, %v7777_v52   ;;  %2327 = vperm.xlu0 %8872, %v7776_v53   ;;  %v7986_v52 = vld [vmem:[%s11035_s7 + $0xb0] sm:$0xff]  ;;  %v8013_v53 = vld [vmem:[%s11037_s9 + $0x88] sm:$0xff] }
  0x68   : > { %2342 = vperm.xlu1 %8873, %v7779_v54   ;;  %2337 = vperm.xlu0 %8872, %v7778_v55   ;;  %v8012_v54 = vld [vmem:[%s11037_s9 + $0x80] sm:$0xff] }
  0x6c   : > { %2664 = vperm.xlu1 %8873, %v7809_v56   ;;  %2659 = vperm.xlu0 %8872, %v7808_v57   ;;  %v8015_v57 = vld [vmem:[%s11037_s9 + $0x98] sm:$0xff] }
  0x70   : > { %2674 = vperm.xlu1 %8873, %v7811_v58   ;;  %2669 = vperm.xlu0 %8872, %v7810_v59   ;;  %v8014_v58 = vld [vmem:[%s11037_s9 + $0x90] sm:$0xff] }
  0x74   : > { %2684 = vperm.xlu1 %8873, %v7813_v60   ;;  %2679 = vperm.xlu0 %8872, %v7812_v61   ;;  %v8017_v61 = vld [vmem:[%s11037_s9 + $0xa8] sm:$0xff] }
  0x78   : > { %2694 = vperm.xlu1 %8873, %v7815_v62   ;;  %2689 = vperm.xlu0 %8872, %v7814_v63   ;;  %v8016_v62 = vld [vmem:[%s11037_s9 + $0xa0] sm:$0xff]  ;;  %v8019_v63 = vld [vmem:[%s11037_s9 + $0xb8] sm:$0xff] }
  0x7c   : > { %3004 = vperm.xlu1 %8873, %v7841_v0   ;;  %2999 = vperm.xlu0 %8872, %v7840_v1   ;;  %v8018_v0 = vld [vmem:[%s11037_s9 + $0xb0] sm:$0xff] }
  0x80   : > { %3014 = vperm.xlu1 %8873, %v7843_v2   ;;  %3009 = vperm.xlu0 %8872, %v7842_v3   ;;  %v8041_v3 = vld [vmem:[%s11041_s13 + $0x8] sm:$0xf] }
  0x84   : > { %3024 = vperm.xlu1 %8873, %v7845_v4   ;;  %3019 = vperm.xlu0 %8872, %v7844_v6   ;;  %v8037_v4 = vld [vmem:[%s11039_s11 + $0x8] sm:$0xf] }
  0x88   : > { %3034 = vperm.xlu1 %8873, %v7847_v7   ;;  %3029 = vperm.xlu0 %8872, %v7846_v8   ;;  %v8053_v8 = vld [vmem:[%s11031_s3 + $0xc8] sm:$0xff] }
  0x8c   : > { %3344 = vperm.xlu1 %8873, %v7873_v9   ;;  %3339 = vperm.xlu0 %8872, %v7872_v10   ;;  %v8052_v9 = vld [vmem:[%s11031_s3 + $0xc0] sm:$0xff]  ;;  %v8055_v10 = vld [vmem:[%s11031_s3 + $0xd8] sm:$0xff] }
  0x90   : > { %3354 = vperm.xlu1 %8873, %v7875_v11   ;;  %3349 = vperm.xlu0 %8872, %v7874_v12   ;;  %v8054_v11 = vld [vmem:[%s11031_s3 + $0xd0] sm:$0xff] }
  0x94   : > { %3364 = vperm.xlu1 %8873, %v7877_v13   ;;  %3359 = vperm.xlu0 %8872, %v7876_v14   ;;  %v9450_v29 = vpop.permute.xlu1 %604  ;;  %v9452_v30 = vpop.permute.xlu0 %594  ;;  %v8057_v14 = vld [vmem:[%s11031_s3 + $0xe8] sm:$0xff] }
  0x98   : > { %3374 = vperm.xlu1 %8873, %v7879_v15   ;;  %3369 = vperm.xlu0 %8872, %v7878_v16   ;;  %v9466_v35 = vpop.permute.xlu1 %609  ;;  %v9468_v36 = vpop.permute.xlu0 %599  ;;  %v8056_v15 = vld [vmem:[%s11031_s3 + $0xe0] sm:$0xff] }
  0x9c   : > { %3827 = vperm.xlu1 %8873, %v7901_v17   ;;  %3665 = vperm.xlu0 %8872, %v7897_v18   ;;  %v9476_v39 = vpop.permute.xlu1 %619  ;;  %v9478_v40 = vpop.permute.xlu0 %614  ;;  %v8059_v18 = vld [vmem:[%s11031_s3 + $0xf8] sm:$0xff] }
  0xa0   : > { %4036 = vperm.xlu1 %8873, %v7913_v19   ;;  %4031 = vperm.xlu0 %8872, %v7912_v20   ;;  %v8058_v19 = vld [vmem:[%s11031_s3 + $0xf0] sm:$0xff]  ;;  %v8089_v20 = vld [vmem:[%s11033_s5 + $0xc8] sm:$0xff] }
  0xa3   : > { %v9492_v45 = vpop.permute.xlu1 %629  ;;  %v9494_v46 = vpop.permute.xlu0 %624 }
  0xa4   : > { %4046 = vperm.xlu1 %8873, %v7915_v21   ;;  %4041 = vperm.xlu0 %8872, %v7914_v22   ;;  %v8088_v21 = vld [vmem:[%s11033_s5 + $0xc0] sm:$0xff] }
  0xa7   : > { %v9502_v49 = vpop.permute.xlu1 %951  ;;  %v9504_v50 = vpop.permute.xlu0 %946 }
  0xa8   : > { %4056 = vperm.xlu1 %8873, %v7917_v23   ;;  %4051 = vperm.xlu0 %8872, %v7916_v24   ;;  %v8091_v24 = vld [vmem:[%s11033_s5 + $0xd8] sm:$0xff] }
  0xab   : > { %v9518_v55 = vpop.permute.xlu1 %961  ;;  %v9520_v56 = vpop.permute.xlu0 %956 }
  0xac   : > { %4066 = vperm.xlu1 %8873, %v7919_v25   ;;  %4061 = vperm.xlu0 %8872, %v7918_v26   ;;  %v8090_v25 = vld [vmem:[%s11033_s5 + $0xd0] sm:$0xff] }
  0xaf   : > { %v9528_v59 = vpop.permute.xlu1 %971  ;;  %v9530_v60 = vpop.permute.xlu0 %966 }
  0xb0   : > { %4388 = vperm.xlu1 %8873, %v7949_v27   ;;  %4383 = vperm.xlu0 %8872, %v7948_v28  }
  0xb3   : > { %v9544_v1 = vpop.permute.xlu1 %981  ;;  %v9546_v2 = vpop.permute.xlu0 %976 }
  0xb4   : > { %4398 = vperm.xlu1 %8873, %v7951_v31   ;;  %4393 = vperm.xlu0 %8872, %v7950_v32  }
  0xb7   : > { %v9554_v6 = vpop.permute.xlu1 %1290  ;;  %v9556_v7 = vpop.permute.xlu0 %1285 }
  0xb8   : > { %4408 = vperm.xlu1 %8873, %v7953_v33   ;;  %4403 = vperm.xlu0 %8872, %v7952_v34  }
  0xbb   : > { %v9570_v12 = vpop.permute.xlu1 %1300  ;;  %v9572_v13 = vpop.permute.xlu0 %1295 }
  0xbc   : > { %4418 = vperm.xlu1 %8873, %v7955_v37   ;;  %4413 = vperm.xlu0 %8872, %v7954_v38   ;;  %v8093_v38 = vld [vmem:[%s11033_s5 + $0xe8] sm:$0xff] }
  0xbf   : > { %v9580_v16 = vpop.permute.xlu1 %1310  ;;  %v9582_v17 = vpop.permute.xlu0 %1305 }
  0xc0   : > { %4728 = vperm.xlu1 %8873, %v7981_v41   ;;  %4723 = vperm.xlu0 %8872, %v7980_v42   ;;  %v8092_v41 = vld [vmem:[%s11033_s5 + $0xe0] sm:$0xff] }
  0xc3   : > { %v9596_v22 = vpop.permute.xlu1 %1320  ;;  %v9598_v23 = vpop.permute.xlu0 %1315 }
  0xc4   : > { %4738 = vperm.xlu1 %8873, %v7983_v43   ;;  %4733 = vperm.xlu0 %8872, %v7982_v44  }
  0xc7   : > { %v9606_v32 = vpop.permute.xlu1 %1628  ;;  %v9608_v33 = vpop.permute.xlu0 %1623 }
  0xc8   : > { %4748 = vperm.xlu1 %8873, %v7985_v47   ;;  %4743 = vperm.xlu0 %8872, %v7984_v48  }
  0xcc   : > { %4758 = vperm.xlu1 %8873, %v7987_v51   ;;  %4753 = vperm.xlu0 %8872, %v7986_v52  }
  0xd0   : > { %5068 = vperm.xlu1 %8873, %v8013_v53   ;;  %5063 = vperm.xlu0 %8872, %v8012_v54  }
  0xd4   : > { %5078 = vperm.xlu1 %8873, %v8015_v57   ;;  %5073 = vperm.xlu0 %8872, %v8014_v58  }
  0xd8   : > { %5088 = vperm.xlu1 %8873, %v8017_v61   ;;  %5083 = vperm.xlu0 %8872, %v8016_v62  }
  0xdc   : > { %5098 = vperm.xlu1 %8873, %v8019_v63   ;;  %5093 = vperm.xlu0 %8872, %v8018_v0   ;;  %v8094_v0 = vld [vmem:[%s11033_s5 + $0xf0] sm:$0xff] }
  0xe0   : > { %5551 = vperm.xlu1 %8873, %v8041_v3   ;;  %5389 = vperm.xlu0 %8872, %v8037_v4  }
  0xe4   : > { %5760 = vperm.xlu1 %8873, %v8053_v8   ;;  %5755 = vperm.xlu0 %8872, %v8052_v9  }
  0xe8   : > { %5770 = vperm.xlu1 %8873, %v8055_v10   ;;  %5765 = vperm.xlu0 %8872, %v8054_v11  }
  0xec   : > { %5780 = vperm.xlu1 %8873, %v8057_v14   ;;  %5775 = vperm.xlu0 %8872, %v8056_v15  }
  0xf0   : > { %5790 = vperm.xlu1 %8873, %v8059_v18   ;;  %5785 = vperm.xlu0 %8872, %v8058_v19  }
  0xf4   : > { %6112 = vperm.xlu1 %8873, %v8089_v20   ;;  %6107 = vperm.xlu0 %8872, %v8088_v21   ;;  %v9630_v20 = vpop.permute.xlu1 %1638  ;;  %v9632_v21 = vpop.permute.xlu0 %1633 }
  0xf6   : > { %v736_v26 = vpop.f32.mrb[0].mxu0  ;;  %v849_v27 = vpop.f32.mrb[0].mxu1 }
  0xf7   : > { %v738_v28 = vpop.f32.mrb[1].mxu0  ;;  %v851_v31 = vpop.f32.mrb[1].mxu1  ;;  %v737_v34 = vadd.f32 %v736_v26, %v9452_v30  ;;  %v850_v37 = vadd.f32 %v849_v27, %v9452_v30  ;;  %v8121_v27 = vld [vmem:[%s11035_s7 + $0xc8] sm:$0xff] }
  0xf8   : > { %6122 = vperm.xlu1 %8873, %v8091_v24   ;;  %6117 = vperm.xlu0 %8872, %v8090_v25   ;;  %v739_v42 = vadd.f32 %v738_v28, %v9452_v30  ;;  %v852_v47 = vadd.f32 %v851_v31, %v9452_v30  ;;  %v8095_v30 = vld [vmem:[%s11033_s5 + $0xf8] sm:$0xff] }
  0xf9   : > { %v896_v58 = vmax.f32 %v737_v34, 0.0  ;;  %v898_v61 = vmax.f32 %v850_v37, 0.0 }
  0xfa   : > { %v742_v43 = vpop.f32.mrb[2].mxu0  ;;  %v855_v44 = vpop.f32.mrb[2].mxu1  ;;  %v897_v3 = vmax.f32 %v739_v42, 0.0 }
  0xfb   : > { %v743_v48 = vadd.f32 %v742_v43, %v9468_v36  ;;  %v856_v51 = vadd.f32 %v855_v44, %v9468_v36  ;;  %v744_v52 = vpop.f32.mrb[3].mxu0  ;;  %v857_v53 = vpop.f32.mrb[3].mxu1 }
  0xfc   : > { %v745_v54 = vadd.f32 %v744_v52, %v9468_v36  ;;  %v858_v57 = vadd.f32 %v857_v53, %v9468_v36  ;;  %6132 = vperm.xlu1 %8873, %v8093_v38   ;;  %6127 = vperm.xlu0 %8872, %v8092_v41   ;;  %v899_v36 = vmax.f32 %v852_v47, 0.0  ;;  %v8120_v38 = vld [vmem:[%s11035_s7 + $0xc0] sm:$0xff] }
  0xfd   : > { %v900_v62 = vmax.f32 %v743_v48, 0.0  ;;  %v902_v63 = vmax.f32 %v856_v51, 0.0 }
  0xfe   : > { %v901_v4 = vmax.f32 %v745_v54, 0.0  ;;  %v903_v8 = vmax.f32 %v858_v57, 0.0  ;;  %v748_v9 = vpop.f32.mrb[4].mxu0  ;;  %v861_v10 = vpop.f32.mrb[4].mxu1  ;;  %v8123_v54 = vld [vmem:[%s11035_s7 + $0xd8] sm:$0xff]  ;;  %v8122_v57 = vld [vmem:[%s11035_s7 + $0xd0] sm:$0xff] }
  0xff   : > { %v8192_v11 = vpack.c.bf16 %v900_v62, %v896_v58  ;;  %v8208_v14 = vpack.c.bf16 %v902_v63, %v898_v61  ;;  %v750_v15 = vpop.f32.mrb[5].mxu0  ;;  %v863_v18 = vpop.f32.mrb[5].mxu1  ;;  %v749_v24 = vadd.f32 %v748_v9, %v9450_v29  ;;  %v862_v25 = vadd.f32 %v861_v10, %v9450_v29 }
 0x100   : > { %6142 = vperm.xlu1 %8873, %v8095_v30   ;;  %6137 = vperm.xlu0 %8872, %v8094_v0   ;;  %v8190_v19 = vpack.c.bf16 %v901_v4, %v897_v3  ;;  %v8206_v26 = vpack.c.bf16 %v903_v8, %v899_v36  ;;  %v751_v28 = vadd.f32 %v750_v15, %v9450_v29  ;;  %v9654_v36 = vpop.permute.xlu1 %1648 }
 0x101   : > { %v864_v31 = vadd.f32 %v863_v18, %v9450_v29  ;;  %v904_v29 = vmax.f32 %v749_v24, 0.0  ;;  %v906_v51 = vmax.f32 %v862_v25, 0.0  ;;  %v8125_v18 = vld [vmem:[%s11035_s7 + $0xe8] sm:$0xff] }
 0x102   : > { %v754_v34 = vpop.f32.mrb[6].mxu0  ;;  %v867_v37 = vpop.f32.mrb[6].mxu1  ;;  %8191 = vmatprep.subr.bf16.mxu0 %v8190_v19  ;;  %8207 = vmatprep.subr.bf16.mxu1 %v8206_v26  ;;  %v905_v58 = vmax.f32 %v751_v28, 0.0 }
 0x103   : > { %v755_v41 = vadd.f32 %v754_v34, %v9466_v35  ;;  %v868_v42 = vadd.f32 %v867_v37, %v9466_v35  ;;  %v756_v43 = vpop.f32.mrb[7].mxu0  ;;  %v869_v44 = vpop.f32.mrb[7].mxu1  ;;  %8193 = vmatpush1.bf16.msra.mxu0 %v8192_v11  ;;  %8209 = vmatpush1.bf16.msra.mxu1 %v8208_v14  ;;  %v907_v61 = vmax.f32 %v864_v31, 0.0 }
 0x104   : > { %v757_v47 = vadd.f32 %v756_v43, %v9466_v35  ;;  %v870_v48 = vadd.f32 %v869_v44, %v9466_v35  ;;  %6452 = vperm.xlu1 %8873, %v8121_v27   ;;  %6447 = vperm.xlu0 %8872, %v8120_v38   ;;  %v9656_v11 = vpop.permute.xlu0 %1643  ;;  %v8124_v27 = vld [vmem:[%s11035_s7 + $0xe0] sm:$0xff] }
 0x105   : > { %v908_v52 = vmax.f32 %v755_v41, 0.0  ;;  %v910_v53 = vmax.f32 %v868_v42, 0.0 }
 0x106   : > { %v909_v62 = vmax.f32 %v757_v47, 0.0  ;;  %v911_v63 = vmax.f32 %v870_v48, 0.0  ;;  %v760_v35 = vpop.f32.mrb[8].mxu0  ;;  %v873_v30 = vpop.f32.mrb[8].mxu1  ;;  %v8127_v47 = vld [vmem:[%s11035_s7 + $0xf8] sm:$0xff]  ;;  %v8126_v48 = vld [vmem:[%s11035_s7 + $0xf0] sm:$0xff] }
 0x107   : > { %v8196_v0 = vpack.c.bf16 %v908_v52, %v904_v29  ;;  %v8212_v3 = vpack.c.bf16 %v910_v53, %v906_v51  ;;  %v762_v4 = vpop.f32.mrb[9].mxu0  ;;  %v875_v8 = vpop.f32.mrb[9].mxu1  ;;  %v761_v14 = vadd.f32 %v760_v35, %v9478_v40  ;;  %v874_v15 = vadd.f32 %v873_v30, %v9478_v40 }
 0x108   : > { %6462 = vperm.xlu1 %8873, %v8123_v54   ;;  %v8194_v9 = vpack.c.bf16 %v909_v62, %v905_v58  ;;  %v8210_v10 = vpack.c.bf16 %v911_v63, %v907_v61  ;;  %6457 = vperm.xlu0 %8872, %v8122_v57   ;;  %v763_v19 = vadd.f32 %v762_v4, %v9478_v40  ;;  %v9678_v30 = vpop.permute.xlu1 %1658 }
 0x109   : > { %v876_v24 = vadd.f32 %v875_v8, %v9478_v40  ;;  %v912_v41 = vmax.f32 %v761_v14, 0.0  ;;  %v914_v42 = vmax.f32 %v874_v15, 0.0  ;;  %v8153_v8 = vld [vmem:[%s11037_s9 + $0xc8] sm:$0xff] }
 0x10a   : > { %v766_v25 = vpop.f32.mrb[10].mxu0  ;;  %v879_v26 = vpop.f32.mrb[10].mxu1  ;;  %8195 = vmatprep.subr.bf16.mxu0 %v8194_v9  ;;  %8211 = vmatprep.subr.bf16.mxu1 %v8210_v10  ;;  %v913_v29 = vmax.f32 %v763_v19, 0.0 }
 0x10b   : > { %v767_v28 = vadd.f32 %v766_v25, %v9476_v39  ;;  %v880_v31 = vadd.f32 %v879_v26, %v9476_v39  ;;  %v768_v34 = vpop.f32.mrb[11].mxu0  ;;  %v881_v37 = vpop.f32.mrb[11].mxu1  ;;  %8197 = vmatpush1.bf16.msra.mxu0 %v8196_v0  ;;  %8213 = vmatpush1.bf16.msra.mxu1 %v8212_v3  ;;  %v915_v51 = vmax.f32 %v876_v24, 0.0 }
 0x10c   : > { %v769_v38 = vadd.f32 %v768_v34, %v9476_v39  ;;  %v882_v40 = vadd.f32 %v881_v37, %v9476_v39  ;;  %6472 = vperm.xlu1 %8873, %v8125_v18   ;;  %6467 = vperm.xlu0 %8872, %v8124_v27   ;;  %v9680_v0 = vpop.permute.xlu0 %1653  ;;  %v8152_v18 = vld [vmem:[%s11037_s9 + $0xc0] sm:$0xff] }
 0x10d   : > { %v916_v43 = vmax.f32 %v767_v28, 0.0  ;;  %v918_v44 = vmax.f32 %v880_v31, 0.0 }
 0x10e   : > { %v917_v52 = vmax.f32 %v769_v38, 0.0  ;;  %v919_v53 = vmax.f32 %v882_v40, 0.0  ;;  %v772_v54 = vpop.f32.mrb[12].mxu0  ;;  %v885_v39 = vpop.f32.mrb[12].mxu1  ;;  %v8155_v38 = vld [vmem:[%s11037_s9 + $0xd8] sm:$0xff] }
 0x10f   : > { %v8200_v57 = vpack.c.bf16 %v916_v43, %v912_v41  ;;  %v8216_v58 = vpack.c.bf16 %v918_v44, %v914_v42  ;;  %v774_v61 = vpop.f32.mrb[13].mxu0  ;;  %v887_v62 = vpop.f32.mrb[13].mxu1  ;;  %v773_v3 = vadd.f32 %v772_v54, %v9494_v46  ;;  %v886_v4 = vadd.f32 %v885_v39, %v9494_v46  ;;  %v8154_v44 = vld [vmem:[%s11037_s9 + $0xd0] sm:$0xff]  ;;  %v8156_v54 = vld [vmem:[%s11037_s9 + $0xe0] sm:$0xff] }
 0x110   : > { %6482 = vperm.xlu1 %8873, %v8127_v47   ;;  %v8198_v63 = vpack.c.bf16 %v917_v52, %v913_v29  ;;  %v8214_v35 = vpack.c.bf16 %v919_v53, %v915_v51  ;;  %6477 = vperm.xlu0 %8872, %v8126_v48   ;;  %v775_v9 = vadd.f32 %v774_v61, %v9494_v46  ;;  %v9702_v48 = vpop.permute.xlu1 %2107  ;;  %v9704_v52 = vpop.permute.xlu0 %1947  ;;  %v8157_v53 = vld [vmem:[%s11037_s9 + $0xe8] sm:$0xff]  ;;  %v928_v39 = vld [vmem:[%s11032_s4] sm:$0xff]  ;;  %v8158_v61 = vld [vmem:[%s11037_s9 + $0xf0] sm:$0xff] }
 0x111   : > { %v888_v10 = vadd.f32 %v887_v62, %v9494_v46  ;;  %v920_v28 = vmax.f32 %v773_v3, 0.0  ;;  %v922_v31 = vmax.f32 %v886_v4, 0.0  ;;  %v8177_v3 = vld [vmem:[%s11039_s11 + $0xc] sm:$0xf]  ;;  %v930_v4 = vld [vmem:[%s11032_s4 + $0x10] sm:$0xff] }
 0x112   : > { %v778_v14 = vpop.f32.mrb[14].mxu0  ;;  %v891_v15 = vpop.f32.mrb[14].mxu1  ;;  %8199 = vmatprep.subr.bf16.mxu0 %v8198_v63  ;;  %8215 = vmatprep.subr.bf16.mxu1 %v8214_v35  ;;  %v921_v40 = vmax.f32 %v775_v9, 0.0  ;;  %v929_v63 = vld [vmem:[%s11032_s4 + $0x8] sm:$0xff] }
 0x113   : > { %v779_v19 = vadd.f32 %v778_v14, %v9492_v45  ;;  %v892_v24 = vadd.f32 %v891_v15, %v9492_v45  ;;  %v780_v25 = vpop.f32.mrb[15].mxu0  ;;  %v893_v26 = vpop.f32.mrb[15].mxu1  ;;  %8201 = vmatpush1.bf16.msra.mxu0 %v8200_v57  ;;  %8217 = vmatpush1.bf16.msra.mxu1 %v8216_v58  ;;  %v923_v41 = vmax.f32 %v888_v10, 0.0  ;;  %v8159_v57 = vld [vmem:[%s11037_s9 + $0xf8] sm:$0xff]  ;;  %v8181_v35 = vld [vmem:[%s11041_s13 + $0xc] sm:$0xf] }
 0x114   : > { %v781_v27 = vadd.f32 %v780_v25, %v9492_v45  ;;  %v894_v46 = vadd.f32 %v893_v26, %v9492_v45  ;;  %6792 = vperm.xlu1 %8873, %v8153_v8   ;;  %6787 = vperm.xlu0 %8872, %v8152_v18   ;;  %v9718_v58 = vpop.permute.xlu1 %2312  ;;  %v9725_v62 = vpop.permute.xlu0 %2307  ;;  %v931_v10 = vld [vmem:[%s11032_s4 + $0x18] sm:$0xff]  ;;  %v932_v14 = vld [vmem:[%s11032_s4 + $0x20] sm:$0xff]  ;;  %v933_v15 = vld [vmem:[%s11032_s4 + $0x28] sm:$0xff] }
 0x115   : > { %v924_v34 = vmax.f32 %v779_v19, 0.0  ;;  %v926_v37 = vmax.f32 %v892_v24, 0.0  ;;  %v934_v18 = vld [vmem:[%s11032_s4 + $0x30] sm:$0xff]  ;;  %v935_v19 = vld [vmem:[%s11032_s4 + $0x38] sm:$0xff] }
 0x116   : > { %v925_v42 = vmax.f32 %v781_v27, 0.0  ;;  %v927_v43 = vmax.f32 %v894_v46, 0.0 }
 0x117   : > { %v8204_v47 = vpack.c.bf16 %v924_v34, %v920_v28  ;;  %v8220_v45 = vpack.c.bf16 %v926_v37, %v922_v31 }
 0x118   : > { %6802 = vperm.xlu1 %8873, %v8155_v38   ;;  %v8202_v29 = vpack.c.bf16 %v925_v42, %v921_v40  ;;  %v8218_v51 = vpack.c.bf16 %v927_v43, %v923_v41  ;;  %6797 = vperm.xlu0 %8872, %v8154_v44   ;;  %v9745_v8 = vpop.permute.xlu1 %2322  ;;  %v9747_v9 = vpop.permute.xlu0 %2317 }
 0x11a   : > { %8203 = vmatprep.subr.bf16.mxu0 %v8202_v29  ;;  %8219 = vmatprep.subr.bf16.mxu1 %v8218_v51 }
 0x11b   : > { %8205 = vmatpush1.bf16.msra.mxu0 %v8204_v47  ;;  %8221 = vmatpush1.bf16.msra.mxu1 %v8220_v45 }
 0x11c   : > { %6812 = vperm.xlu1 %8873, %v8157_v53   ;;  %6807 = vperm.xlu0 %8872, %v8156_v54  }
 0x11e   : > { %7712 = vmatmul.mubr.msk.f32.vlgmr.msra.gmra.mrb[16].mxu0 %vm984_vm2, %v928_v39  ;;  %7720 = vmatmul.mubr.msk.f32.vlgmr.msra.gmra.mrb[16].mxu1 %vm984_vm2, %v928_v39 }
 0x11f   : > { %1079 = vmatprep.mubr.f32.mxu0 %v9007_v5  ;;  %1192 = vmatprep.mubr.f32.mxu1 %v9007_v5 }
 0x120   : > { %6822 = vperm.xlu1 %8873, %v8159_v57   ;;  %6817 = vperm.xlu0 %8872, %v8158_v61  }
 0x122   : > { %7713 = vmatmul.mubr.msk.f32.gmra.mrb[18].mxu0 %vm984_vm2, %v929_v63  ;;  %7721 = vmatmul.mubr.msk.f32.gmra.mrb[18].mxu1 %vm984_vm2, %v929_v63 }
 0x123   : > { %1085 = vmatprep.mubr.f32.mxu0 %v9007_v5  ;;  %1198 = vmatprep.mubr.f32.mxu1 %v9007_v5 }
 0x124   : > { %7275 = vperm.xlu1 %8873, %v8181_v35   ;;  %7113 = vperm.xlu0 %8872, %v8177_v3  }
 0x126   : > { %7714 = vmatmul.mubr.msk.f32.gmra.mrb[20].mxu0 %vm984_vm2, %v930_v4  ;;  %7722 = vmatmul.mubr.msk.f32.gmra.mrb[20].mxu1 %vm984_vm2, %v930_v4 }
 0x127   : > { %1091 = vmatprep.mubr.f32.mxu0 %v9007_v5  ;;  %1204 = vmatprep.mubr.f32.mxu1 %v9007_v5 }
 0x12a   : > { %7715 = vmatmul.mubr.msk.f32.gmra.mrb[22].mxu0 %vm984_vm2, %v931_v10  ;;  %7723 = vmatmul.mubr.msk.f32.gmra.mrb[22].mxu1 %vm984_vm2, %v931_v10 }
 0x12b   : > { %1097 = vmatprep.mubr.f32.mxu0 %v9007_v5  ;;  %1210 = vmatprep.mubr.f32.mxu1 %v9007_v5 }
 0x12e   : > { %7716 = vmatmul.mubr.msk.f32.gmra.mrb[24].mxu0 %vm984_vm2, %v932_v14  ;;  %7724 = vmatmul.mubr.msk.f32.gmra.mrb[24].mxu1 %vm984_vm2, %v932_v14 }
 0x12f   : > { %1103 = vmatprep.mubr.f32.mxu0 %v9007_v5  ;;  %1216 = vmatprep.mubr.f32.mxu1 %v9007_v5 }
 0x132   : > { %7717 = vmatmul.mubr.msk.f32.gmra.mrb[26].mxu0 %vm984_vm2, %v933_v15  ;;  %7725 = vmatmul.mubr.msk.f32.gmra.mrb[26].mxu1 %vm984_vm2, %v933_v15 }
 0x133   : > { %1109 = vmatprep.mubr.f32.mxu0 %v9007_v5  ;;  %1222 = vmatprep.mubr.f32.mxu1 %v9007_v5 }
 0x136   : > { %7718 = vmatmul.mubr.msk.f32.gmra.mrb[28].mxu0 %vm984_vm2, %v934_v18  ;;  %7726 = vmatmul.mubr.msk.f32.gmra.mrb[28].mxu1 %vm984_vm2, %v934_v18 }
 0x137   : > { %1115 = vmatprep.mubr.f32.mxu0 %v9007_v5  ;;  %1228 = vmatprep.mubr.f32.mxu1 %v9007_v5 }
 0x13a   : > { %7719 = vmatmul.mubr.msk.f32.gmra.mrb[30].mxu0 %vm984_vm2, %v935_v19  ;;  %7727 = vmatmul.mubr.msk.f32.gmra.mrb[30].mxu1 %vm984_vm2, %v935_v19 }
 0x13b   : > { %1411 = vmatprep.mubr.f32.mxu0 %v9007_v5  ;;  %1524 = vmatprep.mubr.f32.mxu1 %v9007_v5 }
 0x1f1   : > { %v1075_v24 = vpop.f32.mrb[16].mxu0  ;;  %v1188_v25 = vpop.f32.mrb[16].mxu1 }
 0x1f2   : > { %v1077_v26 = vpop.f32.mrb[17].mxu0  ;;  %v1190_v27 = vpop.f32.mrb[17].mxu1  ;;  %v1076_v46 = vadd.f32 %v1075_v24, %v9504_v50  ;;  %v1189_v28 = vadd.f32 %v1188_v25, %v9504_v50 }
 0x1f3   : > { %v1078_v31 = vadd.f32 %v1077_v26, %v9504_v50  ;;  %v1191_v34 = vadd.f32 %v1190_v27, %v9504_v50 }
 0x1f4   : > { %v1235_v45 = vmax.f32 %v1076_v46, 0.0  ;;  %v1237_v29 = vmax.f32 %v1189_v28, 0.0 }
 0x1f5   : > { %v1081_v37 = vpop.f32.mrb[18].mxu0  ;;  %v1194_v38 = vpop.f32.mrb[18].mxu1  ;;  %v1236_v54 = vmax.f32 %v1078_v31, 0.0  ;;  %v1238_v39 = vmax.f32 %v1191_v34, 0.0 }
 0x1f6   : > { %v1082_v40 = vadd.f32 %v1081_v37, %v9502_v49  ;;  %v1195_v41 = vadd.f32 %v1194_v38, %v9502_v49  ;;  %v1083_v42 = vpop.f32.mrb[19].mxu0  ;;  %v1196_v43 = vpop.f32.mrb[19].mxu1 }
 0x1f7   : > { %v1084_v44 = vadd.f32 %v1083_v42, %v9502_v49  ;;  %v1197_v47 = vadd.f32 %v1196_v43, %v9502_v49 }
 0x1f8   : > { %v1239_v51 = vmax.f32 %v1082_v40, 0.0  ;;  %v1241_v53 = vmax.f32 %v1195_v41, 0.0 }
 0x1f9   : > { %v1240_v57 = vmax.f32 %v1084_v44, 0.0  ;;  %v1242_v50 = vmax.f32 %v1197_v47, 0.0  ;;  %v1087_v61 = vpop.f32.mrb[20].mxu0  ;;  %v1200_v63 = vpop.f32.mrb[20].mxu1 }
 0x1fa   : > { %v8224_v35 = vpack.c.bf16 %v1239_v51, %v1235_v45  ;;  %v8240_v3 = vpack.c.bf16 %v1241_v53, %v1237_v29  ;;  %v1089_v4 = vpop.f32.mrb[21].mxu0  ;;  %v1202_v10 = vpop.f32.mrb[21].mxu1  ;;  %v1088_v18 = vadd.f32 %v1087_v61, %v9520_v56  ;;  %v1201_v49 = vadd.f32 %v1200_v63, %v9520_v56 }
 0x1fb   : > { %v8222_v14 = vpack.c.bf16 %v1240_v57, %v1236_v54  ;;  %v8238_v15 = vpack.c.bf16 %v1242_v50, %v1238_v39  ;;  %v1090_v19 = vadd.f32 %v1089_v4, %v9520_v56  ;;  %v1203_v24 = vadd.f32 %v1202_v10, %v9520_v56 }
 0x1fc   : > { %v1243_v38 = vmax.f32 %v1088_v18, 0.0  ;;  %v1245_v40 = vmax.f32 %v1201_v49, 0.0 }
 0x1fd   : > { %v1093_v25 = vpop.f32.mrb[22].mxu0  ;;  %v1206_v26 = vpop.f32.mrb[22].mxu1  ;;  %8223 = vmatprep.subr.bf16.mxu0 %v8222_v14  ;;  %8239 = vmatprep.subr.bf16.mxu1 %v8238_v15  ;;  %v1244_v42 = vmax.f32 %v1090_v19, 0.0  ;;  %v1246_v43 = vmax.f32 %v1203_v24, 0.0 }
 0x1fe   : > { %v1094_v27 = vadd.f32 %v1093_v25, %v9518_v55  ;;  %v1207_v46 = vadd.f32 %v1206_v26, %v9518_v55  ;;  %v1095_v28 = vpop.f32.mrb[23].mxu0  ;;  %v1208_v31 = vpop.f32.mrb[23].mxu1  ;;  %8225 = vmatpush1.bf16.msra.mxu0 %v8224_v35  ;;  %8241 = vmatpush1.bf16.msra.mxu1 %v8240_v3 }
 0x1ff   : > { %v1096_v34 = vadd.f32 %v1095_v28, %v9518_v55  ;;  %v1209_v37 = vadd.f32 %v1208_v31, %v9518_v55 }
 0x200   : > { %v1247_v41 = vmax.f32 %v1094_v27, 0.0  ;;  %v1249_v56 = vmax.f32 %v1207_v46, 0.0 }
 0x201   : > { %v1248_v44 = vmax.f32 %v1096_v34, 0.0  ;;  %v1250_v47 = vmax.f32 %v1209_v37, 0.0  ;;  %v1099_v45 = vpop.f32.mrb[24].mxu0  ;;  %v1212_v29 = vpop.f32.mrb[24].mxu1 }
 0x202   : > { %v8228_v51 = vpack.c.bf16 %v1247_v41, %v1243_v38  ;;  %v8244_v53 = vpack.c.bf16 %v1249_v56, %v1245_v40  ;;  %v1101_v54 = vpop.f32.mrb[25].mxu0  ;;  %v1214_v39 = vpop.f32.mrb[25].mxu1  ;;  %v1100_v61 = vadd.f32 %v1099_v45, %v9530_v60  ;;  %v1213_v55 = vadd.f32 %v1212_v29, %v9530_v60 }
 0x203   : > { %v8226_v57 = vpack.c.bf16 %v1248_v44, %v1244_v42  ;;  %v8242_v50 = vpack.c.bf16 %v1250_v47, %v1246_v43  ;;  %v1102_v63 = vadd.f32 %v1101_v54, %v9530_v60  ;;  %v1215_v35 = vadd.f32 %v1214_v39, %v9530_v60 }
 0x204   : > { %v1251_v24 = vmax.f32 %v1100_v61, 0.0  ;;  %v1253_v25 = vmax.f32 %v1213_v55, 0.0 }
 0x205   : > { %v1105_v3 = vpop.f32.mrb[26].mxu0  ;;  %v1218_v4 = vpop.f32.mrb[26].mxu1  ;;  %8227 = vmatprep.subr.bf16.mxu0 %v8226_v57  ;;  %8243 = vmatprep.subr.bf16.mxu1 %v8242_v50  ;;  %v1252_v27 = vmax.f32 %v1102_v63, 0.0  ;;  %v1254_v46 = vmax.f32 %v1215_v35, 0.0 }
 0x206   : > { %v1106_v10 = vadd.f32 %v1105_v3, %v9528_v59  ;;  %v1219_v14 = vadd.f32 %v1218_v4, %v9528_v59  ;;  %v1107_v15 = vpop.f32.mrb[27].mxu0  ;;  %v1220_v18 = vpop.f32.mrb[27].mxu1  ;;  %8229 = vmatpush1.bf16.msra.mxu0 %v8228_v51  ;;  %8245 = vmatpush1.bf16.msra.mxu1 %v8244_v53 }
 0x207   : > { %v1108_v49 = vadd.f32 %v1107_v15, %v9528_v59  ;;  %v1221_v19 = vadd.f32 %v1220_v18, %v9528_v59 }
 0x208   : > { %v1255_v26 = vmax.f32 %v1106_v10, 0.0  ;;  %v1257_v60 = vmax.f32 %v1219_v14, 0.0 }
 0x209   : > { %v1256_v28 = vmax.f32 %v1108_v49, 0.0  ;;  %v1258_v31 = vmax.f32 %v1221_v19, 0.0  ;;  %v1111_v34 = vpop.f32.mrb[28].mxu0  ;;  %v1224_v37 = vpop.f32.mrb[28].mxu1 }
 0x20a   : > { %v8232_v38 = vpack.c.bf16 %v1255_v26, %v1251_v24  ;;  %v8248_v40 = vpack.c.bf16 %v1257_v60, %v1253_v25  ;;  %v1113_v41 = vpop.f32.mrb[29].mxu0  ;;  %v1226_v56 = vpop.f32.mrb[29].mxu1  ;;  %v1112_v44 = vadd.f32 %v1111_v34, %v9546_v2  ;;  %v1225_v59 = vadd.f32 %v1224_v37, %v9546_v2  ;;  %v1268_v24 = vld [vmem:[%s11034_s6 + $0x8] sm:$0xff]  ;;  %v1269_v25 = vld [vmem:[%s11034_s6 + $0x10] sm:$0xff]  ;;  %v1270_v26 = vld [vmem:[%s11034_s6 + $0x18] sm:$0xff] }
 0x20b   : > { %v8230_v42 = vpack.c.bf16 %v1256_v28, %v1252_v27  ;;  %v8246_v43 = vpack.c.bf16 %v1258_v31, %v1254_v46  ;;  %v1114_v47 = vadd.f32 %v1113_v41, %v9546_v2  ;;  %v1227_v45 = vadd.f32 %v1226_v56, %v9546_v2  ;;  %v1271_v60 = vld [vmem:[%s11034_s6 + $0x20] sm:$0xff]  ;;  %v1272_v27 = vld [vmem:[%s11034_s6 + $0x28] sm:$0xff]  ;;  %v1273_v46 = vld [vmem:[%s11034_s6 + $0x30] sm:$0xff] }
 0x20c   : > { %v1259_v55 = vmax.f32 %v1112_v44, 0.0  ;;  %v1261_v63 = vmax.f32 %v1225_v59, 0.0  ;;  %v1274_v28 = vld [vmem:[%s11034_s6 + $0x38] sm:$0xff] }
 0x20d   : > { %v1117_v29 = vpop.f32.mrb[30].mxu0  ;;  %v1230_v51 = vpop.f32.mrb[30].mxu1  ;;  %8231 = vmatprep.subr.bf16.mxu0 %v8230_v42  ;;  %8247 = vmatprep.subr.bf16.mxu1 %v8246_v43  ;;  %v1260_v3 = vmax.f32 %v1114_v47, 0.0  ;;  %v1262_v4 = vmax.f32 %v1227_v45, 0.0 }
 0x20e   : > { %v1118_v53 = vadd.f32 %v1117_v29, %v9544_v1  ;;  %v1231_v54 = vadd.f32 %v1230_v51, %v9544_v1  ;;  %v1119_v39 = vpop.f32.mrb[31].mxu0  ;;  %v1232_v57 = vpop.f32.mrb[31].mxu1  ;;  %8233 = vmatpush1.bf16.msra.mxu0 %v8232_v38  ;;  %8249 = vmatpush1.bf16.msra.mxu1 %v8248_v40 }
 0x20f   : > { %v1120_v50 = vadd.f32 %v1119_v39, %v9544_v1  ;;  %v1233_v61 = vadd.f32 %v1232_v57, %v9544_v1  ;;  %v1267_v1 = vld [vmem:[%s11034_s6] sm:$0xff] }
 0x210   : > { %v1263_v35 = vmax.f32 %v1118_v53, 0.0  ;;  %v1265_v2 = vmax.f32 %v1231_v54, 0.0 }
 0x211   : > { %v1264_v10 = vmax.f32 %v1120_v50, 0.0  ;;  %v1266_v14 = vmax.f32 %v1233_v61, 0.0 }
 0x212   : > { %v8236_v15 = vpack.c.bf16 %v1263_v35, %v1259_v55  ;;  %v8252_v18 = vpack.c.bf16 %v1265_v2, %v1261_v63 }
 0x213   : > { %v8234_v49 = vpack.c.bf16 %v1264_v10, %v1260_v3  ;;  %v8250_v19 = vpack.c.bf16 %v1266_v14, %v1262_v4 }
 0x215   : > { %8235 = vmatprep.subr.bf16.mxu0 %v8234_v49  ;;  %8251 = vmatprep.subr.bf16.mxu1 %v8250_v19 }
 0x216   : > { %8237 = vmatpush1.bf16.msra.mxu0 %v8236_v15  ;;  %8253 = vmatpush1.bf16.msra.mxu1 %v8252_v18 }
 0x219   : > { %7728 = vmatmul.mubr.msk.f32.vlgmr.msra.gmra.mrb[32].mxu0 %vm984_vm2, %v1267_v1  ;;  %7736 = vmatmul.mubr.msk.f32.vlgmr.msra.gmra.mrb[32].mxu1 %vm984_vm2, %v1267_v1 }
 0x21a   : > { %1417 = vmatprep.mubr.f32.mxu0 %v9007_v5  ;;  %1530 = vmatprep.mubr.f32.mxu1 %v9007_v5 }
 0x21d   : > { %7729 = vmatmul.mubr.msk.f32.gmra.mrb[34].mxu0 %vm984_vm2, %v1268_v24  ;;  %7737 = vmatmul.mubr.msk.f32.gmra.mrb[34].mxu1 %vm984_vm2, %v1268_v24 }
 0x21e   : > { %1423 = vmatprep.mubr.f32.mxu0 %v9007_v5  ;;  %1536 = vmatprep.mubr.f32.mxu1 %v9007_v5 }
 0x221   : > { %7730 = vmatmul.mubr.msk.f32.gmra.mrb[36].mxu0 %vm984_vm2, %v1269_v25  ;;  %7738 = vmatmul.mubr.msk.f32.gmra.mrb[36].mxu1 %vm984_vm2, %v1269_v25 }
 0x222   : > { %1429 = vmatprep.mubr.f32.mxu0 %v9007_v5  ;;  %1542 = vmatprep.mubr.f32.mxu1 %v9007_v5 }
 0x225   : > { %7731 = vmatmul.mubr.msk.f32.gmra.mrb[38].mxu0 %vm984_vm2, %v1270_v26  ;;  %7739 = vmatmul.mubr.msk.f32.gmra.mrb[38].mxu1 %vm984_vm2, %v1270_v26 }
 0x226   : > { %1435 = vmatprep.mubr.f32.mxu0 %v9007_v5  ;;  %1548 = vmatprep.mubr.f32.mxu1 %v9007_v5 }
 0x229   : > { %7732 = vmatmul.mubr.msk.f32.gmra.mrb[40].mxu0 %vm984_vm2, %v1271_v60  ;;  %7740 = vmatmul.mubr.msk.f32.gmra.mrb[40].mxu1 %vm984_vm2, %v1271_v60 }
 0x22a   : > { %1441 = vmatprep.mubr.f32.mxu0 %v9007_v5  ;;  %1554 = vmatprep.mubr.f32.mxu1 %v9007_v5 }
 0x22d   : > { %7733 = vmatmul.mubr.msk.f32.gmra.mrb[42].mxu0 %vm984_vm2, %v1272_v27  ;;  %7741 = vmatmul.mubr.msk.f32.gmra.mrb[42].mxu1 %vm984_vm2, %v1272_v27 }
 0x22e   : > { %1447 = vmatprep.mubr.f32.mxu0 %v9007_v5  ;;  %1560 = vmatprep.mubr.f32.mxu1 %v9007_v5 }
 0x231   : > { %7734 = vmatmul.mubr.msk.f32.gmra.mrb[44].mxu0 %vm984_vm2, %v1273_v46  ;;  %7742 = vmatmul.mubr.msk.f32.gmra.mrb[44].mxu1 %vm984_vm2, %v1273_v46 }
 0x232   : > { %1453 = vmatprep.mubr.f32.mxu0 %v9007_v5  ;;  %1566 = vmatprep.mubr.f32.mxu1 %v9007_v5 }
 0x235   : > { %7735 = vmatmul.mubr.msk.f32.gmra.mrb[46].mxu0 %vm984_vm2, %v1274_v28  ;;  %7743 = vmatmul.mubr.msk.f32.gmra.mrb[46].mxu1 %vm984_vm2, %v1274_v28 }
 0x236   : > { %1749 = vmatprep.mubr.f32.mxu0 %v9007_v5  ;;  %1862 = vmatprep.mubr.f32.mxu1 %v9007_v5 }
 0x2ec   : > { %v1413_v31 = vpop.f32.mrb[32].mxu0  ;;  %v1526_v34 = vpop.f32.mrb[32].mxu1 }
 0x2ed   : > { %v1415_v37 = vpop.f32.mrb[33].mxu0  ;;  %v1528_v38 = vpop.f32.mrb[33].mxu1  ;;  %v1414_v40 = vadd.f32 %v1413_v31, %v9556_v7  ;;  %v1527_v41 = vadd.f32 %v1526_v34, %v9556_v7 }
 0x2ee   : > { %v1416_v56 = vadd.f32 %v1415_v37, %v9556_v7  ;;  %v1529_v42 = vadd.f32 %v1528_v38, %v9556_v7 }
 0x2ef   : > { %v1573_v54 = vmax.f32 %v1414_v40, 0.0  ;;  %v1575_v39 = vmax.f32 %v1527_v41, 0.0 }
 0x2f0   : > { %v1419_v43 = vpop.f32.mrb[34].mxu0  ;;  %v1532_v44 = vpop.f32.mrb[34].mxu1  ;;  %v1574_v61 = vmax.f32 %v1416_v56, 0.0  ;;  %v1576_v55 = vmax.f32 %v1529_v42, 0.0 }
 0x2f1   : > { %v1420_v59 = vadd.f32 %v1419_v43, %v9554_v6  ;;  %v1533_v47 = vadd.f32 %v1532_v44, %v9554_v6  ;;  %v1421_v45 = vpop.f32.mrb[35].mxu0  ;;  %v1534_v29 = vpop.f32.mrb[35].mxu1 }
 0x2f2   : > { %v1422_v51 = vadd.f32 %v1421_v45, %v9554_v6  ;;  %v1535_v53 = vadd.f32 %v1534_v29, %v9554_v6 }
 0x2f3   : > { %v1577_v57 = vmax.f32 %v1420_v59, 0.0  ;;  %v1579_v50 = vmax.f32 %v1533_v47, 0.0 }
 0x2f4   : > { %v1578_v63 = vmax.f32 %v1422_v51, 0.0  ;;  %v1580_v7 = vmax.f32 %v1535_v53, 0.0  ;;  %v1425_v35 = vpop.f32.mrb[36].mxu0  ;;  %v1538_v2 = vpop.f32.mrb[36].mxu1 }
 0x2f5   : > { %v8256_v3 = vpack.c.bf16 %v1577_v57, %v1573_v54  ;;  %v8272_v4 = vpack.c.bf16 %v1579_v50, %v1575_v39  ;;  %v1427_v10 = vpop.f32.mrb[37].mxu0  ;;  %v1540_v14 = vpop.f32.mrb[37].mxu1  ;;  %v1426_v49 = vadd.f32 %v1425_v35, %v9572_v13  ;;  %v1539_v6 = vadd.f32 %v1538_v2, %v9572_v13 }
 0x2f6   : > { %v8254_v15 = vpack.c.bf16 %v1578_v63, %v1574_v61  ;;  %v8270_v18 = vpack.c.bf16 %v1580_v7, %v1576_v55  ;;  %v1428_v19 = vadd.f32 %v1427_v10, %v9572_v13  ;;  %v1541_v1 = vadd.f32 %v1540_v14, %v9572_v13 }
 0x2f7   : > { %v1581_v34 = vmax.f32 %v1426_v49, 0.0  ;;  %v1583_v37 = vmax.f32 %v1539_v6, 0.0 }
 0x2f8   : > { %v1431_v24 = vpop.f32.mrb[38].mxu0  ;;  %v1544_v25 = vpop.f32.mrb[38].mxu1  ;;  %8255 = vmatprep.subr.bf16.mxu0 %v8254_v15  ;;  %8271 = vmatprep.subr.bf16.mxu1 %v8270_v18  ;;  %v1582_v40 = vmax.f32 %v1428_v19, 0.0  ;;  %v1584_v41 = vmax.f32 %v1541_v1, 0.0 }
 0x2f9   : > { %v1432_v26 = vadd.f32 %v1431_v24, %v9570_v12  ;;  %v1545_v60 = vadd.f32 %v1544_v25, %v9570_v12  ;;  %v1433_v27 = vpop.f32.mrb[39].mxu0  ;;  %v1546_v46 = vpop.f32.mrb[39].mxu1  ;;  %8257 = vmatpush1.bf16.msra.mxu0 %v8256_v3  ;;  %8273 = vmatpush1.bf16.msra.mxu1 %v8272_v4 }
 0x2fa   : > { %v1434_v28 = vadd.f32 %v1433_v27, %v9570_v12  ;;  %v1547_v31 = vadd.f32 %v1546_v46, %v9570_v12 }
 0x2fb   : > { %v1585_v38 = vmax.f32 %v1432_v26, 0.0  ;;  %v1587_v13 = vmax.f32 %v1545_v60, 0.0 }
 0x2fc   : > { %v1586_v56 = vmax.f32 %v1434_v28, 0.0  ;;  %v1588_v42 = vmax.f32 %v1547_v31, 0.0  ;;  %v1437_v43 = vpop.f32.mrb[40].mxu0  ;;  %v1550_v44 = vpop.f32.mrb[40].mxu1 }
 0x2fd   : > { %v8260_v59 = vpack.c.bf16 %v1585_v38, %v1581_v34  ;;  %v8276_v47 = vpack.c.bf16 %v1587_v13, %v1583_v37  ;;  %v1439_v45 = vpop.f32.mrb[41].mxu0  ;;  %v1552_v29 = vpop.f32.mrb[41].mxu1  ;;  %v1438_v54 = vadd.f32 %v1437_v43, %v9582_v17  ;;  %v1551_v12 = vadd.f32 %v1550_v44, %v9582_v17 }
 0x2fe   : > { %v8258_v51 = vpack.c.bf16 %v1586_v56, %v1582_v40  ;;  %v8274_v53 = vpack.c.bf16 %v1588_v42, %v1584_v41  ;;  %v1440_v39 = vadd.f32 %v1439_v45, %v9582_v17  ;;  %v1553_v57 = vadd.f32 %v1552_v29, %v9582_v17 }
 0x2ff   : > { %v1589_v4 = vmax.f32 %v1438_v54, 0.0  ;;  %v1591_v10 = vmax.f32 %v1551_v12, 0.0 }
 0x300   : > { %v1443_v50 = vpop.f32.mrb[42].mxu0  ;;  %v1556_v61 = vpop.f32.mrb[42].mxu1  ;;  %8259 = vmatprep.subr.bf16.mxu0 %v8258_v51  ;;  %8275 = vmatprep.subr.bf16.mxu1 %v8274_v53  ;;  %v1590_v15 = vmax.f32 %v1440_v39, 0.0  ;;  %v1592_v18 = vmax.f32 %v1553_v57, 0.0 }
 0x301   : > { %v1444_v55 = vadd.f32 %v1443_v50, %v9580_v16  ;;  %v1557_v63 = vadd.f32 %v1556_v61, %v9580_v16  ;;  %v1445_v7 = vpop.f32.mrb[43].mxu0  ;;  %v1558_v35 = vpop.f32.mrb[43].mxu1  ;;  %8261 = vmatpush1.bf16.msra.mxu0 %v8260_v59  ;;  %8277 = vmatpush1.bf16.msra.mxu1 %v8276_v47  ;;  %v1606_v50 = vld [vmem:[%s11036_s8 + $0x8] sm:$0xff]  ;;  %v1607_v61 = vld [vmem:[%s11036_s8 + $0x10] sm:$0xff] }
 0x302   : > { %v1446_v2 = vadd.f32 %v1445_v7, %v9580_v16  ;;  %v1559_v3 = vadd.f32 %v1558_v35, %v9580_v16  ;;  %v1610_v7 = vld [vmem:[%s11036_s8 + $0x28] sm:$0xff]  ;;  %v1611_v35 = vld [vmem:[%s11036_s8 + $0x30] sm:$0xff] }
 0x303   : > { %v1593_v14 = vmax.f32 %v1444_v55, 0.0  ;;  %v1595_v17 = vmax.f32 %v1557_v63, 0.0  ;;  %v1608_v55 = vld [vmem:[%s11036_s8 + $0x18] sm:$0xff]  ;;  %v1609_v63 = vld [vmem:[%s11036_s8 + $0x20] sm:$0xff] }
 0x304   : > { %v1594_v49 = vmax.f32 %v1446_v2, 0.0  ;;  %v1596_v6 = vmax.f32 %v1559_v3, 0.0  ;;  %v1449_v19 = vpop.f32.mrb[44].mxu0  ;;  %v1562_v1 = vpop.f32.mrb[44].mxu1  ;;  %v1612_v2 = vld [vmem:[%s11036_s8 + $0x38] sm:$0xff] }
 0x305   : > { %v8264_v24 = vpack.c.bf16 %v1593_v14, %v1589_v4  ;;  %v8280_v25 = vpack.c.bf16 %v1595_v17, %v1591_v10  ;;  %v1451_v26 = vpop.f32.mrb[45].mxu0  ;;  %v1564_v60 = vpop.f32.mrb[45].mxu1  ;;  %v1450_v28 = vadd.f32 %v1449_v19, %v9598_v23  ;;  %v1563_v16 = vadd.f32 %v1562_v1, %v9598_v23 }
 0x306   : > { %v8262_v27 = vpack.c.bf16 %v1594_v49, %v1590_v15  ;;  %v8278_v46 = vpack.c.bf16 %v1596_v6, %v1592_v18  ;;  %v1452_v31 = vadd.f32 %v1451_v26, %v9598_v23  ;;  %v1565_v34 = vadd.f32 %v1564_v60, %v9598_v23 }
 0x307   : > { %v1597_v44 = vmax.f32 %v1450_v28, 0.0  ;;  %v1599_v59 = vmax.f32 %v1563_v16, 0.0 }
 0x308   : > { %v1455_v37 = vpop.f32.mrb[46].mxu0  ;;  %v1568_v38 = vpop.f32.mrb[46].mxu1  ;;  %8263 = vmatprep.subr.bf16.mxu0 %v8262_v27  ;;  %8279 = vmatprep.subr.bf16.mxu1 %v8278_v46  ;;  %v1598_v45 = vmax.f32 %v1452_v31, 0.0  ;;  %v1600_v29 = vmax.f32 %v1565_v34, 0.0 }
 0x309   : > { %v1456_v13 = vadd.f32 %v1455_v37, %v9596_v22  ;;  %v1569_v40 = vadd.f32 %v1568_v38, %v9596_v22  ;;  %v1457_v41 = vpop.f32.mrb[47].mxu0  ;;  %v1570_v56 = vpop.f32.mrb[47].mxu1  ;;  %8265 = vmatpush1.bf16.msra.mxu0 %v8264_v24  ;;  %8281 = vmatpush1.bf16.msra.mxu1 %v8280_v25 }
 0x30a   : > { %v1458_v42 = vadd.f32 %v1457_v41, %v9596_v22  ;;  %v1571_v43 = vadd.f32 %v1570_v56, %v9596_v22  ;;  %v1605_v22 = vld [vmem:[%s11036_s8] sm:$0xff] }
 0x30b   : > { %v1601_v47 = vmax.f32 %v1456_v13, 0.0  ;;  %v1603_v23 = vmax.f32 %v1569_v40, 0.0 }
 0x30c   : > { %v1602_v51 = vmax.f32 %v1458_v42, 0.0  ;;  %v1604_v53 = vmax.f32 %v1571_v43, 0.0 }
 0x30d   : > { %v8268_v54 = vpack.c.bf16 %v1601_v47, %v1597_v44  ;;  %v8284_v12 = vpack.c.bf16 %v1603_v23, %v1599_v59 }
 0x30e   : > { %v8266_v39 = vpack.c.bf16 %v1602_v51, %v1598_v45  ;;  %v8282_v57 = vpack.c.bf16 %v1604_v53, %v1600_v29 }
 0x310   : > { %8267 = vmatprep.subr.bf16.mxu0 %v8266_v39  ;;  %8283 = vmatprep.subr.bf16.mxu1 %v8282_v57 }
 0x311   : > { %8269 = vmatpush1.bf16.msra.mxu0 %v8268_v54  ;;  %8285 = vmatpush1.bf16.msra.mxu1 %v8284_v12 }
 0x314   : > { %7744 = vmatmul.mubr.msk.f32.vlgmr.msra.gmra.mrb[48].mxu0 %vm984_vm2, %v1605_v22  ;;  %7752 = vmatmul.mubr.msk.f32.vlgmr.msra.gmra.mrb[48].mxu1 %vm984_vm2, %v1605_v22 }
 0x315   : > { %1755 = vmatprep.mubr.f32.mxu0 %v9007_v5  ;;  %1868 = vmatprep.mubr.f32.mxu1 %v9007_v5 }
 0x318   : > { %7745 = vmatmul.mubr.msk.f32.gmra.mrb[50].mxu0 %vm984_vm2, %v1606_v50  ;;  %7753 = vmatmul.mubr.msk.f32.gmra.mrb[50].mxu1 %vm984_vm2, %v1606_v50 }
 0x319   : > { %1761 = vmatprep.mubr.f32.mxu0 %v9007_v5  ;;  %1874 = vmatprep.mubr.f32.mxu1 %v9007_v5 }
 0x31c   : > { %7746 = vmatmul.mubr.msk.f32.gmra.mrb[52].mxu0 %vm984_vm2, %v1607_v61  ;;  %7754 = vmatmul.mubr.msk.f32.gmra.mrb[52].mxu1 %vm984_vm2, %v1607_v61 }
 0x31d   : > { %1767 = vmatprep.mubr.f32.mxu0 %v9007_v5  ;;  %1880 = vmatprep.mubr.f32.mxu1 %v9007_v5 }
 0x320   : > { %7747 = vmatmul.mubr.msk.f32.gmra.mrb[54].mxu0 %vm984_vm2, %v1608_v55  ;;  %7755 = vmatmul.mubr.msk.f32.gmra.mrb[54].mxu1 %vm984_vm2, %v1608_v55 }
 0x321   : > { %1773 = vmatprep.mubr.f32.mxu0 %v9007_v5  ;;  %1886 = vmatprep.mubr.f32.mxu1 %v9007_v5 }
 0x324   : > { %7748 = vmatmul.mubr.msk.f32.gmra.mrb[56].mxu0 %vm984_vm2, %v1609_v63  ;;  %7756 = vmatmul.mubr.msk.f32.gmra.mrb[56].mxu1 %vm984_vm2, %v1609_v63 }
 0x325   : > { %1779 = vmatprep.mubr.f32.mxu0 %v9007_v5  ;;  %1892 = vmatprep.mubr.f32.mxu1 %v9007_v5 }
 0x328   : > { %7749 = vmatmul.mubr.msk.f32.gmra.mrb[58].mxu0 %vm984_vm2, %v1610_v7  ;;  %7757 = vmatmul.mubr.msk.f32.gmra.mrb[58].mxu1 %vm984_vm2, %v1610_v7 }
 0x329   : > { %1785 = vmatprep.mubr.f32.mxu0 %v9007_v5  ;;  %1898 = vmatprep.mubr.f32.mxu1 %v9007_v5 }
 0x32c   : > { %7750 = vmatmul.mubr.msk.f32.gmra.mrb[60].mxu0 %vm984_vm2, %v1611_v35  ;;  %7758 = vmatmul.mubr.msk.f32.gmra.mrb[60].mxu1 %vm984_vm2, %v1611_v35 }
 0x32d   : > { %1791 = vmatprep.mubr.f32.mxu0 %v9007_v5  ;;  %1904 = vmatprep.mubr.f32.mxu1 %v9007_v5 }
 0x330   : > { %7751 = vmatmul.mubr.msk.f32.gmra.mrb[62].mxu0 %vm984_vm2, %v1612_v2  ;;  %7759 = vmatmul.mubr.msk.f32.gmra.mrb[62].mxu1 %vm984_vm2, %v1612_v2 }
 0x331   : > { %2017 = vmatprep.mubr.f32.mxu0 %v9007_v5  ;;  %2088 = vmatprep.mubr.f32.mxu1 %v9007_v5 }
 0x3e7   : > { %v1751_v3 = vpop.f32.mrb[48].mxu0  ;;  %v1864_v4 = vpop.f32.mrb[48].mxu1 }
 0x3e8   : > { %v1753_v10 = vpop.f32.mrb[49].mxu0  ;;  %v1866_v14 = vpop.f32.mrb[49].mxu1  ;;  %v1752_v17 = vadd.f32 %v1751_v3, %v9608_v33  ;;  %v1865_v15 = vadd.f32 %v1864_v4, %v9608_v33 }
 0x3e9   : > { %v1754_v18 = vadd.f32 %v1753_v10, %v9608_v33  ;;  %v1867_v49 = vadd.f32 %v1866_v14, %v9608_v33 }
 0x3ea   : > { %v1911_v46 = vmax.f32 %v1752_v17, 0.0  ;;  %v1913_v28 = vmax.f32 %v1865_v15, 0.0 }
 0x3eb   : > { %v1757_v6 = vpop.f32.mrb[50].mxu0  ;;  %v1870_v19 = vpop.f32.mrb[50].mxu1  ;;  %v1912_v34 = vmax.f32 %v1754_v18, 0.0  ;;  %v1914_v37 = vmax.f32 %v1867_v49, 0.0 }
 0x3ec   : > { %v1758_v1 = vadd.f32 %v1757_v6, %v9606_v32  ;;  %v1871_v24 = vadd.f32 %v1870_v19, %v9606_v32  ;;  %v1759_v25 = vpop.f32.mrb[51].mxu0  ;;  %v1872_v26 = vpop.f32.mrb[51].mxu1 }
 0x3ed   : > { %v1760_v60 = vadd.f32 %v1759_v25, %v9606_v32  ;;  %v1873_v27 = vadd.f32 %v1872_v26, %v9606_v32 }
 0x3ee   : > { %v1915_v16 = vmax.f32 %v1758_v1, 0.0  ;;  %v1917_v31 = vmax.f32 %v1871_v24, 0.0 }
 0x3ef   : > { %v1916_v38 = vmax.f32 %v1760_v60, 0.0  ;;  %v1918_v33 = vmax.f32 %v1873_v27, 0.0  ;;  %v1763_v13 = vpop.f32.mrb[52].mxu0  ;;  %v1876_v40 = vpop.f32.mrb[52].mxu1 }
 0x3f0   : > { %v9972_v41 = vpack.c.bf16 %v1915_v16, %v1911_v46  ;;  %v9974_v56 = vpack.c.bf16 %v1917_v31, %v1913_v28  ;;  %v1765_v42 = vpop.f32.mrb[53].mxu0  ;;  %v1878_v43 = vpop.f32.mrb[53].mxu1  ;;  %v1764_v32 = vadd.f32 %v1763_v13, %v9632_v21  ;;  %v1877_v47 = vadd.f32 %v1876_v40, %v9632_v21 }
 0x3f1   : > { %v9976_v44 = vpack.c.bf16 %v1916_v38, %v1912_v34  ;;  %v9978_v59 = vpack.c.bf16 %v1918_v33, %v1914_v37  ;;  %v1766_v23 = vadd.f32 %v1765_v42, %v9632_v21  ;;  %v1879_v45 = vadd.f32 %v1878_v43, %v9632_v21 }
 0x3f2   : > { %v1919_v22 = vmax.f32 %v1764_v32, 0.0  ;;  %v1921_v50 = vmax.f32 %v1877_v47, 0.0 }
 0x3f3   : > { %v1769_v29 = vpop.f32.mrb[54].mxu0  ;;  %v1882_v51 = vpop.f32.mrb[54].mxu1  ;;  %8287 = vmatprep.subr.bf16.mxu0 %v9976_v44  ;;  %8303 = vmatprep.subr.bf16.mxu1 %v9978_v59  ;;  %v1920_v63 = vmax.f32 %v1766_v23, 0.0  ;;  %v1922_v7 = vmax.f32 %v1879_v45, 0.0 }
 0x3f4   : > { %v1770_v53 = vadd.f32 %v1769_v29, %v9630_v20  ;;  %v1883_v54 = vadd.f32 %v1882_v51, %v9630_v20  ;;  %v1771_v12 = vpop.f32.mrb[55].mxu0  ;;  %v1884_v39 = vpop.f32.mrb[55].mxu1  ;;  %8289 = vmatpush1.bf16.msra.mxu0 %v9972_v41  ;;  %8305 = vmatpush1.bf16.msra.mxu1 %v9974_v56 }
 0x3f5   : > { %v1772_v57 = vadd.f32 %v1771_v12, %v9630_v20  ;;  %v1885_v21 = vadd.f32 %v1884_v39, %v9630_v20 }
 0x3f6   : > { %v1923_v61 = vmax.f32 %v1770_v53, 0.0  ;;  %v1925_v55 = vmax.f32 %v1883_v54, 0.0 }
 0x3f7   : > { %v1924_v35 = vmax.f32 %v1772_v57, 0.0  ;;  %v1926_v2 = vmax.f32 %v1885_v21, 0.0  ;;  %v1775_v3 = vpop.f32.mrb[56].mxu0  ;;  %v1888_v4 = vpop.f32.mrb[56].mxu1 }
 0x3f8   : > { %v9992_v10 = vpack.c.bf16 %v1923_v61, %v1919_v22  ;;  %v9994_v14 = vpack.c.bf16 %v1925_v55, %v1921_v50  ;;  %v1777_v17 = vpop.f32.mrb[57].mxu0  ;;  %v1890_v15 = vpop.f32.mrb[57].mxu1  ;;  %v1776_v20 = vadd.f32 %v1775_v3, %v9656_v11  ;;  %v1889_v6 = vadd.f32 %v1888_v4, %v9656_v11 }
 0x3f9   : > { %v9996_v18 = vpack.c.bf16 %v1924_v35, %v1920_v63  ;;  %v9998_v49 = vpack.c.bf16 %v1926_v2, %v1922_v7  ;;  %v1778_v19 = vadd.f32 %v1777_v17, %v9656_v11  ;;  %v1891_v1 = vadd.f32 %v1890_v15, %v9656_v11 }
 0x3fa   : > { %v1927_v16 = vmax.f32 %v1776_v20, 0.0  ;;  %v1929_v31 = vmax.f32 %v1889_v6, 0.0 }
 0x3fb   : > { %v1781_v24 = vpop.f32.mrb[58].mxu0  ;;  %v1894_v25 = vpop.f32.mrb[58].mxu1  ;;  %8291 = vmatprep.subr.bf16.mxu0 %v9996_v18  ;;  %8307 = vmatprep.subr.bf16.mxu1 %v9998_v49  ;;  %v1928_v38 = vmax.f32 %v1778_v19, 0.0  ;;  %v1930_v33 = vmax.f32 %v1891_v1, 0.0 }
 0x3fc   : > { %v1782_v26 = vadd.f32 %v1781_v24, %v9654_v36  ;;  %v1895_v60 = vadd.f32 %v1894_v25, %v9654_v36  ;;  %v1783_v27 = vpop.f32.mrb[59].mxu0  ;;  %v1896_v46 = vpop.f32.mrb[59].mxu1  ;;  %8293 = vmatpush1.bf16.msra.mxu0 %v9992_v10  ;;  %8309 = vmatpush1.bf16.msra.mxu1 %v9994_v14 }
 0x3fd   : > { %v1784_v28 = vadd.f32 %v1783_v27, %v9654_v36  ;;  %v1897_v11 = vadd.f32 %v1896_v46, %v9654_v36 }
 0x3fe   : > { %v1931_v34 = vmax.f32 %v1782_v26, 0.0  ;;  %v1933_v37 = vmax.f32 %v1895_v60, 0.0 }
 0x3ff   : > { %v1932_v13 = vmax.f32 %v1784_v28, 0.0  ;;  %v1934_v40 = vmax.f32 %v1897_v11, 0.0  ;;  %v1787_v42 = vpop.f32.mrb[60].mxu0  ;;  %v1900_v43 = vpop.f32.mrb[60].mxu1 }
 0x400   : > { %v8296_v32 = vpack.c.bf16 %v1931_v34, %v1927_v16  ;;  %v8312_v47 = vpack.c.bf16 %v1933_v37, %v1929_v31  ;;  %v1789_v23 = vpop.f32.mrb[61].mxu0  ;;  %v1902_v45 = vpop.f32.mrb[61].mxu1  ;;  %v1788_v53 = vadd.f32 %v1787_v42, %v9680_v0  ;;  %v1901_v36 = vadd.f32 %v1900_v43, %v9680_v0 }
 0x401   : > { %v8294_v29 = vpack.c.bf16 %v1932_v13, %v1928_v38  ;;  %v8310_v51 = vpack.c.bf16 %v1934_v40, %v1930_v33  ;;  %v1790_v54 = vadd.f32 %v1789_v23, %v9680_v0  ;;  %v1903_v12 = vadd.f32 %v1902_v45, %v9680_v0 }
 0x402   : > { %v1935_v7 = vmax.f32 %v1788_v53, 0.0  ;;  %v1937_v35 = vmax.f32 %v1901_v36, 0.0 }
 0x403   : > { %v1793_v39 = vpop.f32.mrb[62].mxu0  ;;  %v1906_v57 = vpop.f32.mrb[62].mxu1  ;;  %8295 = vmatprep.subr.bf16.mxu0 %v8294_v29  ;;  %8311 = vmatprep.subr.bf16.mxu1 %v8310_v51  ;;  %v1936_v3 = vmax.f32 %v1790_v54, 0.0  ;;  %v1938_v4 = vmax.f32 %v1903_v12, 0.0 }
 0x404   : > { %v1794_v21 = vadd.f32 %v1793_v39, %v9678_v30  ;;  %v1907_v22 = vadd.f32 %v1906_v57, %v9678_v30  ;;  %v1795_v50 = vpop.f32.mrb[63].mxu0  ;;  %v1908_v61 = vpop.f32.mrb[63].mxu1  ;;  %8297 = vmatpush1.bf16.msra.mxu0 %v8296_v32  ;;  %8313 = vmatpush1.bf16.msra.mxu1 %v8312_v47  ;;  %v574_v57 = vld [vmem:[%s557_s21] sm:$0xff] }
 0x405   : > { %v1796_v55 = vadd.f32 %v1795_v50, %v9678_v30  ;;  %v1909_v63 = vadd.f32 %v1908_v61, %v9678_v30  ;;  %v1943_v30 = vld [vmem:[%s11038_s10] sm:$0xf] }
 0x406   : > { %v1939_v2 = vmax.f32 %v1794_v21, 0.0  ;;  %v1941_v0 = vmax.f32 %v1907_v22, 0.0  ;;  %v575_v22 = vld [vmem:[%s557_s21 + $0x8] sm:$0xff]  ;;  %s8189_s21 = sshll.u32 %s9116_s25, 6 }
 0x407   : > { %v1940_v17 = vmax.f32 %v1796_v55, 0.0  ;;  %v1942_v15 = vmax.f32 %v1909_v63, 0.0  ;;  %s10984_s26 = scalar_lea.hbm %s11044_s16, %s8189_s21 }
 0x408   : > { %v8300_v20 = vpack.c.bf16 %v1939_v2, %v1935_v7  ;;  %v8316_v6 = vpack.c.bf16 %v1941_v0, %v1937_v35  ;;  %v7764_v0 = vld [vmem:[%s11030_s2 + $0x40] sm:$0xff] }
 0x409   : > { %v8298_v19 = vpack.c.bf16 %v1940_v17, %v1936_v3  ;;  %v8314_v1 = vpack.c.bf16 %v1942_v15, %v1938_v4  ;;  %v7765_v3 = vld [vmem:[%s11030_s2 + $0x48] sm:$0xff]  ;;  %v7766_v4 = vld [vmem:[%s11030_s2 + $0x50] sm:$0xff]  ;;  %v7767_v17 = vld [vmem:[%s11030_s2 + $0x58] sm:$0xff] }
 0x40a   : > { %v7768_v15 = vld [vmem:[%s11030_s2 + $0x60] sm:$0xff] }
 0x40b   : > { %8299 = vmatprep.subr.bf16.mxu0 %v8298_v19  ;;  %8315 = vmatprep.subr.bf16.mxu1 %v8314_v1 }
 0x40c   : > { %8301 = vmatpush1.bf16.msra.mxu0 %v8300_v20  ;;  %8317 = vmatpush1.bf16.msra.mxu1 %v8316_v6 }
 0x40d   : > { %8319 = vmatprep.subr.bf16.mxu0 %v9976_v44  ;;  %8335 = vmatprep.subr.bf16.mxu1 %v9978_v59 }
 0x40f   : > { %7760 = vmatmul.mubr.msk.f32.vlgmr.msra.gmra.mrb[64].mxu0 %vm984_vm2, %v1943_v30  ;;  %7761 = vmatmul.mubr.msk.f32.vlgmr.msra.gmra.mrb[64].mxu1 %vm984_vm2, %v1943_v30 }
 0x410   : > { %8321 = vmatpush1.bf16.msra.mxu0 %v9972_v41  ;;  %8337 = vmatpush1.bf16.msra.mxu1 %v9974_v56  ;;  %v2103_v41 = vld [vmem:[%s11040_s12] sm:$0xf] }
 0x411   : > { %8323 = vmatprep.subr.bf16.mxu0 %v9996_v18  ;;  %8339 = vmatprep.subr.bf16.mxu1 %v9998_v49 }
 0x412   : > { %2177 = vmatprep.mubr.f32.mxu0 %v9007_v5  ;;  %2248 = vmatprep.mubr.f32.mxu1 %v9007_v5 }
 0x414   : > { %8325 = vmatpush1.bf16.msra.mxu0 %v9992_v10  ;;  %8341 = vmatpush1.bf16.msra.mxu1 %v9994_v14 }
 0x415   : > { %8327 = vmatprep.subr.bf16.mxu0 %v8294_v29  ;;  %8343 = vmatprep.subr.bf16.mxu1 %v8310_v51 }
 0x418   : > { %8329 = vmatpush1.bf16.msra.mxu0 %v8296_v32  ;;  %8345 = vmatpush1.bf16.msra.mxu1 %v8312_v47 }
 0x419   : > { %8331 = vmatprep.subr.bf16.mxu0 %v8298_v19  ;;  %8347 = vmatprep.subr.bf16.mxu1 %v8314_v1  ;;  %v7771_v19 = vld [vmem:[%s11030_s2 + $0x78] sm:$0xff] }
 0x41c   : > { %8333 = vmatpush1.bf16.msra.mxu0 %v8300_v20  ;;  %8349 = vmatpush1.bf16.msra.mxu1 %v8316_v6  ;;  %v7769_v20 = vld [vmem:[%s11030_s2 + $0x68] sm:$0xff]  ;;  %v7770_v6 = vld [vmem:[%s11030_s2 + $0x70] sm:$0xff] }
 0x41f   : > { %7762 = vmatmul.mubr.msk.f32.vlgmr.msra.gmra.mrb[66].mxu0 %vm984_vm2, %v2103_v41  ;;  %7763 = vmatmul.mubr.msk.f32.vlgmr.msra.gmra.mrb[66].mxu1 %vm984_vm2, %v2103_v41 }
 0x420   : > { %2445 = vmatprep.mubr.f32.mxu0 %v9007_v5  ;;  %2558 = vmatprep.mubr.f32.mxu1 %v9007_v5 }
 0x4e2   : > { %v2019_v56 = vpop.f32.mrb[64].mxu0  ;;  %v2090_v44 = vpop.f32.mrb[64].mxu1 }
 0x4e3   : > { %v2020_v59 = vadd.f32 %v2019_v56, %v9704_v52  ;;  %v2091_v10 = vadd.f32 %v2090_v44, %v9704_v52  ;;  %v2021_v14 = vpop.f32.mrb[65].mxu0  ;;  %v2092_v18 = vpop.f32.mrb[65].mxu1 }
 0x4e4   : > { %v2022_v49 = vadd.f32 %v2021_v14, %v9704_v52  ;;  %v2093_v24 = vadd.f32 %v2092_v18, %v9704_v52 }
 0x4e5   : > { %8876 = vtanh.f32 %v2020_v59 }
 0x4e6   : > { %8878 = vtanh.f32 %v2091_v10 }
 0x4e7   : > { %8880 = vtanh.f32 %v2022_v49 }
 0x4e8   : > { %8882 = vtanh.f32 %v2093_v24 }
 0x4ef   : > { %v8877_v25 = vpop.eup %8876 }
 0x4f0   : > { %v8879_v26 = vpop.eup %8878  ;;  %v10046_v60 = vmul.f32 3.0, %v8877_v25 }
 0x4f1   : > { %v8881_v27 = vpop.eup %8880  ;;  %v10048_v46 = vmul.f32 3.0, %v8879_v26 }
 0x4f2   : > { %v8883_v28 = vpop.eup %8882  ;;  %v2259_v11 = vmul.f32 1.442695, %v10046_v60  ;;  %v10051_v16 = vmul.f32 3.0, %v8881_v27  ;;  %v2179_v31 = vpop.f32.mrb[66].mxu0 }
 0x4f3   : > { %v2250_v34 = vpop.f32.mrb[66].mxu1  ;;  %v2263_v52 = vmul.f32 1.442695, %v10048_v46  ;;  %v10054_v37 = vmul.f32 3.0, %v8883_v28  ;;  %v2180_v38 = vadd.f32 %v2179_v31, %v9702_v48  ;;  %v2181_v13 = vpop.f32.mrb[67].mxu0 }
 0x4f4   : > { %v2251_v33 = vadd.f32 %v2250_v34, %v9702_v48  ;;  %v2252_v40 = vpop.f32.mrb[67].mxu1  ;;  %8884 = vpow2.f32 %v2259_v11  ;;  %v2261_v42 = vmul.f32 1.442695, %v10051_v16  ;;  %v2182_v43 = vadd.f32 %v2181_v13, %v9702_v48 }
 0x4f5   : > { %v2253_v32 = vadd.f32 %v2252_v40, %v9702_v48  ;;  %8886 = vpow2.f32 %v2263_v52  ;;  %v2265_v47 = vmul.f32 1.442695, %v10054_v37  ;;  %v2255_v23 = vmul.f32 3.0, %v2180_v38 }
 0x4f6   : > { %v2257_v45 = vmul.f32 3.0, %v2251_v33  ;;  %8888 = vpow2.f32 %v2261_v42  ;;  %v2256_v29 = vmul.f32 3.0, %v2182_v43 }
 0x4f7   : > { %v2258_v51 = vmul.f32 3.0, %v2253_v32  ;;  %8890 = vpow2.f32 %v2265_v47 }
 0x4f8   : > { %v2281_v53 = vcombine.low %v2255_v23, %v2256_v29 }
 0x4f9   : > { %v2282_v36 = vcombine.low %v2257_v45, %v2258_v51 }
 0x4fe   : > { %v8885_v54 = vpop.eup %8884 }
 0x4ff   : > { %v8887_v12 = vpop.eup %8886 }
 0x500   : > { %v8889_v39 = vpop.eup %8888 }
 0x501   : > { %v8891_v48 = vpop.eup %8890  ;;  %v2271_v21 = vcombine.low %v8885_v54, %v8889_v39 }
 0x502   : > { %v2272_v50 = vcombine.low %v8887_v12, %v8891_v48 }
 0x503   : > { %v2275_v61 = vmul.f32 %v2271_v21, %v574_v57 }
 0x504   : > { %v2276_v55 = vmul.f32 %v2272_v50, %v575_v22 }
 0x505   : > { %v10066_v63 = vadd.f32 %v2281_v53, %v2275_v61 }
 0x506   : > { %v10068_v7 = vadd.f32 %v2282_v36, %v2276_v55 }
 0x507   : > { %v2347_v35 = vcombine.high %v10066_v63, %v10066_v63 }
 0x508   : > { %v2348_v2 = vcombine.high %v10068_v7, %v10068_v7 }
 0x509   : > { %7780 = vmatprep.subr.msk.mxu0 %vm661_vm0, %v2347_v35 }
 0x50a   : > { %7790 = vmatprep.subr.msk.mxu1 %vm661_vm0, %v2348_v2  ;;  %7781 = vmatpush1.msk.msra.mxu0 %vm661_vm0, %v10066_v63 }
 0x50b   : > { %7791 = vmatpush1.msk.msra.mxu1 %vm661_vm0, %v10068_v7  ;;  %7782 = vmatmul.mubr.msk.f32.vlgmr.msra.gmra.mrb[68].mxu0 %vm636_vm1, %v7764_v0 }
 0x50c   : > { %7792 = vmatmul.mubr.msk.f32.vlgmr.msra.gmra.mrb[68].mxu1 %vm636_vm1, %v7764_v0  ;;  %2451 = vmatprep.mubr.f32.mxu0 %v9007_v5 }
 0x50d   : > { %2564 = vmatprep.mubr.f32.mxu1 %v9007_v5 }
 0x50f   : > { %7783 = vmatmul.mubr.msk.f32.gmra.mrb[70].mxu0 %vm636_vm1, %v7765_v3 }
 0x510   : > { %7793 = vmatmul.mubr.msk.f32.gmra.mrb[70].mxu1 %vm636_vm1, %v7765_v3  ;;  %2457 = vmatprep.mubr.f32.mxu0 %v9007_v5 }
 0x511   : > { %2570 = vmatprep.mubr.f32.mxu1 %v9007_v5 }
 0x513   : > { %7784 = vmatmul.mubr.msk.f32.gmra.mrb[72].mxu0 %vm636_vm1, %v7766_v4 }
 0x514   : > { %7794 = vmatmul.mubr.msk.f32.gmra.mrb[72].mxu1 %vm636_vm1, %v7766_v4  ;;  %2463 = vmatprep.mubr.f32.mxu0 %v9007_v5 }
 0x515   : > { %2576 = vmatprep.mubr.f32.mxu1 %v9007_v5 }
 0x517   : > { %7785 = vmatmul.mubr.msk.f32.gmra.mrb[74].mxu0 %vm636_vm1, %v7767_v17 }
 0x518   : > { %7795 = vmatmul.mubr.msk.f32.gmra.mrb[74].mxu1 %vm636_vm1, %v7767_v17  ;;  %2469 = vmatprep.mubr.f32.mxu0 %v9007_v5 }
 0x519   : > { %2582 = vmatprep.mubr.f32.mxu1 %v9007_v5 }
 0x51b   : > { %7786 = vmatmul.mubr.msk.f32.gmra.mrb[76].mxu0 %vm636_vm1, %v7768_v15 }
 0x51c   : > { %7796 = vmatmul.mubr.msk.f32.gmra.mrb[76].mxu1 %vm636_vm1, %v7768_v15  ;;  %2475 = vmatprep.mubr.f32.mxu0 %v9007_v5 }
 0x51d   : > { %2588 = vmatprep.mubr.f32.mxu1 %v9007_v5 }
 0x51f   : > { %7787 = vmatmul.mubr.msk.f32.gmra.mrb[78].mxu0 %vm636_vm1, %v7769_v20 }
 0x520   : > { %7797 = vmatmul.mubr.msk.f32.gmra.mrb[78].mxu1 %vm636_vm1, %v7769_v20  ;;  %2481 = vmatprep.mubr.f32.mxu0 %v9007_v5 }
 0x521   : > { %2594 = vmatprep.mubr.f32.mxu1 %v9007_v5 }
 0x523   : > { %7788 = vmatmul.mubr.msk.f32.gmra.mrb[80].mxu0 %vm636_vm1, %v7770_v6 }
 0x524   : > { %7798 = vmatmul.mubr.msk.f32.gmra.mrb[80].mxu1 %vm636_vm1, %v7770_v6  ;;  %2487 = vmatprep.mubr.f32.mxu0 %v9007_v5 }
 0x525   : > { %2600 = vmatprep.mubr.f32.mxu1 %v9007_v5 }
 0x527   : > { %7789 = vmatmul.mubr.msk.f32.gmra.mrb[82].mxu0 %vm636_vm1, %v7771_v19 }
 0x528   : > { %7799 = vmatmul.mubr.msk.f32.gmra.mrb[82].mxu1 %vm636_vm1, %v7771_v19  ;;  %2785 = vmatprep.mubr.f32.mxu0 %v9007_v5 }
 0x529   : > { %2898 = vmatprep.mubr.f32.mxu1 %v9007_v5 }
 0x5de   : > { %v2447_v1 = vpop.f32.mrb[68].mxu0 }
 0x5df   : > { %v2560_v30 = vpop.f32.mrb[68].mxu1  ;;  %v2449_v41 = vpop.f32.mrb[69].mxu0  ;;  %v2448_v44 = vadd.f32 %v2447_v1, %v9725_v62 }
 0x5e0   : > { %v2562_v56 = vpop.f32.mrb[69].mxu1  ;;  %v2561_v59 = vadd.f32 %v2560_v30, %v9725_v62  ;;  %v2450_v10 = vadd.f32 %v2449_v41, %v9725_v62  ;;  %v2328_v1 = vpop.permute.xlu0 %2327 }
 0x5e1   : > { %v2563_v18 = vadd.f32 %v2562_v56, %v9725_v62  ;;  %v2607_v11 = vmax.f32 %v2448_v44, 0.0 }
 0x5e2   : > { %v2453_v14 = vpop.f32.mrb[70].mxu0  ;;  %v2609_v52 = vmax.f32 %v2561_v59, 0.0  ;;  %v2608_v38 = vmax.f32 %v2450_v10, 0.0  ;;  %v2333_v10 = vpop.permute.xlu1 %2332 }
 0x5e3   : > { %v2454_v49 = vadd.f32 %v2453_v14, %v9718_v58  ;;  %v2566_v24 = vpop.f32.mrb[70].mxu1  ;;  %v2455_v25 = vpop.f32.mrb[71].mxu0  ;;  %v2610_v42 = vmax.f32 %v2563_v18, 0.0 }
 0x5e4   : > { %v2567_v26 = vadd.f32 %v2566_v24, %v9718_v58  ;;  %v2456_v27 = vadd.f32 %v2455_v25, %v9718_v58  ;;  %v2568_v28 = vpop.f32.mrb[71].mxu1 }
 0x5e5   : > { %v2611_v31 = vmax.f32 %v2454_v49, 0.0  ;;  %v2569_v34 = vadd.f32 %v2568_v28, %v9718_v58 }
 0x5e6   : > { %v2613_v33 = vmax.f32 %v2567_v26, 0.0  ;;  %v2612_v13 = vmax.f32 %v2456_v27, 0.0  ;;  %v2459_v40 = vpop.f32.mrb[72].mxu0 }
 0x5e7   : > { %v8352_v62 = vpack.c.bf16 %v2611_v31, %v2607_v11  ;;  %v2614_v43 = vmax.f32 %v2569_v34, 0.0  ;;  %v2572_v32 = vpop.f32.mrb[72].mxu1  ;;  %v2461_v47 = vpop.f32.mrb[73].mxu0  ;;  %v2460_v53 = vadd.f32 %v2459_v40, %v9747_v9 }
 0x5e8   : > { %v8368_v23 = vpack.c.bf16 %v2613_v33, %v2609_v52  ;;  %v8350_v45 = vpack.c.bf16 %v2612_v13, %v2608_v38  ;;  %v2574_v29 = vpop.f32.mrb[73].mxu1  ;;  %v2573_v36 = vadd.f32 %v2572_v32, %v9747_v9  ;;  %v2462_v58 = vadd.f32 %v2461_v47, %v9747_v9 }
 0x5e9   : > { %v8366_v51 = vpack.c.bf16 %v2614_v43, %v2610_v42  ;;  %v2575_v12 = vadd.f32 %v2574_v29, %v9747_v9  ;;  %v2615_v61 = vmax.f32 %v2460_v53, 0.0 }
 0x5ea   : > { %v2465_v54 = vpop.f32.mrb[74].mxu0  ;;  %8351 = vmatprep.subr.bf16.mxu0 %v8350_v45  ;;  %v2617_v2 = vmax.f32 %v2573_v36, 0.0  ;;  %v2616_v0 = vmax.f32 %v2462_v58, 0.0  ;;  %v2338_v45 = vpop.permute.xlu0 %2337 }
 0x5eb   : > { %v2466_v39 = vadd.f32 %v2465_v54, %v9745_v8  ;;  %v2578_v57 = vpop.f32.mrb[74].mxu1  ;;  %8367 = vmatprep.subr.bf16.mxu1 %v8366_v51  ;;  %v2467_v48 = vpop.f32.mrb[75].mxu0  ;;  %8353 = vmatpush1.bf16.msra.mxu0 %v8352_v62  ;;  %v2618_v17 = vmax.f32 %v2575_v12, 0.0 }
 0x5ec   : > { %v2579_v21 = vadd.f32 %v2578_v57, %v9745_v8  ;;  %v2468_v22 = vadd.f32 %v2467_v48, %v9745_v8  ;;  %v2580_v50 = vpop.f32.mrb[75].mxu1  ;;  %8369 = vmatpush1.bf16.msra.mxu1 %v8368_v23  ;;  %v2343_v54 = vpop.permute.xlu1 %2342 }
 0x5ed   : > { %v2619_v55 = vmax.f32 %v2466_v39, 0.0  ;;  %v2581_v35 = vadd.f32 %v2580_v50, %v9745_v8 }
 0x5ee   : > { %v2621_v3 = vmax.f32 %v2579_v21, 0.0  ;;  %v2620_v9 = vmax.f32 %v2468_v22, 0.0  ;;  %v2471_v4 = vpop.f32.mrb[76].mxu0 }
 0x5ef   : > { %v8356_v15 = vpack.c.bf16 %v2619_v55, %v2615_v61  ;;  %v2622_v20 = vmax.f32 %v2581_v35, 0.0  ;;  %v2584_v6 = vpop.f32.mrb[76].mxu1  ;;  %v2473_v19 = vpop.f32.mrb[77].mxu0  ;;  %v2472_v59 = vadd.f32 %v2471_v4, %v2328_v1 }
 0x5f0   : > { %v8372_v30 = vpack.c.bf16 %v2621_v3, %v2617_v2  ;;  %v8354_v41 = vpack.c.bf16 %v2620_v9, %v2616_v0  ;;  %v2586_v56 = vpop.f32.mrb[77].mxu1  ;;  %v2585_v14 = vadd.f32 %v2584_v6, %v2328_v1  ;;  %v2474_v18 = vadd.f32 %v2473_v19, %v2328_v1 }
 0x5f1   : > { %v8370_v44 = vpack.c.bf16 %v2622_v20, %v2618_v17  ;;  %v2587_v49 = vadd.f32 %v2586_v56, %v2328_v1  ;;  %v2623_v31 = vmax.f32 %v2472_v59, 0.0  ;;  %v7800_v56 = vld [vmem:[%s11032_s4 + $0x40] sm:$0xff]  ;;  %v7802_v59 = vld [vmem:[%s11032_s4 + $0x50] sm:$0xff] }
 0x5f2   : > { %v2477_v8 = vpop.f32.mrb[78].mxu0  ;;  %8355 = vmatprep.subr.bf16.mxu0 %v8354_v41  ;;  %v2625_v38 = vmax.f32 %v2585_v14, 0.0  ;;  %v2624_v33 = vmax.f32 %v2474_v18, 0.0  ;;  %v7804_v14 = vld [vmem:[%s11032_s4 + $0x60] sm:$0xff]  ;;  %v7805_v18 = vld [vmem:[%s11032_s4 + $0x68] sm:$0xff] }
 0x5f3   : > { %v2478_v24 = vadd.f32 %v2477_v8, %v2333_v10  ;;  %v2590_v25 = vpop.f32.mrb[78].mxu1  ;;  %8371 = vmatprep.subr.bf16.mxu1 %v8370_v44  ;;  %v2479_v26 = vpop.f32.mrb[79].mxu0  ;;  %8357 = vmatpush1.bf16.msra.mxu0 %v8356_v15  ;;  %v2626_v62 = vmax.f32 %v2587_v49, 0.0  ;;  %v7801_v44 = vld [vmem:[%s11032_s4 + $0x48] sm:$0xff]  ;;  %v7806_v8 = vld [vmem:[%s11032_s4 + $0x70] sm:$0xff]  ;;  %v7807_v49 = vld [vmem:[%s11032_s4 + $0x78] sm:$0xff] }
 0x5f4   : > { %v2591_v27 = vadd.f32 %v2590_v25, %v2333_v10  ;;  %v2480_v28 = vadd.f32 %v2479_v26, %v2333_v10  ;;  %v2592_v11 = vpop.f32.mrb[79].mxu1  ;;  %8373 = vmatpush1.bf16.msra.mxu1 %v8372_v30 }
 0x5f5   : > { %v2627_v34 = vmax.f32 %v2478_v24, 0.0  ;;  %v2593_v52 = vadd.f32 %v2592_v11, %v2333_v10  ;;  %v7803_v10 = vld [vmem:[%s11032_s4 + $0x58] sm:$0xff] }
 0x5f6   : > { %v2629_v13 = vmax.f32 %v2591_v27, 0.0  ;;  %v2628_v40 = vmax.f32 %v2480_v28, 0.0  ;;  %v2483_v42 = vpop.f32.mrb[80].mxu0  ;;  %v2660_v27 = vpop.permute.xlu0 %2659 }
 0x5f7   : > { %v8360_v43 = vpack.c.bf16 %v2627_v34, %v2623_v31  ;;  %v2630_v32 = vmax.f32 %v2593_v52, 0.0  ;;  %v2596_v47 = vpop.f32.mrb[80].mxu1  ;;  %v2485_v23 = vpop.f32.mrb[81].mxu0  ;;  %v2484_v58 = vadd.f32 %v2483_v42, %v2338_v45 }
 0x5f8   : > { %v8376_v29 = vpack.c.bf16 %v2629_v13, %v2625_v38  ;;  %v8358_v51 = vpack.c.bf16 %v2628_v40, %v2624_v33  ;;  %v2598_v53 = vpop.f32.mrb[81].mxu1  ;;  %v2597_v12 = vadd.f32 %v2596_v47, %v2338_v45  ;;  %v2486_v39 = vadd.f32 %v2485_v23, %v2338_v45  ;;  %v2665_v31 = vpop.permute.xlu1 %2664 }
 0x5f9   : > { %v8374_v36 = vpack.c.bf16 %v2630_v32, %v2626_v62  ;;  %v2599_v48 = vadd.f32 %v2598_v53, %v2338_v45  ;;  %v2631_v2 = vmax.f32 %v2484_v58, 0.0 }
 0x5fa   : > { %v2489_v57 = vpop.f32.mrb[82].mxu0  ;;  %8359 = vmatprep.subr.bf16.mxu0 %v8358_v51  ;;  %v2633_v9 = vmax.f32 %v2597_v12, 0.0  ;;  %v2632_v4 = vmax.f32 %v2486_v39, 0.0 }
 0x5fb   : > { %v2490_v21 = vadd.f32 %v2489_v57, %v2343_v54  ;;  %v2602_v22 = vpop.f32.mrb[82].mxu1  ;;  %8375 = vmatprep.subr.bf16.mxu1 %v8374_v36  ;;  %v2491_v50 = vpop.f32.mrb[83].mxu0  ;;  %8361 = vmatpush1.bf16.msra.mxu0 %v8360_v43  ;;  %v2634_v20 = vmax.f32 %v2599_v48, 0.0 }
 0x5fc   : > { %v2603_v61 = vadd.f32 %v2602_v22, %v2343_v54  ;;  %v2492_v55 = vadd.f32 %v2491_v50, %v2343_v54  ;;  %v2604_v35 = vpop.f32.mrb[83].mxu1  ;;  %8377 = vmatpush1.bf16.msra.mxu1 %v8376_v29 }
 0x5fd   : > { %v2635_v0 = vmax.f32 %v2490_v21, 0.0  ;;  %v2605_v3 = vadd.f32 %v2604_v35, %v2343_v54  ;;  %v2670_v21 = vpop.permute.xlu0 %2669 }
 0x5fe   : > { %v2637_v17 = vmax.f32 %v2603_v61, 0.0  ;;  %v2636_v15 = vmax.f32 %v2492_v55, 0.0 }
 0x5ff   : > { %v8364_v6 = vpack.c.bf16 %v2635_v0, %v2631_v2  ;;  %v2638_v19 = vmax.f32 %v2605_v3, 0.0  ;;  %v2675_v2 = vpop.permute.xlu1 %2674 }
 0x600   : > { %v8380_v1 = vpack.c.bf16 %v2637_v17, %v2633_v9  ;;  %v8362_v30 = vpack.c.bf16 %v2636_v15, %v2632_v4 }
 0x601   : > { %v8378_v41 = vpack.c.bf16 %v2638_v19, %v2634_v20 }
 0x602   : > { %8363 = vmatprep.subr.bf16.mxu0 %v8362_v30 }
 0x603   : > { %8379 = vmatprep.subr.bf16.mxu1 %v8378_v41  ;;  %8365 = vmatpush1.bf16.msra.mxu0 %v8364_v6 }
 0x604   : > { %8381 = vmatpush1.bf16.msra.mxu1 %v8380_v1 }
 0x606   : > { %7816 = vmatmul.mubr.msk.f32.vlgmr.msra.gmra.mrb[84].mxu0 %vm984_vm2, %v7800_v56 }
 0x607   : > { %7824 = vmatmul.mubr.msk.f32.vlgmr.msra.gmra.mrb[84].mxu1 %vm984_vm2, %v7800_v56  ;;  %2791 = vmatprep.mubr.f32.mxu0 %v9007_v5 }
 0x608   : > { %2904 = vmatprep.mubr.f32.mxu1 %v9007_v5 }
 0x60a   : > { %7817 = vmatmul.mubr.msk.f32.gmra.mrb[86].mxu0 %vm984_vm2, %v7801_v44 }
 0x60b   : > { %7825 = vmatmul.mubr.msk.f32.gmra.mrb[86].mxu1 %vm984_vm2, %v7801_v44  ;;  %2797 = vmatprep.mubr.f32.mxu0 %v9007_v5 }
 0x60c   : > { %2910 = vmatprep.mubr.f32.mxu1 %v9007_v5 }
 0x60e   : > { %7818 = vmatmul.mubr.msk.f32.gmra.mrb[88].mxu0 %vm984_vm2, %v7802_v59 }
 0x60f   : > { %7826 = vmatmul.mubr.msk.f32.gmra.mrb[88].mxu1 %vm984_vm2, %v7802_v59  ;;  %2803 = vmatprep.mubr.f32.mxu0 %v9007_v5 }
 0x610   : > { %2916 = vmatprep.mubr.f32.mxu1 %v9007_v5 }
 0x612   : > { %7819 = vmatmul.mubr.msk.f32.gmra.mrb[90].mxu0 %vm984_vm2, %v7803_v10 }
 0x613   : > { %7827 = vmatmul.mubr.msk.f32.gmra.mrb[90].mxu1 %vm984_vm2, %v7803_v10  ;;  %2809 = vmatprep.mubr.f32.mxu0 %v9007_v5 }
 0x614   : > { %2922 = vmatprep.mubr.f32.mxu1 %v9007_v5 }
 0x616   : > { %7820 = vmatmul.mubr.msk.f32.gmra.mrb[92].mxu0 %vm984_vm2, %v7804_v14 }
 0x617   : > { %7828 = vmatmul.mubr.msk.f32.gmra.mrb[92].mxu1 %vm984_vm2, %v7804_v14  ;;  %2815 = vmatprep.mubr.f32.mxu0 %v9007_v5 }
 0x618   : > { %2928 = vmatprep.mubr.f32.mxu1 %v9007_v5 }
 0x61a   : > { %7821 = vmatmul.mubr.msk.f32.gmra.mrb[94].mxu0 %vm984_vm2, %v7805_v18 }
 0x61b   : > { %7829 = vmatmul.mubr.msk.f32.gmra.mrb[94].mxu1 %vm984_vm2, %v7805_v18  ;;  %2821 = vmatprep.mubr.f32.mxu0 %v9007_v5 }
 0x61c   : > { %2934 = vmatprep.mubr.f32.mxu1 %v9007_v5 }
 0x61e   : > { %7822 = vmatmul.mubr.msk.f32.gmra.mrb[96].mxu0 %vm984_vm2, %v7806_v8 }
 0x61f   : > { %7830 = vmatmul.mubr.msk.f32.gmra.mrb[96].mxu1 %vm984_vm2, %v7806_v8  ;;  %2827 = vmatprep.mubr.f32.mxu0 %v9007_v5 }
 0x620   : > { %2940 = vmatprep.mubr.f32.mxu1 %v9007_v5 }
 0x622   : > { %7823 = vmatmul.mubr.msk.f32.gmra.mrb[98].mxu0 %vm984_vm2, %v7807_v49 }
 0x623   : > { %7831 = vmatmul.mubr.msk.f32.gmra.mrb[98].mxu1 %vm984_vm2, %v7807_v49  ;;  %3125 = vmatprep.mubr.f32.mxu0 %v9007_v5 }
 0x624   : > { %3238 = vmatprep.mubr.f32.mxu1 %v9007_v5 }
 0x6d9   : > { %v2787_v24 = vpop.f32.mrb[84].mxu0 }
 0x6da   : > { %v2900_v25 = vpop.f32.mrb[84].mxu1  ;;  %v2789_v26 = vpop.f32.mrb[85].mxu0  ;;  %v2788_v11 = vadd.f32 %v2787_v24, %v2660_v27 }
 0x6db   : > { %v2902_v28 = vpop.f32.mrb[85].mxu1  ;;  %v2901_v34 = vadd.f32 %v2900_v25, %v2660_v27  ;;  %v2790_v52 = vadd.f32 %v2789_v26, %v2660_v27 }
 0x6dc   : > { %v2903_v33 = vadd.f32 %v2902_v28, %v2660_v27  ;;  %v2947_v47 = vmax.f32 %v2788_v11, 0.0  ;;  %v2680_v27 = vpop.permute.xlu0 %2679 }
 0x6dd   : > { %v2793_v38 = vpop.f32.mrb[86].mxu0  ;;  %v2949_v29 = vmax.f32 %v2901_v34, 0.0  ;;  %v2948_v51 = vmax.f32 %v2790_v52, 0.0 }
 0x6de   : > { %v2794_v13 = vadd.f32 %v2793_v38, %v2665_v31  ;;  %v2906_v40 = vpop.f32.mrb[86].mxu1  ;;  %v2795_v42 = vpop.f32.mrb[87].mxu0  ;;  %v2950_v54 = vmax.f32 %v2903_v33, 0.0 }
 0x6df   : > { %v2907_v62 = vadd.f32 %v2906_v40, %v2665_v31  ;;  %v2796_v43 = vadd.f32 %v2795_v42, %v2665_v31  ;;  %v2908_v32 = vpop.f32.mrb[87].mxu1  ;;  %v2685_v38 = vpop.permute.xlu1 %2684 }
 0x6e0   : > { %v2951_v23 = vmax.f32 %v2794_v13, 0.0  ;;  %v2909_v45 = vadd.f32 %v2908_v32, %v2665_v31 }
 0x6e1   : > { %v2953_v53 = vmax.f32 %v2907_v62, 0.0  ;;  %v2952_v36 = vmax.f32 %v2796_v43, 0.0  ;;  %v2799_v58 = vpop.f32.mrb[88].mxu0 }
 0x6e2   : > { %v8384_v12 = vpack.c.bf16 %v2951_v23, %v2947_v47  ;;  %v2954_v39 = vmax.f32 %v2909_v45, 0.0  ;;  %v2912_v57 = vpop.f32.mrb[88].mxu1  ;;  %v2801_v48 = vpop.f32.mrb[89].mxu0  ;;  %v2800_v35 = vadd.f32 %v2799_v58, %v2670_v21 }
 0x6e3   : > { %v8400_v22 = vpack.c.bf16 %v2953_v53, %v2949_v29  ;;  %v8382_v50 = vpack.c.bf16 %v2952_v36, %v2948_v51  ;;  %v2914_v61 = vpop.f32.mrb[89].mxu1  ;;  %v2913_v0 = vadd.f32 %v2912_v57, %v2670_v21  ;;  %v2802_v3 = vadd.f32 %v2801_v48, %v2670_v21 }
 0x6e4   : > { %v8398_v55 = vpack.c.bf16 %v2954_v39, %v2950_v54  ;;  %v2915_v4 = vadd.f32 %v2914_v61, %v2670_v21  ;;  %v2955_v30 = vmax.f32 %v2800_v35, 0.0  ;;  %v2690_v61 = vpop.permute.xlu0 %2689 }
 0x6e5   : > { %v2805_v9 = vpop.f32.mrb[90].mxu0  ;;  %8383 = vmatprep.subr.bf16.mxu0 %v8382_v50  ;;  %v2957_v44 = vmax.f32 %v2913_v0, 0.0  ;;  %v2956_v59 = vmax.f32 %v2802_v3, 0.0 }
 0x6e6   : > { %v2806_v17 = vadd.f32 %v2805_v9, %v2675_v2  ;;  %v2918_v15 = vpop.f32.mrb[90].mxu1  ;;  %8399 = vmatprep.subr.bf16.mxu1 %v8398_v55  ;;  %v2807_v20 = vpop.f32.mrb[91].mxu0  ;;  %8385 = vmatpush1.bf16.msra.mxu0 %v8384_v12  ;;  %v2958_v8 = vmax.f32 %v2915_v4, 0.0 }
 0x6e7   : > { %v2919_v6 = vadd.f32 %v2918_v15, %v2675_v2  ;;  %v2808_v19 = vadd.f32 %v2807_v20, %v2675_v2  ;;  %v2920_v1 = vpop.f32.mrb[91].mxu1  ;;  %8401 = vmatpush1.bf16.msra.mxu1 %v8400_v22  ;;  %v2695_v9 = vpop.permute.xlu1 %2694 }
 0x6e8   : > { %v2959_v41 = vmax.f32 %v2806_v17, 0.0  ;;  %v2921_v56 = vadd.f32 %v2920_v1, %v2675_v2 }
 0x6e9   : > { %v2961_v10 = vmax.f32 %v2919_v6, 0.0  ;;  %v2960_v14 = vmax.f32 %v2808_v19, 0.0  ;;  %v2811_v18 = vpop.f32.mrb[92].mxu0 }
 0x6ea   : > { %v8388_v49 = vpack.c.bf16 %v2959_v41, %v2955_v30  ;;  %v2962_v24 = vmax.f32 %v2921_v56, 0.0  ;;  %v2924_v25 = vpop.f32.mrb[92].mxu1  ;;  %v2813_v26 = vpop.f32.mrb[93].mxu0  ;;  %v2812_v52 = vadd.f32 %v2811_v18, %v2680_v27 }
 0x6eb   : > { %v8404_v28 = vpack.c.bf16 %v2961_v10, %v2957_v44  ;;  %v8386_v11 = vpack.c.bf16 %v2960_v14, %v2956_v59  ;;  %v2926_v31 = vpop.f32.mrb[93].mxu1  ;;  %v2925_v33 = vadd.f32 %v2924_v25, %v2680_v27  ;;  %v2814_v13 = vadd.f32 %v2813_v26, %v2680_v27 }
 0x6ec   : > { %v8402_v34 = vpack.c.bf16 %v2962_v24, %v2958_v8  ;;  %v2927_v42 = vadd.f32 %v2926_v31, %v2680_v27  ;;  %v2963_v29 = vmax.f32 %v2812_v52, 0.0  ;;  %v7832_v31 = vld [vmem:[%s11034_s6 + $0x40] sm:$0xff]  ;;  %v7834_v52 = vld [vmem:[%s11034_s6 + $0x50] sm:$0xff] }
 0x6ed   : > { %v2817_v40 = vpop.f32.mrb[94].mxu0  ;;  %8387 = vmatprep.subr.bf16.mxu0 %v8386_v11  ;;  %v2965_v36 = vmax.f32 %v2925_v33, 0.0  ;;  %v2964_v58 = vmax.f32 %v2814_v13, 0.0  ;;  %v7836_v33 = vld [vmem:[%s11034_s6 + $0x60] sm:$0xff]  ;;  %v7837_v13 = vld [vmem:[%s11034_s6 + $0x68] sm:$0xff] }
 0x6ee   : > { %v2818_v62 = vadd.f32 %v2817_v40, %v2685_v38  ;;  %v2930_v43 = vpop.f32.mrb[94].mxu1  ;;  %8403 = vmatprep.subr.bf16.mxu1 %v8402_v34  ;;  %v2819_v32 = vpop.f32.mrb[95].mxu0  ;;  %8389 = vmatpush1.bf16.msra.mxu0 %v8388_v49  ;;  %v2966_v57 = vmax.f32 %v2927_v42, 0.0  ;;  %v7833_v34 = vld [vmem:[%s11034_s6 + $0x48] sm:$0xff]  ;;  %v7838_v40 = vld [vmem:[%s11034_s6 + $0x70] sm:$0xff]  ;;  %v7839_v42 = vld [vmem:[%s11034_s6 + $0x78] sm:$0xff] }
 0x6ef   : > { %v2931_v47 = vadd.f32 %v2930_v43, %v2685_v38  ;;  %v2820_v23 = vadd.f32 %v2819_v32, %v2685_v38  ;;  %v2932_v45 = vpop.f32.mrb[95].mxu1  ;;  %8405 = vmatpush1.bf16.msra.mxu1 %v8404_v28 }
 0x6f0   : > { %v2967_v51 = vmax.f32 %v2818_v62, 0.0  ;;  %v2933_v53 = vadd.f32 %v2932_v45, %v2685_v38  ;;  %v7835_v38 = vld [vmem:[%s11034_s6 + $0x58] sm:$0xff] }
 0x6f1   : > { %v2969_v54 = vmax.f32 %v2931_v47, 0.0  ;;  %v2968_v12 = vmax.f32 %v2820_v23, 0.0  ;;  %v2823_v39 = vpop.f32.mrb[96].mxu0  ;;  %v3000_v47 = vpop.permute.xlu0 %2999 }
 0x6f2   : > { %v8392_v48 = vpack.c.bf16 %v2967_v51, %v2963_v29  ;;  %v2970_v21 = vmax.f32 %v2933_v53, 0.0  ;;  %v2936_v22 = vpop.f32.mrb[96].mxu1  ;;  %v2825_v50 = vpop.f32.mrb[97].mxu0  ;;  %v2824_v3 = vadd.f32 %v2823_v39, %v2690_v61 }
 0x6f3   : > { %v8408_v55 = vpack.c.bf16 %v2969_v54, %v2965_v36  ;;  %v8390_v35 = vpack.c.bf16 %v2968_v12, %v2964_v58  ;;  %v2938_v2 = vpop.f32.mrb[97].mxu1  ;;  %v2937_v4 = vadd.f32 %v2936_v22, %v2690_v61  ;;  %v2826_v17 = vadd.f32 %v2825_v50, %v2690_v61  ;;  %v3005_v29 = vpop.permute.xlu1 %3004 }
 0x6f4   : > { %v8406_v0 = vpack.c.bf16 %v2970_v21, %v2966_v57  ;;  %v2939_v20 = vadd.f32 %v2938_v2, %v2690_v61  ;;  %v2971_v44 = vmax.f32 %v2824_v3, 0.0 }
 0x6f5   : > { %v2829_v15 = vpop.f32.mrb[98].mxu0  ;;  %8391 = vmatprep.subr.bf16.mxu0 %v8390_v35  ;;  %v2973_v14 = vmax.f32 %v2937_v4, 0.0  ;;  %v2972_v18 = vmax.f32 %v2826_v17, 0.0 }
 0x6f6   : > { %v2830_v6 = vadd.f32 %v2829_v15, %v2695_v9  ;;  %v2942_v19 = vpop.f32.mrb[98].mxu1  ;;  %8407 = vmatprep.subr.bf16.mxu1 %v8406_v0  ;;  %v2831_v1 = vpop.f32.mrb[99].mxu0  ;;  %8393 = vmatpush1.bf16.msra.mxu0 %v8392_v48  ;;  %v2974_v24 = vmax.f32 %v2939_v20, 0.0 }
 0x6f7   : > { %v2943_v30 = vadd.f32 %v2942_v19, %v2695_v9  ;;  %v2832_v41 = vadd.f32 %v2831_v1, %v2695_v9  ;;  %v2944_v56 = vpop.f32.mrb[99].mxu1  ;;  %8409 = vmatpush1.bf16.msra.mxu1 %v8408_v55 }
 0x6f8   : > { %v2975_v59 = vmax.f32 %v2830_v6, 0.0  ;;  %v2945_v10 = vadd.f32 %v2944_v56, %v2695_v9  ;;  %v3010_v6 = vpop.permute.xlu0 %3009 }
 0x6f9   : > { %v2977_v8 = vmax.f32 %v2943_v30, 0.0  ;;  %v2976_v49 = vmax.f32 %v2832_v41, 0.0 }
 0x6fa   : > { %v8396_v25 = vpack.c.bf16 %v2975_v59, %v2971_v44  ;;  %v2978_v26 = vmax.f32 %v2945_v10, 0.0  ;;  %v3015_v44 = vpop.permute.xlu1 %3014 }
 0x6fb   : > { %v8412_v27 = vpack.c.bf16 %v2977_v8, %v2973_v14  ;;  %v8394_v28 = vpack.c.bf16 %v2976_v49, %v2972_v18 }
 0x6fc   : > { %v8410_v11 = vpack.c.bf16 %v2978_v26, %v2974_v24 }
 0x6fd   : > { %8395 = vmatprep.subr.bf16.mxu0 %v8394_v28 }
 0x6fe   : > { %8411 = vmatprep.subr.bf16.mxu1 %v8410_v11  ;;  %8397 = vmatpush1.bf16.msra.mxu0 %v8396_v25 }
 0x6ff   : > { %8413 = vmatpush1.bf16.msra.mxu1 %v8412_v27 }
 0x701   : > { %7848 = vmatmul.mubr.msk.f32.vlgmr.msra.gmra.mrb[100].mxu0 %vm984_vm2, %v7832_v31 }
 0x702   : > { %7856 = vmatmul.mubr.msk.f32.vlgmr.msra.gmra.mrb[100].mxu1 %vm984_vm2, %v7832_v31  ;;  %3131 = vmatprep.mubr.f32.mxu0 %v9007_v5 }
 0x703   : > { %3244 = vmatprep.mubr.f32.mxu1 %v9007_v5 }
 0x705   : > { %7849 = vmatmul.mubr.msk.f32.gmra.mrb[102].mxu0 %vm984_vm2, %v7833_v34 }
 0x706   : > { %7857 = vmatmul.mubr.msk.f32.gmra.mrb[102].mxu1 %vm984_vm2, %v7833_v34  ;;  %3137 = vmatprep.mubr.f32.mxu0 %v9007_v5 }
 0x707   : > { %3250 = vmatprep.mubr.f32.mxu1 %v9007_v5 }
 0x709   : > { %7850 = vmatmul.mubr.msk.f32.gmra.mrb[104].mxu0 %vm984_vm2, %v7834_v52 }
 0x70a   : > { %7858 = vmatmul.mubr.msk.f32.gmra.mrb[104].mxu1 %vm984_vm2, %v7834_v52  ;;  %3143 = vmatprep.mubr.f32.mxu0 %v9007_v5 }
 0x70b   : > { %3256 = vmatprep.mubr.f32.mxu1 %v9007_v5 }
 0x70d   : > { %7851 = vmatmul.mubr.msk.f32.gmra.mrb[106].mxu0 %vm984_vm2, %v7835_v38 }
 0x70e   : > { %7859 = vmatmul.mubr.msk.f32.gmra.mrb[106].mxu1 %vm984_vm2, %v7835_v38  ;;  %3149 = vmatprep.mubr.f32.mxu0 %v9007_v5 }
 0x70f   : > { %3262 = vmatprep.mubr.f32.mxu1 %v9007_v5 }
 0x711   : > { %7852 = vmatmul.mubr.msk.f32.gmra.mrb[108].mxu0 %vm984_vm2, %v7836_v33 }
 0x712   : > { %7860 = vmatmul.mubr.msk.f32.gmra.mrb[108].mxu1 %vm984_vm2, %v7836_v33  ;;  %3155 = vmatprep.mubr.f32.mxu0 %v9007_v5 }
 0x713   : > { %3268 = vmatprep.mubr.f32.mxu1 %v9007_v5 }
 0x715   : > { %7853 = vmatmul.mubr.msk.f32.gmra.mrb[110].mxu0 %vm984_vm2, %v7837_v13 }
 0x716   : > { %7861 = vmatmul.mubr.msk.f32.gmra.mrb[110].mxu1 %vm984_vm2, %v7837_v13  ;;  %3161 = vmatprep.mubr.f32.mxu0 %v9007_v5 }
 0x717   : > { %3274 = vmatprep.mubr.f32.mxu1 %v9007_v5 }
 0x719   : > { %7854 = vmatmul.mubr.msk.f32.gmra.mrb[112].mxu0 %vm984_vm2, %v7838_v40 }
 0x71a   : > { %7862 = vmatmul.mubr.msk.f32.gmra.mrb[112].mxu1 %vm984_vm2, %v7838_v40  ;;  %3167 = vmatprep.mubr.f32.mxu0 %v9007_v5 }
 0x71b   : > { %3280 = vmatprep.mubr.f32.mxu1 %v9007_v5 }
 0x71d   : > { %7855 = vmatmul.mubr.msk.f32.gmra.mrb[114].mxu0 %vm984_vm2, %v7839_v42 }
 0x71e   : > { %7863 = vmatmul.mubr.msk.f32.gmra.mrb[114].mxu1 %vm984_vm2, %v7839_v42  ;;  %3465 = vmatprep.mubr.f32.mxu0 %v9007_v5 }
 0x71f   : > { %3578 = vmatprep.mubr.f32.mxu1 %v9007_v5 }
 0x7d4   : > { %v3127_v62 = vpop.f32.mrb[100].mxu0 }
 0x7d5   : > { %v3240_v43 = vpop.f32.mrb[100].mxu1  ;;  %v3129_v32 = vpop.f32.mrb[101].mxu0  ;;  %v3128_v45 = vadd.f32 %v3127_v62, %v3000_v47 }
 0x7d6   : > { %v3242_v23 = vpop.f32.mrb[101].mxu1  ;;  %v3241_v51 = vadd.f32 %v3240_v43, %v3000_v47  ;;  %v3130_v53 = vadd.f32 %v3129_v32, %v3000_v47 }
 0x7d7   : > { %v3243_v58 = vadd.f32 %v3242_v23, %v3000_v47  ;;  %v3287_v22 = vmax.f32 %v3128_v45, 0.0  ;;  %v3020_v47 = vpop.permute.xlu0 %3019 }
 0x7d8   : > { %v3133_v36 = vpop.f32.mrb[102].mxu0  ;;  %v3289_v55 = vmax.f32 %v3241_v51, 0.0  ;;  %v3288_v35 = vmax.f32 %v3130_v53, 0.0 }
 0x7d9   : > { %v3134_v54 = vadd.f32 %v3133_v36, %v3005_v29  ;;  %v3246_v12 = vpop.f32.mrb[102].mxu1  ;;  %v3135_v39 = vpop.f32.mrb[103].mxu0  ;;  %v3290_v9 = vmax.f32 %v3243_v58, 0.0 }
 0x7da   : > { %v3247_v57 = vadd.f32 %v3246_v12, %v3005_v29  ;;  %v3136_v48 = vadd.f32 %v3135_v39, %v3005_v29  ;;  %v3248_v21 = vpop.f32.mrb[103].mxu1  ;;  %v3025_v36 = vpop.permute.xlu1 %3024 }
 0x7db   : > { %v3291_v50 = vmax.f32 %v3134_v54, 0.0  ;;  %v3249_v61 = vadd.f32 %v3248_v21, %v3005_v29 }
 0x7dc   : > { %v3293_v2 = vmax.f32 %v3247_v57, 0.0  ;;  %v3292_v0 = vmax.f32 %v3136_v48, 0.0  ;;  %v3139_v3 = vpop.f32.mrb[104].mxu0 }
 0x7dd   : > { %v8416_v4 = vpack.c.bf16 %v3291_v50, %v3287_v22  ;;  %v3294_v17 = vmax.f32 %v3249_v61, 0.0  ;;  %v3252_v15 = vpop.f32.mrb[104].mxu1  ;;  %v3141_v20 = vpop.f32.mrb[105].mxu0  ;;  %v3140_v56 = vadd.f32 %v3139_v3, %v3010_v6 }
 0x7de   : > { %v8432_v19 = vpack.c.bf16 %v3293_v2, %v3289_v55  ;;  %v8414_v1 = vpack.c.bf16 %v3292_v0, %v3288_v35  ;;  %v3254_v30 = vpop.f32.mrb[105].mxu1  ;;  %v3253_v59 = vadd.f32 %v3252_v15, %v3010_v6  ;;  %v3142_v10 = vadd.f32 %v3141_v20, %v3010_v6 }
 0x7df   : > { %v8430_v41 = vpack.c.bf16 %v3294_v17, %v3290_v9  ;;  %v3255_v18 = vadd.f32 %v3254_v30, %v3010_v6  ;;  %v3295_v28 = vmax.f32 %v3140_v56, 0.0  ;;  %v3030_v30 = vpop.permute.xlu0 %3029 }
 0x7e0   : > { %v3145_v14 = vpop.f32.mrb[106].mxu0  ;;  %8415 = vmatprep.subr.bf16.mxu0 %v8414_v1  ;;  %v3297_v34 = vmax.f32 %v3253_v59, 0.0  ;;  %v3296_v52 = vmax.f32 %v3142_v10, 0.0 }
 0x7e1   : > { %v3146_v8 = vadd.f32 %v3145_v14, %v3015_v44  ;;  %v3258_v49 = vpop.f32.mrb[106].mxu1  ;;  %8431 = vmatprep.subr.bf16.mxu1 %v8430_v41  ;;  %v3147_v24 = vpop.f32.mrb[107].mxu0  ;;  %8417 = vmatpush1.bf16.msra.mxu0 %v8416_v4  ;;  %v3298_v40 = vmax.f32 %v3255_v18, 0.0 }
 0x7e2   : > { %v3259_v25 = vadd.f32 %v3258_v49, %v3015_v44  ;;  %v3148_v26 = vadd.f32 %v3147_v24, %v3015_v44  ;;  %v3260_v27 = vpop.f32.mrb[107].mxu1  ;;  %8433 = vmatpush1.bf16.msra.mxu1 %v8432_v19  ;;  %v3035_v14 = vpop.permute.xlu1 %3034 }
 0x7e3   : > { %v3299_v11 = vmax.f32 %v3146_v8, 0.0  ;;  %v3261_v31 = vadd.f32 %v3260_v27, %v3015_v44 }
 0x7e4   : > { %v3301_v38 = vmax.f32 %v3259_v25, 0.0  ;;  %v3300_v33 = vmax.f32 %v3148_v26, 0.0  ;;  %v3151_v13 = vpop.f32.mrb[108].mxu0 }
 0x7e5   : > { %v8420_v42 = vpack.c.bf16 %v3299_v11, %v3295_v28  ;;  %v3302_v62 = vmax.f32 %v3261_v31, 0.0  ;;  %v3264_v43 = vpop.f32.mrb[108].mxu1  ;;  %v3153_v32 = vpop.f32.mrb[109].mxu0  ;;  %v3152_v53 = vadd.f32 %v3151_v13, %v3020_v47 }
 0x7e6   : > { %v8436_v23 = vpack.c.bf16 %v3301_v38, %v3297_v34  ;;  %v8418_v45 = vpack.c.bf16 %v3300_v33, %v3296_v52  ;;  %v3266_v29 = vpop.f32.mrb[109].mxu1  ;;  %v3265_v58 = vadd.f32 %v3264_v43, %v3020_v47  ;;  %v3154_v54 = vadd.f32 %v3153_v32, %v3020_v47 }
 0x7e7   : > { %v8434_v51 = vpack.c.bf16 %v3302_v62, %v3298_v40  ;;  %v3267_v39 = vadd.f32 %v3266_v29, %v3020_v47  ;;  %v3303_v55 = vmax.f32 %v3152_v53, 0.0  ;;  %v7864_v29 = vld [vmem:[%s11036_s8 + $0x40] sm:$0xff]  ;;  %v7866_v53 = vld [vmem:[%s11036_s8 + $0x50] sm:$0xff] }
 0x7e8   : > { %v3157_v12 = vpop.f32.mrb[110].mxu0  ;;  %8419 = vmatprep.subr.bf16.mxu0 %v8418_v45  ;;  %v3305_v0 = vmax.f32 %v3265_v58, 0.0  ;;  %v3304_v3 = vmax.f32 %v3154_v54, 0.0  ;;  %v7868_v58 = vld [vmem:[%s11036_s8 + $0x60] sm:$0xff]  ;;  %v7869_v54 = vld [vmem:[%s11036_s8 + $0x68] sm:$0xff] }
 0x7e9   : > { %v3158_v57 = vadd.f32 %v3157_v12, %v3025_v36  ;;  %v3270_v48 = vpop.f32.mrb[110].mxu1  ;;  %8435 = vmatprep.subr.bf16.mxu1 %v8434_v51  ;;  %v3159_v21 = vpop.f32.mrb[111].mxu0  ;;  %8421 = vmatpush1.bf16.msra.mxu0 %v8420_v42  ;;  %v3306_v15 = vmax.f32 %v3267_v39, 0.0  ;;  %v7865_v51 = vld [vmem:[%s11036_s8 + $0x48] sm:$0xff]  ;;  %v7870_v12 = vld [vmem:[%s11036_s8 + $0x70] sm:$0xff]  ;;  %v7871_v39 = vld [vmem:[%s11036_s8 + $0x78] sm:$0xff] }
 0x7ea   : > { %v3271_v22 = vadd.f32 %v3270_v48, %v3025_v36  ;;  %v3160_v50 = vadd.f32 %v3159_v21, %v3025_v36  ;;  %v3272_v61 = vpop.f32.mrb[111].mxu1  ;;  %8437 = vmatpush1.bf16.msra.mxu1 %v8436_v23 }
 0x7eb   : > { %v3307_v35 = vmax.f32 %v3158_v57, 0.0  ;;  %v3273_v2 = vadd.f32 %v3272_v61, %v3025_v36  ;;  %v7867_v36 = vld [vmem:[%s11036_s8 + $0x58] sm:$0xff] }
 0x7ec   : > { %v3309_v9 = vmax.f32 %v3271_v22, 0.0  ;;  %v3308_v4 = vmax.f32 %v3160_v50, 0.0  ;;  %v3163_v17 = vpop.f32.mrb[112].mxu0  ;;  %v3340_v22 = vpop.permute.xlu0 %3339 }
 0x7ed   : > { %v8424_v20 = vpack.c.bf16 %v3307_v35, %v3303_v55  ;;  %v3310_v6 = vmax.f32 %v3273_v2, 0.0  ;;  %v3276_v19 = vpop.f32.mrb[112].mxu1  ;;  %v3165_v1 = vpop.f32.mrb[113].mxu0  ;;  %v3164_v10 = vadd.f32 %v3163_v17, %v3030_v30 }
 0x7ee   : > { %v8440_v41 = vpack.c.bf16 %v3309_v9, %v3305_v0  ;;  %v8422_v56 = vpack.c.bf16 %v3308_v4, %v3304_v3  ;;  %v3278_v44 = vpop.f32.mrb[113].mxu1  ;;  %v3277_v18 = vadd.f32 %v3276_v19, %v3030_v30  ;;  %v3166_v8 = vadd.f32 %v3165_v1, %v3030_v30  ;;  %v3345_v55 = vpop.permute.xlu1 %3344 }
 0x7ef   : > { %v8438_v59 = vpack.c.bf16 %v3310_v6, %v3306_v15  ;;  %v3279_v24 = vadd.f32 %v3278_v44, %v3030_v30  ;;  %v3311_v34 = vmax.f32 %v3164_v10, 0.0 }
 0x7f0   : > { %v3169_v49 = vpop.f32.mrb[114].mxu0  ;;  %8423 = vmatprep.subr.bf16.mxu0 %v8422_v56  ;;  %v3313_v33 = vmax.f32 %v3277_v18, 0.0  ;;  %v3312_v13 = vmax.f32 %v3166_v8, 0.0 }
 0x7f1   : > { %v3170_v25 = vadd.f32 %v3169_v49, %v3035_v14  ;;  %v3282_v26 = vpop.f32.mrb[114].mxu1  ;;  %8439 = vmatprep.subr.bf16.mxu1 %v8438_v59  ;;  %v3171_v27 = vpop.f32.mrb[115].mxu0  ;;  %8425 = vmatpush1.bf16.msra.mxu0 %v8424_v20  ;;  %v3314_v62 = vmax.f32 %v3279_v24, 0.0 }
 0x7f2   : > { %v3283_v28 = vadd.f32 %v3282_v26, %v3035_v14  ;;  %v3172_v11 = vadd.f32 %v3171_v27, %v3035_v14  ;;  %v3284_v31 = vpop.f32.mrb[115].mxu1  ;;  %8441 = vmatpush1.bf16.msra.mxu1 %v8440_v41 }
 0x7f3   : > { %v3315_v52 = vmax.f32 %v3170_v25, 0.0  ;;  %v3285_v38 = vadd.f32 %v3284_v31, %v3035_v14  ;;  %v3350_v25 = vpop.permute.xlu0 %3349 }
 0x7f4   : > { %v3317_v40 = vmax.f32 %v3283_v28, 0.0  ;;  %v3316_v42 = vmax.f32 %v3172_v11, 0.0 }
 0x7f5   : > { %v8428_v43 = vpack.c.bf16 %v3315_v52, %v3311_v34  ;;  %v3318_v32 = vmax.f32 %v3285_v38, 0.0  ;;  %v3355_v34 = vpop.permute.xlu1 %3354 }
 0x7f6   : > { %v8444_v47 = vpack.c.bf16 %v3317_v40, %v3313_v33  ;;  %v8426_v23 = vpack.c.bf16 %v3316_v42, %v3312_v13 }
 0x7f7   : > { %v8442_v45 = vpack.c.bf16 %v3318_v32, %v3314_v62 }
 0x7f8   : > { %8427 = vmatprep.subr.bf16.mxu0 %v8426_v23 }
 0x7f9   : > { %8443 = vmatprep.subr.bf16.mxu1 %v8442_v45  ;;  %8429 = vmatpush1.bf16.msra.mxu0 %v8428_v43 }
 0x7fa   : > { %8445 = vmatpush1.bf16.msra.mxu1 %v8444_v47 }
 0x7fc   : > { %7880 = vmatmul.mubr.msk.f32.vlgmr.msra.gmra.mrb[116].mxu0 %vm984_vm2, %v7864_v29 }
 0x7fd   : > { %7888 = vmatmul.mubr.msk.f32.vlgmr.msra.gmra.mrb[116].mxu1 %vm984_vm2, %v7864_v29  ;;  %3471 = vmatprep.mubr.f32.mxu0 %v9007_v5 }
 0x7fe   : > { %3584 = vmatprep.mubr.f32.mxu1 %v9007_v5 }
 0x800   : > { %7881 = vmatmul.mubr.msk.f32.gmra.mrb[118].mxu0 %vm984_vm2, %v7865_v51 }
 0x801   : > { %7889 = vmatmul.mubr.msk.f32.gmra.mrb[118].mxu1 %vm984_vm2, %v7865_v51  ;;  %3477 = vmatprep.mubr.f32.mxu0 %v9007_v5 }
 0x802   : > { %3590 = vmatprep.mubr.f32.mxu1 %v9007_v5 }
 0x804   : > { %7882 = vmatmul.mubr.msk.f32.gmra.mrb[120].mxu0 %vm984_vm2, %v7866_v53 }
 0x805   : > { %7890 = vmatmul.mubr.msk.f32.gmra.mrb[120].mxu1 %vm984_vm2, %v7866_v53  ;;  %3483 = vmatprep.mubr.f32.mxu0 %v9007_v5 }
 0x806   : > { %3596 = vmatprep.mubr.f32.mxu1 %v9007_v5 }
 0x808   : > { %7883 = vmatmul.mubr.msk.f32.gmra.mrb[122].mxu0 %vm984_vm2, %v7867_v36 }
 0x809   : > { %7891 = vmatmul.mubr.msk.f32.gmra.mrb[122].mxu1 %vm984_vm2, %v7867_v36  ;;  %3489 = vmatprep.mubr.f32.mxu0 %v9007_v5 }
 0x80a   : > { %3602 = vmatprep.mubr.f32.mxu1 %v9007_v5 }
 0x80c   : > { %7884 = vmatmul.mubr.msk.f32.gmra.mrb[124].mxu0 %vm984_vm2, %v7868_v58 }
 0x80d   : > { %7892 = vmatmul.mubr.msk.f32.gmra.mrb[124].mxu1 %vm984_vm2, %v7868_v58  ;;  %3495 = vmatprep.mubr.f32.mxu0 %v9007_v5 }
 0x80e   : > { %3608 = vmatprep.mubr.f32.mxu1 %v9007_v5 }
 0x810   : > { %7885 = vmatmul.mubr.msk.f32.gmra.mrb[126].mxu0 %vm984_vm2, %v7869_v54 }
 0x811   : > { %7893 = vmatmul.mubr.msk.f32.gmra.mrb[126].mxu1 %vm984_vm2, %v7869_v54  ;;  %3501 = vmatprep.mubr.f32.mxu0 %v9007_v5 }
 0x812   : > { %3614 = vmatprep.mubr.f32.mxu1 %v9007_v5 }
 0x814   : > { %7886 = vmatmul.mubr.msk.f32.gmra.mrb[128].mxu0 %vm984_vm2, %v7870_v12 }
 0x815   : > { %7894 = vmatmul.mubr.msk.f32.gmra.mrb[128].mxu1 %vm984_vm2, %v7870_v12  ;;  %3507 = vmatprep.mubr.f32.mxu0 %v9007_v5 }
 0x816   : > { %3620 = vmatprep.mubr.f32.mxu1 %v9007_v5 }
 0x818   : > { %7887 = vmatmul.mubr.msk.f32.gmra.mrb[130].mxu0 %vm984_vm2, %v7871_v39 }
 0x819   : > { %7895 = vmatmul.mubr.msk.f32.gmra.mrb[130].mxu1 %vm984_vm2, %v7871_v39  ;;  %3735 = vmatprep.mubr.f32.mxu0 %v9007_v5 }
 0x81a   : > { %3806 = vmatprep.mubr.f32.mxu1 %v9007_v5 }
 0x8cf   : > { %v3467_v57 = vpop.f32.mrb[116].mxu0 }
 0x8d0   : > { %v3580_v48 = vpop.f32.mrb[116].mxu1  ;;  %v3469_v21 = vpop.f32.mrb[117].mxu0  ;;  %v3468_v61 = vadd.f32 %v3467_v57, %v3340_v22 }
 0x8d1   : > { %v3582_v50 = vpop.f32.mrb[117].mxu1  ;;  %v3581_v35 = vadd.f32 %v3580_v48, %v3340_v22  ;;  %v3470_v2 = vadd.f32 %v3469_v21, %v3340_v22 }
 0x8d2   : > { %v3583_v3 = vadd.f32 %v3582_v50, %v3340_v22  ;;  %v3627_v19 = vmax.f32 %v3468_v61, 0.0  ;;  %v3360_v22 = vpop.permute.xlu0 %3359 }
 0x8d3   : > { %v3473_v0 = vpop.f32.mrb[118].mxu0  ;;  %v3629_v41 = vmax.f32 %v3581_v35, 0.0  ;;  %v3628_v56 = vmax.f32 %v3470_v2, 0.0 }
 0x8d4   : > { %v3474_v9 = vadd.f32 %v3473_v0, %v3345_v55  ;;  %v3586_v4 = vpop.f32.mrb[118].mxu1  ;;  %v3475_v17 = vpop.f32.mrb[119].mxu0  ;;  %v3630_v14 = vmax.f32 %v3583_v3, 0.0 }
 0x8d5   : > { %v3587_v15 = vadd.f32 %v3586_v4, %v3345_v55  ;;  %v3476_v20 = vadd.f32 %v3475_v17, %v3345_v55  ;;  %v3588_v6 = vpop.f32.mrb[119].mxu1  ;;  %v3365_v0 = vpop.permute.xlu1 %3364 }
 0x8d6   : > { %v3631_v1 = vmax.f32 %v3474_v9, 0.0  ;;  %v3589_v30 = vadd.f32 %v3588_v6, %v3345_v55 }
 0x8d7   : > { %v3633_v44 = vmax.f32 %v3587_v15, 0.0  ;;  %v3632_v59 = vmax.f32 %v3476_v20, 0.0  ;;  %v3479_v10 = vpop.f32.mrb[120].mxu0 }
 0x8d8   : > { %v10320_v18 = vpack.c.bf16 %v3631_v1, %v3627_v19  ;;  %v3634_v8 = vmax.f32 %v3589_v30, 0.0  ;;  %v3592_v49 = vpop.f32.mrb[120].mxu1  ;;  %v3481_v24 = vpop.f32.mrb[121].mxu0  ;;  %v3480_v31 = vadd.f32 %v3479_v10, %v3350_v25 }
 0x8d9   : > { %v10322_v26 = vpack.c.bf16 %v3633_v44, %v3629_v41  ;;  %v10324_v27 = vpack.c.bf16 %v3632_v59, %v3628_v56  ;;  %v3594_v28 = vpop.f32.mrb[121].mxu1  ;;  %v3593_v52 = vadd.f32 %v3592_v49, %v3350_v25  ;;  %v3482_v38 = vadd.f32 %v3481_v24, %v3350_v25 }
 0x8da   : > { %v10326_v11 = vpack.c.bf16 %v3634_v8, %v3630_v14  ;;  %v3595_v13 = vadd.f32 %v3594_v28, %v3350_v25  ;;  %v3635_v23 = vmax.f32 %v3480_v31, 0.0 }
 0x8db   : > { %v3485_v33 = vpop.f32.mrb[122].mxu0  ;;  %8447 = vmatprep.subr.bf16.mxu0 %v10324_v27  ;;  %v3637_v51 = vmax.f32 %v3593_v52, 0.0  ;;  %v3636_v53 = vmax.f32 %v3482_v38, 0.0  ;;  %v3370_v52 = vpop.permute.xlu0 %3369 }
 0x8dc   : > { %v3486_v40 = vadd.f32 %v3485_v33, %v3355_v34  ;;  %v3598_v42 = vpop.f32.mrb[122].mxu1  ;;  %8463 = vmatprep.subr.bf16.mxu1 %v10326_v11  ;;  %v3487_v62 = vpop.f32.mrb[123].mxu0  ;;  %8449 = vmatpush1.bf16.msra.mxu0 %v10320_v18  ;;  %v3638_v12 = vmax.f32 %v3595_v13, 0.0 }
 0x8dd   : > { %v3599_v43 = vadd.f32 %v3598_v42, %v3355_v34  ;;  %v3488_v32 = vadd.f32 %v3487_v62, %v3355_v34  ;;  %v3600_v47 = vpop.f32.mrb[123].mxu1  ;;  %8465 = vmatpush1.bf16.msra.mxu1 %v10322_v26  ;;  %v3375_v62 = vpop.permute.xlu1 %3374 }
 0x8de   : > { %v3639_v45 = vmax.f32 %v3486_v40, 0.0  ;;  %v3601_v29 = vadd.f32 %v3600_v47, %v3355_v34 }
 0x8df   : > { %v3641_v36 = vmax.f32 %v3599_v43, 0.0  ;;  %v3640_v58 = vmax.f32 %v3488_v32, 0.0  ;;  %v3491_v54 = vpop.f32.mrb[124].mxu0 }
 0x8e0   : > { %v10332_v39 = vpack.c.bf16 %v3639_v45, %v3635_v23  ;;  %v3642_v57 = vmax.f32 %v3601_v29, 0.0  ;;  %v3604_v48 = vpop.f32.mrb[124].mxu1  ;;  %v3493_v21 = vpop.f32.mrb[125].mxu0  ;;  %v3492_v2 = vadd.f32 %v3491_v54, %v3360_v22 }
 0x8e1   : > { %v10334_v50 = vpack.c.bf16 %v3641_v36, %v3637_v51  ;;  %v10336_v61 = vpack.c.bf16 %v3640_v58, %v3636_v53  ;;  %v3606_v55 = vpop.f32.mrb[125].mxu1  ;;  %v3605_v3 = vadd.f32 %v3604_v48, %v3360_v22  ;;  %v3494_v9 = vadd.f32 %v3493_v21, %v3360_v22 }
 0x8e2   : > { %v10338_v35 = vpack.c.bf16 %v3642_v57, %v3638_v12  ;;  %v3607_v17 = vadd.f32 %v3606_v55, %v3360_v22  ;;  %v3643_v41 = vmax.f32 %v3492_v2, 0.0 }
 0x8e3   : > { %v3497_v4 = vpop.f32.mrb[126].mxu0  ;;  %8451 = vmatprep.subr.bf16.mxu0 %v10336_v61  ;;  %v3645_v59 = vmax.f32 %v3605_v3, 0.0  ;;  %v3644_v10 = vmax.f32 %v3494_v9, 0.0 }
 0x8e4   : > { %v3498_v15 = vadd.f32 %v3497_v4, %v3365_v0  ;;  %v3610_v20 = vpop.f32.mrb[126].mxu1  ;;  %8467 = vmatprep.subr.bf16.mxu1 %v10338_v35  ;;  %v3499_v6 = vpop.f32.mrb[127].mxu0  ;;  %8453 = vmatpush1.bf16.msra.mxu0 %v10332_v39  ;;  %v3646_v24 = vmax.f32 %v3607_v17, 0.0 }
 0x8e5   : > { %v3611_v19 = vadd.f32 %v3610_v20, %v3365_v0  ;;  %v3500_v1 = vadd.f32 %v3499_v6, %v3365_v0  ;;  %v3612_v30 = vpop.f32.mrb[127].mxu1  ;;  %8469 = vmatpush1.bf16.msra.mxu1 %v10334_v50 }
 0x8e6   : > { %v3647_v56 = vmax.f32 %v3498_v15, 0.0  ;;  %v3613_v44 = vadd.f32 %v3612_v30, %v3365_v0  ;;  %v7896_v15 = vld [vmem:[%s11038_s10 + $0x4] sm:$0xf] }
 0x8e7   : > { %v3649_v14 = vmax.f32 %v3611_v19, 0.0  ;;  %v3648_v8 = vmax.f32 %v3500_v1, 0.0  ;;  %v3503_v49 = vpop.f32.mrb[128].mxu0 }
 0x8e8   : > { %v8456_v25 = vpack.c.bf16 %v3647_v56, %v3643_v41  ;;  %v3650_v28 = vmax.f32 %v3613_v44, 0.0  ;;  %v3616_v31 = vpop.f32.mrb[128].mxu1  ;;  %v3505_v34 = vpop.f32.mrb[129].mxu0  ;;  %v3504_v42 = vadd.f32 %v3503_v49, %v3370_v52 }
 0x8e9   : > { %v8472_v38 = vpack.c.bf16 %v3649_v14, %v3645_v59  ;;  %v8454_v33 = vpack.c.bf16 %v3648_v8, %v3644_v10  ;;  %v3618_v13 = vpop.f32.mrb[129].mxu1  ;;  %v3617_v43 = vadd.f32 %v3616_v31, %v3370_v52  ;;  %v3506_v32 = vadd.f32 %v3505_v34, %v3370_v52  ;;  %v3828_v59 = vpop.permute.xlu1 %3827 }
 0x8ea   : > { %v8470_v40 = vpack.c.bf16 %v3650_v28, %v3646_v24  ;;  %v3619_v23 = vadd.f32 %v3618_v13, %v3370_v52  ;;  %v3651_v54 = vmax.f32 %v3504_v42, 0.0 }
 0x8eb   : > { %v3509_v47 = vpop.f32.mrb[130].mxu0  ;;  %8455 = vmatprep.subr.bf16.mxu0 %v8454_v33  ;;  %v3653_v48 = vmax.f32 %v3617_v43, 0.0  ;;  %v3652_v21 = vmax.f32 %v3506_v32, 0.0 }
 0x8ec   : > { %v3510_v45 = vadd.f32 %v3509_v47, %v3375_v62  ;;  %v3622_v29 = vpop.f32.mrb[130].mxu1  ;;  %8471 = vmatprep.subr.bf16.mxu1 %v8470_v40  ;;  %v3511_v51 = vpop.f32.mrb[131].mxu0  ;;  %8457 = vmatpush1.bf16.msra.mxu0 %v8456_v25  ;;  %v3654_v2 = vmax.f32 %v3619_v23, 0.0 }
 0x8ed   : > { %v3623_v53 = vadd.f32 %v3622_v29, %v3375_v62  ;;  %v3512_v36 = vadd.f32 %v3511_v51, %v3375_v62  ;;  %v3624_v58 = vpop.f32.mrb[131].mxu1  ;;  %8473 = vmatpush1.bf16.msra.mxu1 %v8472_v38 }
 0x8ee   : > { %v3655_v12 = vmax.f32 %v3510_v45, 0.0  ;;  %v3625_v57 = vadd.f32 %v3624_v58, %v3375_v62 }
 0x8ef   : > { %v3657_v22 = vmax.f32 %v3623_v53, 0.0  ;;  %v3656_v55 = vmax.f32 %v3512_v36, 0.0 }
 0x8f0   : > { %v8460_v0 = vpack.c.bf16 %v3655_v12, %v3651_v54  ;;  %v3658_v3 = vmax.f32 %v3625_v57, 0.0  ;;  %v8940_v54 = vld [vmem:[%s9167_s23] sm:$0xff]  ;;  %v8941_v57 = vld [vmem:[%s9167_s23 + $0x8] sm:$0xff]  ;;  %s546_s23 = scalar_lea.vmem [#allocation2], %s7683_s28  ;;  %s9009_s28 = smov [#allocation2]  }
 0x8f1   : > { %v8476_v9 = vpack.c.bf16 %v3657_v22, %v3653_v48  ;;  %v8458_v4 = vpack.c.bf16 %v3656_v55, %v3652_v21  ;;  %s7558_s24 = sshll.u32 %s546_s23, 4  ;;  %s8946_s19 = sshll.u32 %s9009_s28, 4  ;;  %s10986_s24 = int_to_ptr.vmem [resolvable:$true] %s7558_s24  ;;  %s8947_s19 = int_to_ptr.vmem [resolvable:$false] %s8946_s19 }
 0x8f2   : > { %v8474_v17 = vpack.c.bf16 %v3658_v3, %v3654_v2  ;;  %v7905_v3 = vld [vmem:[%s11030_s2 + $0x88] sm:$0xff]  ;;  %s8942_s25 = scalar_lea.vmem %s10986_s24, 64  ;;  %s8948_s17 = scalar_lea.vmem %s8947_s19, 128 }
 0x8f3   : > { %8459 = vmatprep.subr.bf16.mxu0 %v8458_v4  ;;  %p8943_p11 = scmp.ne.s32.totalorder %s10986_s24, %s8942_s25  ;;  %p8949_p0 = scmp.lt.s32.totalorder %s10986_s24, %s8947_s19 }
 0x8f4   : > { %8475 = vmatprep.subr.bf16.mxu1 %v8474_v17  ;;  %8461 = vmatpush1.bf16.msra.mxu0 %v8460_v0  ;;  %p8950_p1 = scmp.lt.s32.totalorder %s8948_s17, %s8942_s25 }
 0x8f5   : > { %8477 = vmatpush1.bf16.msra.mxu1 %v8476_v9  ;;  %8479 = vmatprep.subr.bf16.mxu0 %v10324_v27  ;;  %p8944_p12 = pnand %p8943_p11, %p9133_p5 }
 0x8f6   : > { %8495 = vmatprep.subr.bf16.mxu1 %v10326_v11  ;;  %p8951_p2 = por %p8950_p1, %p8949_p0 }
 0x8f7   : > { %7898 = vmatmul.mubr.msk.f32.vlgmr.msra.gmra.mrb[132].mxu0 %vm984_vm2, %v7896_v15  ;;  %p8945_p13 = pneg %p8944_p12 }
 0x8f8   : > { %7899 = vmatmul.mubr.msk.f32.vlgmr.msra.gmra.mrb[132].mxu1 %vm984_vm2, %v7896_v15  ;;  %8481 = vmatpush1.bf16.msra.mxu0 %v10320_v18  ;;  %v7900_v18 = vld [vmem:[%s11040_s12 + $0x4] sm:$0xf]  ;;  %v7909_v15 = vld [vmem:[%s11030_s2 + $0xa8] sm:$0xff] }
 0x8f9   : > { %8497 = vmatpush1.bf16.msra.mxu1 %v10322_v26  ;;  %8483 = vmatprep.subr.bf16.mxu0 %v10336_v61  ;;  %v3666_v26 = vpop.permute.xlu0 %3665  ;;  %p8952_p3 = pnand %p8951_p2, %p8945_p13 }
 0x8fa   : > { %8499 = vmatprep.subr.bf16.mxu1 %v10338_v35  ;;  %3897 = vmatprep.mubr.f32.mxu0 %v9007_v5 }
 0x8fb   : > { %3968 = vmatprep.mubr.f32.mxu1 %v9007_v5 }
 0x8fc   : > { %8485 = vmatpush1.bf16.msra.mxu0 %v10332_v39 }
 0x8fd   : > { %8501 = vmatpush1.bf16.msra.mxu1 %v10334_v50  ;;  %8487 = vmatprep.subr.bf16.mxu0 %v8454_v33 }
 0x8fe   : > { %8503 = vmatprep.subr.bf16.mxu1 %v8470_v40 }
 0x900   : > { %8489 = vmatpush1.bf16.msra.mxu0 %v8456_v25 }
 0x901   : > { %8505 = vmatpush1.bf16.msra.mxu1 %v8472_v38  ;;  %8491 = vmatprep.subr.bf16.mxu0 %v8458_v4  ;;  %v7907_v4 = vld [vmem:[%s11030_s2 + $0x98] sm:$0xff] }
 0x902   : > { %8507 = vmatprep.subr.bf16.mxu1 %v8474_v17  ;;  %v7908_v17 = vld [vmem:[%s11030_s2 + $0xa0] sm:$0xff] }
 0x904   : > { %8493 = vmatpush1.bf16.msra.mxu0 %v8460_v0  ;;  %v7904_v0 = vld [vmem:[%s11030_s2 + $0x80] sm:$0xff] }
 0x905   : > { %8509 = vmatpush1.bf16.msra.mxu1 %v8476_v9  ;;  %v7906_v9 = vld [vmem:[%s11030_s2 + $0x90] sm:$0xff] }
 0x907   : > { %7902 = vmatmul.mubr.msk.f32.vlgmr.msra.gmra.mrb[134].mxu0 %vm984_vm2, %v7900_v18 }
 0x908   : > { %7903 = vmatmul.mubr.msk.f32.vlgmr.msra.gmra.mrb[134].mxu1 %vm984_vm2, %v7900_v18  ;;  %4169 = vmatprep.mubr.f32.mxu0 %v9007_v5  ;;  %v7910_v18 = vld [vmem:[%s11030_s2 + $0xb0] sm:$0xff] }
 0x909   : > { %4282 = vmatprep.mubr.f32.mxu1 %v9007_v5 }
 0x9ca   : > { %v3737_v27 = vpop.f32.mrb[132].mxu0 }
 0x9cb   : > { %v3738_v11 = vadd.f32 %v3737_v27, %v3666_v26  ;;  %v3808_v39 = vpop.f32.mrb[132].mxu1  ;;  %v3739_v50 = vpop.f32.mrb[133].mxu0 }
 0x9cc   : > { %v3809_v61 = vadd.f32 %v3808_v39, %v3666_v26  ;;  %v3740_v35 = vadd.f32 %v3739_v50, %v3666_v26  ;;  %v3810_v20 = vpop.f32.mrb[133].mxu1  ;;  %v4032_v50 = vpop.permute.xlu0 %4031 }
 0x9cd   : > { %8892 = vtanh.f32 %v3738_v11  ;;  %v3811_v6 = vadd.f32 %v3810_v20, %v3666_v26  ;;  %v7911_v26 = vld [vmem:[%s11030_s2 + $0xb8] sm:$0xff]  ;;  %v4037_v20 = vpop.permute.xlu1 %4036 }
 0x9ce   : > { %8894 = vtanh.f32 %v3809_v61 }
 0x9cf   : > { %8896 = vtanh.f32 %v3740_v35 }
 0x9d0   : > { %8898 = vtanh.f32 %v3811_v6 }
 0x9d7   : > { %v8893_v19 = vpop.eup %8892 }
 0x9d8   : > { %v8895_v1 = vpop.eup %8894  ;;  %v10366_v30 = vmul.f32 3.0, %v8893_v19 }
 0x9d9   : > { %v8897_v41 = vpop.eup %8896  ;;  %v10368_v56 = vmul.f32 3.0, %v8895_v1 }
 0x9da   : > { %v8899_v44 = vpop.eup %8898  ;;  %v3979_v10 = vmul.f32 1.442695, %v10366_v30  ;;  %v10371_v14 = vmul.f32 3.0, %v8897_v41  ;;  %v3899_v8 = vpop.f32.mrb[134].mxu0 }
 0x9db   : > { %v3983_v49 = vmul.f32 1.442695, %v10368_v56  ;;  %v10374_v24 = vmul.f32 3.0, %v8899_v44  ;;  %v3900_v25 = vadd.f32 %v3899_v8, %v3828_v59  ;;  %v3970_v28 = vpop.f32.mrb[134].mxu1  ;;  %v3901_v31 = vpop.f32.mrb[135].mxu0 }
 0x9dc   : > { %8900 = vpow2.f32 %v3979_v10  ;;  %v3981_v34 = vmul.f32 1.442695, %v10371_v14  ;;  %v3971_v52 = vadd.f32 %v3970_v28, %v3828_v59  ;;  %v3972_v38 = vpop.f32.mrb[135].mxu1  ;;  %v3902_v42 = vadd.f32 %v3901_v31, %v3828_v59 }
 0x9dd   : > { %8902 = vpow2.f32 %v3983_v49  ;;  %v3985_v33 = vmul.f32 1.442695, %v10374_v24  ;;  %v3975_v13 = vmul.f32 3.0, %v3900_v25  ;;  %v3973_v62 = vadd.f32 %v3972_v38, %v3828_v59 }
 0x9de   : > { %8904 = vpow2.f32 %v3981_v34  ;;  %v3977_v40 = vmul.f32 3.0, %v3971_v52  ;;  %v3976_v43 = vmul.f32 3.0, %v3902_v42 }
 0x9df   : > { %8906 = vpow2.f32 %v3985_v33  ;;  %v3978_v32 = vmul.f32 3.0, %v3973_v62 }
 0x9e0   : > { %v4001_v47 = vcombine.low %v3975_v13, %v3976_v43 }
 0x9e1   : > { %v4002_v23 = vcombine.low %v3977_v40, %v3978_v32 }
 0x9e6   : > { %v8901_v45 = vpop.eup %8900 }
 0x9e7   : > { %v8903_v29 = vpop.eup %8902 }
 0x9e8   : > { %v8905_v51 = vpop.eup %8904 }
 0x9e9   : > { %v8907_v53 = vpop.eup %8906  ;;  %v3991_v36 = vcombine.low %v8901_v45, %v8905_v51 }
 0x9ea   : > { %v3992_v58 = vcombine.low %v8903_v29, %v8907_v53 }
 0x9eb   : > { %v3995_v12 = vmul.f32 %v8940_v54, %v3991_v36 }
 0x9ec   : > { %v3996_v48 = vmul.f32 %v8941_v57, %v3992_v58  ;;  %v4047_v58 = vpop.permute.xlu1 %4046 }
 0x9ed   : > { %v10380_v21 = vadd.f32 %v4001_v47, %v3995_v12 }
 0x9ee   : > { %v10382_v22 = vadd.f32 %v4002_v23, %v3996_v48  ;;  %v4042_v23 = vpop.permute.xlu0 %4041 }
 0x9ef   : > { %v4071_v55 = vcombine.high %v10380_v21, %v10380_v21 }
 0x9f0   : > { %v4072_v2 = vcombine.high %v10382_v22, %v10382_v22 }
 0x9f1   : > { %7920 = vmatprep.subr.msk.mxu0 %vm661_vm0, %v4071_v55 }
 0x9f2   : > { %7930 = vmatprep.subr.msk.mxu1 %vm661_vm0, %v4072_v2  ;;  %7921 = vmatpush1.msk.msra.mxu0 %vm661_vm0, %v10380_v21 }
 0x9f3   : > { %7931 = vmatpush1.msk.msra.mxu1 %vm661_vm0, %v10382_v22  ;;  %7922 = vmatmul.mubr.msk.f32.vlgmr.msra.gmra.mrb[136].mxu0 %vm636_vm1, %v7904_v0 }
 0x9f4   : > { %7932 = vmatmul.mubr.msk.f32.vlgmr.msra.gmra.mrb[136].mxu1 %vm636_vm1, %v7904_v0  ;;  %4175 = vmatprep.mubr.f32.mxu0 %v9007_v5 }
 0x9f5   : > { %4288 = vmatprep.mubr.f32.mxu1 %v9007_v5 }
 0x9f7   : > { %7923 = vmatmul.mubr.msk.f32.gmra.mrb[138].mxu0 %vm636_vm1, %v7905_v3 }
 0x9f8   : > { %7933 = vmatmul.mubr.msk.f32.gmra.mrb[138].mxu1 %vm636_vm1, %v7905_v3  ;;  %4181 = vmatprep.mubr.f32.mxu0 %v9007_v5 }
 0x9f9   : > { %4294 = vmatprep.mubr.f32.mxu1 %v9007_v5 }
 0x9fb   : > { %7924 = vmatmul.mubr.msk.f32.gmra.mrb[140].mxu0 %vm636_vm1, %v7906_v9 }
 0x9fc   : > { %7934 = vmatmul.mubr.msk.f32.gmra.mrb[140].mxu1 %vm636_vm1, %v7906_v9  ;;  %4187 = vmatprep.mubr.f32.mxu0 %v9007_v5 }
 0x9fd   : > { %4300 = vmatprep.mubr.f32.mxu1 %v9007_v5 }
 0x9ff   : > { %7925 = vmatmul.mubr.msk.f32.gmra.mrb[142].mxu0 %vm636_vm1, %v7907_v4 }
 0xa00   : > { %7935 = vmatmul.mubr.msk.f32.gmra.mrb[142].mxu1 %vm636_vm1, %v7907_v4  ;;  %4193 = vmatprep.mubr.f32.mxu0 %v9007_v5 }
 0xa01   : > { %4306 = vmatprep.mubr.f32.mxu1 %v9007_v5 }
 0xa03   : > { %7926 = vmatmul.mubr.msk.f32.gmra.mrb[144].mxu0 %vm636_vm1, %v7908_v17 }
 0xa04   : > { %7936 = vmatmul.mubr.msk.f32.gmra.mrb[144].mxu1 %vm636_vm1, %v7908_v17  ;;  %4199 = vmatprep.mubr.f32.mxu0 %v9007_v5 }
 0xa05   : > { %4312 = vmatprep.mubr.f32.mxu1 %v9007_v5 }
 0xa07   : > { %7927 = vmatmul.mubr.msk.f32.gmra.mrb[146].mxu0 %vm636_vm1, %v7909_v15 }
 0xa08   : > { %7937 = vmatmul.mubr.msk.f32.gmra.mrb[146].mxu1 %vm636_vm1, %v7909_v15  ;;  %4205 = vmatprep.mubr.f32.mxu0 %v9007_v5 }
 0xa09   : > { %4318 = vmatprep.mubr.f32.mxu1 %v9007_v5 }
 0xa0b   : > { %7928 = vmatmul.mubr.msk.f32.gmra.mrb[148].mxu0 %vm636_vm1, %v7910_v18 }
 0xa0c   : > { %7938 = vmatmul.mubr.msk.f32.gmra.mrb[148].mxu1 %vm636_vm1, %v7910_v18  ;;  %4211 = vmatprep.mubr.f32.mxu0 %v9007_v5 }
 0xa0d   : > { %4324 = vmatprep.mubr.f32.mxu1 %v9007_v5 }
 0xa0f   : > { %7929 = vmatmul.mubr.msk.f32.gmra.mrb[150].mxu0 %vm636_vm1, %v7911_v26 }
 0xa10   : > { %7939 = vmatmul.mubr.msk.f32.gmra.mrb[150].mxu1 %vm636_vm1, %v7911_v26  ;;  %4509 = vmatprep.mubr.f32.mxu0 %v9007_v5 }
 0xa11   : > { %4622 = vmatprep.mubr.f32.mxu1 %v9007_v5 }
 0xac6   : > { %v4171_v27 = vpop.f32.mrb[136].mxu0 }
 0xac7   : > { %v4284_v11 = vpop.f32.mrb[136].mxu1  ;;  %v4173_v39 = vpop.f32.mrb[137].mxu0  ;;  %v4172_v35 = vadd.f32 %v4171_v27, %v4032_v50 }
 0xac8   : > { %v4286_v61 = vpop.f32.mrb[137].mxu1  ;;  %v4285_v6 = vadd.f32 %v4284_v11, %v4032_v50  ;;  %v4174_v19 = vadd.f32 %v4173_v39, %v4032_v50 }
 0xac9   : > { %v4287_v41 = vadd.f32 %v4286_v61, %v4032_v50  ;;  %v4331_v28 = vmax.f32 %v4172_v35, 0.0 }
 0xaca   : > { %v4177_v1 = vpop.f32.mrb[138].mxu0  ;;  %v4333_v52 = vmax.f32 %v4285_v6, 0.0  ;;  %v4332_v38 = vmax.f32 %v4174_v19, 0.0 }
 0xacb   : > { %v4178_v44 = vadd.f32 %v4177_v1, %v4037_v20  ;;  %v4290_v59 = vpop.f32.mrb[138].mxu1  ;;  %v4179_v10 = vpop.f32.mrb[139].mxu0  ;;  %v4334_v42 = vmax.f32 %v4287_v41, 0.0 }
 0xacc   : > { %v4291_v8 = vadd.f32 %v4290_v59, %v4037_v20  ;;  %v4180_v49 = vadd.f32 %v4179_v10, %v4037_v20  ;;  %v4292_v25 = vpop.f32.mrb[139].mxu1  ;;  %v4052_v1 = vpop.permute.xlu0 %4051 }
 0xacd   : > { %v4335_v31 = vmax.f32 %v4178_v44, 0.0  ;;  %v4293_v34 = vadd.f32 %v4292_v25, %v4037_v20 }
 0xace   : > { %v4337_v33 = vmax.f32 %v4291_v8, 0.0  ;;  %v4336_v13 = vmax.f32 %v4180_v49, 0.0  ;;  %v4183_v40 = vpop.f32.mrb[140].mxu0  ;;  %v4057_v49 = vpop.permute.xlu1 %4056 }
 0xacf   : > { %v8512_v62 = vpack.c.bf16 %v4335_v31, %v4331_v28  ;;  %v4338_v43 = vmax.f32 %v4293_v34, 0.0  ;;  %v4296_v32 = vpop.f32.mrb[140].mxu1  ;;  %v4185_v47 = vpop.f32.mrb[141].mxu0  ;;  %v4184_v36 = vadd.f32 %v4183_v40, %v4042_v23 }
 0xad0   : > { %v8528_v45 = vpack.c.bf16 %v4337_v33, %v4333_v52  ;;  %v8510_v29 = vpack.c.bf16 %v4336_v13, %v4332_v38  ;;  %v4298_v51 = vpop.f32.mrb[141].mxu1  ;;  %v4297_v54 = vadd.f32 %v4296_v32, %v4042_v23  ;;  %v4186_v12 = vadd.f32 %v4185_v47, %v4042_v23 }
 0xad1   : > { %v8526_v53 = vpack.c.bf16 %v4338_v43, %v4334_v42  ;;  %v4299_v48 = vadd.f32 %v4298_v51, %v4042_v23  ;;  %v4339_v17 = vmax.f32 %v4184_v36, 0.0 }
 0xad2   : > { %v4189_v57 = vpop.f32.mrb[142].mxu0  ;;  %8511 = vmatprep.subr.bf16.mxu0 %v8510_v29  ;;  %v4341_v26 = vmax.f32 %v4297_v54, 0.0  ;;  %v4340_v27 = vmax.f32 %v4186_v12, 0.0 }
 0xad3   : > { %v4190_v55 = vadd.f32 %v4189_v57, %v4047_v58  ;;  %v4302_v2 = vpop.f32.mrb[142].mxu1  ;;  %8527 = vmatprep.subr.bf16.mxu1 %v8526_v53  ;;  %v4191_v0 = vpop.f32.mrb[143].mxu0  ;;  %8513 = vmatpush1.bf16.msra.mxu0 %v8512_v62  ;;  %v4342_v61 = vmax.f32 %v4299_v48, 0.0 }
 0xad4   : > { %v4303_v3 = vadd.f32 %v4302_v2, %v4047_v58  ;;  %v4192_v9 = vadd.f32 %v4191_v0, %v4047_v58  ;;  %v4304_v4 = vpop.f32.mrb[143].mxu1  ;;  %8529 = vmatpush1.bf16.msra.mxu1 %v8528_v45  ;;  %v4062_v57 = vpop.permute.xlu0 %4061 }
 0xad5   : > { %v4343_v15 = vmax.f32 %v4190_v55, 0.0  ;;  %v4305_v18 = vadd.f32 %v4304_v4, %v4047_v58 }
 0xad6   : > { %v4345_v11 = vmax.f32 %v4303_v3, 0.0  ;;  %v4344_v39 = vmax.f32 %v4192_v9, 0.0  ;;  %v4195_v50 = vpop.f32.mrb[144].mxu0  ;;  %v4067_v9 = vpop.permute.xlu1 %4066 }
 0xad7   : > { %v8516_v35 = vpack.c.bf16 %v4343_v15, %v4339_v17  ;;  %v4346_v20 = vmax.f32 %v4305_v18, 0.0  ;;  %v4308_v6 = vpop.f32.mrb[144].mxu1  ;;  %v4197_v19 = vpop.f32.mrb[145].mxu0  ;;  %v4196_v8 = vadd.f32 %v4195_v50, %v4052_v1 }
 0xad8   : > { %v8532_v41 = vpack.c.bf16 %v4345_v11, %v4341_v26  ;;  %v8514_v44 = vpack.c.bf16 %v4344_v39, %v4340_v27  ;;  %v4310_v59 = vpop.f32.mrb[145].mxu1  ;;  %v4309_v25 = vadd.f32 %v4308_v6, %v4052_v1  ;;  %v4198_v28 = vadd.f32 %v4197_v19, %v4052_v1 }
 0xad9   : > { %v8530_v10 = vpack.c.bf16 %v4346_v20, %v4342_v61  ;;  %v4311_v34 = vadd.f32 %v4310_v59, %v4052_v1  ;;  %v4347_v62 = vmax.f32 %v4196_v8, 0.0 }
 0xada   : > { %v4201_v31 = vpop.f32.mrb[146].mxu0  ;;  %8515 = vmatprep.subr.bf16.mxu0 %v8514_v44  ;;  %v4349_v47 = vmax.f32 %v4309_v25, 0.0  ;;  %v4348_v23 = vmax.f32 %v4198_v28, 0.0 }
 0xadb   : > { %v4202_v52 = vadd.f32 %v4201_v31, %v4057_v49  ;;  %v4314_v38 = vpop.f32.mrb[146].mxu1  ;;  %8531 = vmatprep.subr.bf16.mxu1 %v8530_v10  ;;  %v4203_v33 = vpop.f32.mrb[147].mxu0  ;;  %8517 = vmatpush1.bf16.msra.mxu0 %v8516_v35  ;;  %v4350_v53 = vmax.f32 %v4311_v34, 0.0  ;;  %v7940_v31 = vld [vmem:[%s11032_s4 + $0x80] sm:$0xff]  ;;  %v7941_v34 = vld [vmem:[%s11032_s4 + $0x88] sm:$0xff] }
 0xadc   : > { %v4315_v13 = vadd.f32 %v4314_v38, %v4057_v49  ;;  %v4204_v40 = vadd.f32 %v4203_v33, %v4057_v49  ;;  %v4316_v42 = vpop.f32.mrb[147].mxu1  ;;  %8533 = vmatpush1.bf16.msra.mxu1 %v8532_v41  ;;  %v7943_v38 = vld [vmem:[%s11032_s4 + $0x98] sm:$0xff]  ;;  %v7944_v33 = vld [vmem:[%s11032_s4 + $0xa0] sm:$0xff] }
 0xadd   : > { %v4351_v43 = vmax.f32 %v4202_v52, 0.0  ;;  %v4317_v32 = vadd.f32 %v4316_v42, %v4057_v49  ;;  %v7942_v52 = vld [vmem:[%s11032_s4 + $0x90] sm:$0xff]  ;;  %v7947_v42 = vld [vmem:[%s11032_s4 + $0xb8] sm:$0xff] }
 0xade   : > { %v4353_v45 = vmax.f32 %v4315_v13, 0.0  ;;  %v4352_v29 = vmax.f32 %v4204_v40, 0.0  ;;  %v4207_v51 = vpop.f32.mrb[148].mxu0  ;;  %v7945_v13 = vld [vmem:[%s11032_s4 + $0xa8] sm:$0xff]  ;;  %v7946_v40 = vld [vmem:[%s11032_s4 + $0xb0] sm:$0xff] }
 0xadf   : > { %v8520_v36 = vpack.c.bf16 %v4351_v43, %v4347_v62  ;;  %v4354_v58 = vmax.f32 %v4317_v32, 0.0  ;;  %v4320_v54 = vpop.f32.mrb[148].mxu1  ;;  %v4209_v12 = vpop.f32.mrb[149].mxu0  ;;  %v4208_v3 = vadd.f32 %v4207_v51, %v4062_v57 }
 0xae0   : > { %v8536_v48 = vpack.c.bf16 %v4353_v45, %v4349_v47  ;;  %v8518_v55 = vpack.c.bf16 %v4352_v29, %v4348_v23  ;;  %v4322_v2 = vpop.f32.mrb[149].mxu1  ;;  %v4321_v4 = vadd.f32 %v4320_v54, %v4062_v57  ;;  %v4210_v17 = vadd.f32 %v4209_v12, %v4062_v57  ;;  %v4384_v47 = vpop.permute.xlu0 %4383 }
 0xae1   : > { %v8534_v0 = vpack.c.bf16 %v4354_v58, %v4350_v53  ;;  %v4323_v18 = vadd.f32 %v4322_v2, %v4062_v57  ;;  %v4355_v35 = vmax.f32 %v4208_v3, 0.0  ;;  %v4389_v29 = vpop.permute.xlu1 %4388 }
 0xae2   : > { %v4213_v15 = vpop.f32.mrb[150].mxu0  ;;  %8519 = vmatprep.subr.bf16.mxu0 %v8518_v55  ;;  %v4357_v19 = vmax.f32 %v4321_v4, 0.0  ;;  %v4356_v1 = vmax.f32 %v4210_v17, 0.0 }
 0xae3   : > { %v4214_v26 = vadd.f32 %v4213_v15, %v4067_v9  ;;  %v4326_v27 = vpop.f32.mrb[150].mxu1  ;;  %8535 = vmatprep.subr.bf16.mxu1 %v8534_v0  ;;  %v4215_v11 = vpop.f32.mrb[151].mxu0  ;;  %8521 = vmatpush1.bf16.msra.mxu0 %v8520_v36  ;;  %v4358_v59 = vmax.f32 %v4323_v18, 0.0 }
 0xae4   : > { %v4327_v39 = vadd.f32 %v4326_v27, %v4067_v9  ;;  %v4216_v50 = vadd.f32 %v4215_v11, %v4067_v9  ;;  %v4328_v61 = vpop.f32.mrb[151].mxu1  ;;  %8537 = vmatpush1.bf16.msra.mxu1 %v8536_v48 }
 0xae5   : > { %v4359_v20 = vmax.f32 %v4214_v26, 0.0  ;;  %v4329_v6 = vadd.f32 %v4328_v61, %v4067_v9 }
 0xae6   : > { %v4361_v41 = vmax.f32 %v4327_v39, 0.0  ;;  %v4360_v44 = vmax.f32 %v4216_v50, 0.0 }
 0xae7   : > { %v8524_v10 = vpack.c.bf16 %v4359_v20, %v4355_v35  ;;  %v4362_v8 = vmax.f32 %v4329_v6, 0.0  ;;  %v4394_v35 = vpop.permute.xlu0 %4393 }
 0xae8   : > { %v8540_v49 = vpack.c.bf16 %v4361_v41, %v4357_v19  ;;  %v8522_v25 = vpack.c.bf16 %v4360_v44, %v4356_v1  ;;  %v4399_v44 = vpop.permute.xlu1 %4398 }
 0xae9   : > { %v8538_v28 = vpack.c.bf16 %v4362_v8, %v4358_v59 }
 0xaea   : > { %8523 = vmatprep.subr.bf16.mxu0 %v8522_v25 }
 0xaeb   : > { %8539 = vmatprep.subr.bf16.mxu1 %v8538_v28  ;;  %8525 = vmatpush1.bf16.msra.mxu0 %v8524_v10 }
 0xaec   : > { %8541 = vmatpush1.bf16.msra.mxu1 %v8540_v49 }
 0xaee   : > { %7956 = vmatmul.mubr.msk.f32.vlgmr.msra.gmra.mrb[152].mxu0 %vm984_vm2, %v7940_v31 }
 0xaef   : > { %7964 = vmatmul.mubr.msk.f32.vlgmr.msra.gmra.mrb[152].mxu1 %vm984_vm2, %v7940_v31  ;;  %4515 = vmatprep.mubr.f32.mxu0 %v9007_v5 }
 0xaf0   : > { %4628 = vmatprep.mubr.f32.mxu1 %v9007_v5 }
 0xaf2   : > { %7957 = vmatmul.mubr.msk.f32.gmra.mrb[154].mxu0 %vm984_vm2, %v7941_v34 }
 0xaf3   : > { %7965 = vmatmul.mubr.msk.f32.gmra.mrb[154].mxu1 %vm984_vm2, %v7941_v34  ;;  %4521 = vmatprep.mubr.f32.mxu0 %v9007_v5 }
 0xaf4   : > { %4634 = vmatprep.mubr.f32.mxu1 %v9007_v5 }
 0xaf6   : > { %7958 = vmatmul.mubr.msk.f32.gmra.mrb[156].mxu0 %vm984_vm2, %v7942_v52 }
 0xaf7   : > { %7966 = vmatmul.mubr.msk.f32.gmra.mrb[156].mxu1 %vm984_vm2, %v7942_v52  ;;  %4527 = vmatprep.mubr.f32.mxu0 %v9007_v5 }
 0xaf8   : > { %4640 = vmatprep.mubr.f32.mxu1 %v9007_v5 }
 0xafa   : > { %7959 = vmatmul.mubr.msk.f32.gmra.mrb[158].mxu0 %vm984_vm2, %v7943_v38 }
 0xafb   : > { %7967 = vmatmul.mubr.msk.f32.gmra.mrb[158].mxu1 %vm984_vm2, %v7943_v38  ;;  %4533 = vmatprep.mubr.f32.mxu0 %v9007_v5 }
 0xafc   : > { %4646 = vmatprep.mubr.f32.mxu1 %v9007_v5 }
 0xafe   : > { %7960 = vmatmul.mubr.msk.f32.gmra.mrb[160].mxu0 %vm984_vm2, %v7944_v33 }
 0xaff   : > { %7968 = vmatmul.mubr.msk.f32.gmra.mrb[160].mxu1 %vm984_vm2, %v7944_v33  ;;  %4539 = vmatprep.mubr.f32.mxu0 %v9007_v5 }
 0xb00   : > { %4652 = vmatprep.mubr.f32.mxu1 %v9007_v5 }
 0xb02   : > { %7961 = vmatmul.mubr.msk.f32.gmra.mrb[162].mxu0 %vm984_vm2, %v7945_v13 }
 0xb03   : > { %7969 = vmatmul.mubr.msk.f32.gmra.mrb[162].mxu1 %vm984_vm2, %v7945_v13  ;;  %4545 = vmatprep.mubr.f32.mxu0 %v9007_v5 }
 0xb04   : > { %4658 = vmatprep.mubr.f32.mxu1 %v9007_v5 }
 0xb06   : > { %7962 = vmatmul.mubr.msk.f32.gmra.mrb[164].mxu0 %vm984_vm2, %v7946_v40 }
 0xb07   : > { %7970 = vmatmul.mubr.msk.f32.gmra.mrb[164].mxu1 %vm984_vm2, %v7946_v40  ;;  %4551 = vmatprep.mubr.f32.mxu0 %v9007_v5 }
 0xb08   : > { %4664 = vmatprep.mubr.f32.mxu1 %v9007_v5 }
 0xb0a   : > { %7963 = vmatmul.mubr.msk.f32.gmra.mrb[166].mxu0 %vm984_vm2, %v7947_v42 }
 0xb0b   : > { %7971 = vmatmul.mubr.msk.f32.gmra.mrb[166].mxu1 %vm984_vm2, %v7947_v42  ;;  %4849 = vmatprep.mubr.f32.mxu0 %v9007_v5 }
 0xb0c   : > { %4962 = vmatprep.mubr.f32.mxu1 %v9007_v5 }
 0xbc1   : > { %v4511_v62 = vpop.f32.mrb[152].mxu0 }
 0xbc2   : > { %v4624_v43 = vpop.f32.mrb[152].mxu1  ;;  %v4513_v32 = vpop.f32.mrb[153].mxu0  ;;  %v4512_v45 = vadd.f32 %v4511_v62, %v4384_v47 }
 0xbc3   : > { %v4626_v23 = vpop.f32.mrb[153].mxu1  ;;  %v4625_v51 = vadd.f32 %v4624_v43, %v4384_v47  ;;  %v4514_v53 = vadd.f32 %v4513_v32, %v4384_v47 }
 0xbc4   : > { %v4627_v58 = vadd.f32 %v4626_v23, %v4384_v47  ;;  %v4671_v0 = vmax.f32 %v4512_v45, 0.0 }
 0xbc5   : > { %v4517_v36 = vpop.f32.mrb[154].mxu0  ;;  %v4673_v4 = vmax.f32 %v4625_v51, 0.0  ;;  %v4672_v17 = vmax.f32 %v4514_v53, 0.0 }
 0xbc6   : > { %v4518_v54 = vadd.f32 %v4517_v36, %v4389_v29  ;;  %v4630_v12 = vpop.f32.mrb[154].mxu1  ;;  %v4519_v57 = vpop.f32.mrb[155].mxu0  ;;  %v4674_v27 = vmax.f32 %v4627_v58, 0.0 }
 0xbc7   : > { %v4631_v48 = vadd.f32 %v4630_v12, %v4389_v29  ;;  %v4520_v55 = vadd.f32 %v4519_v57, %v4389_v29  ;;  %v4632_v2 = vpop.f32.mrb[155].mxu1  ;;  %v4404_v36 = vpop.permute.xlu0 %4403 }
 0xbc8   : > { %v4675_v3 = vmax.f32 %v4518_v54, 0.0  ;;  %v4633_v9 = vadd.f32 %v4632_v2, %v4389_v29 }
 0xbc9   : > { %v4677_v15 = vmax.f32 %v4631_v48, 0.0  ;;  %v4676_v18 = vmax.f32 %v4520_v55, 0.0  ;;  %v4523_v26 = vpop.f32.mrb[156].mxu0  ;;  %v4409_v55 = vpop.permute.xlu1 %4408 }
 0xbca   : > { %v8544_v11 = vpack.c.bf16 %v4675_v3, %v4671_v0  ;;  %v4678_v39 = vmax.f32 %v4633_v9, 0.0  ;;  %v4636_v50 = vpop.f32.mrb[156].mxu1  ;;  %v4525_v61 = vpop.f32.mrb[157].mxu0  ;;  %v4524_v41 = vadd.f32 %v4523_v26, %v4394_v35 }
 0xbcb   : > { %v8560_v20 = vpack.c.bf16 %v4677_v15, %v4673_v4  ;;  %v8542_v6 = vpack.c.bf16 %v4676_v18, %v4672_v17  ;;  %v4638_v19 = vpop.f32.mrb[157].mxu1  ;;  %v4637_v59 = vadd.f32 %v4636_v50, %v4394_v35  ;;  %v4526_v10 = vadd.f32 %v4525_v61, %v4394_v35 }
 0xbcc   : > { %v8558_v1 = vpack.c.bf16 %v4678_v39, %v4674_v27  ;;  %v4639_v49 = vadd.f32 %v4638_v19, %v4394_v35  ;;  %v4679_v33 = vmax.f32 %v4524_v41, 0.0 }
 0xbcd   : > { %v4529_v8 = vpop.f32.mrb[158].mxu0  ;;  %8543 = vmatprep.subr.bf16.mxu0 %v8542_v6  ;;  %v4681_v42 = vmax.f32 %v4637_v59, 0.0  ;;  %v4680_v62 = vmax.f32 %v4526_v10, 0.0 }
 0xbce   : > { %v4530_v25 = vadd.f32 %v4529_v8, %v4399_v44  ;;  %v4642_v28 = vpop.f32.mrb[158].mxu1  ;;  %8559 = vmatprep.subr.bf16.mxu1 %v8558_v1  ;;  %v4531_v31 = vpop.f32.mrb[159].mxu0  ;;  %8545 = vmatpush1.bf16.msra.mxu0 %v8544_v11  ;;  %v4682_v23 = vmax.f32 %v4639_v49, 0.0 }
 0xbcf   : > { %v4643_v34 = vadd.f32 %v4642_v28, %v4399_v44  ;;  %v4532_v52 = vadd.f32 %v4531_v31, %v4399_v44  ;;  %v4644_v38 = vpop.f32.mrb[159].mxu1  ;;  %8561 = vmatpush1.bf16.msra.mxu1 %v8560_v20  ;;  %v4414_v8 = vpop.permute.xlu0 %4413 }
 0xbd0   : > { %v4683_v13 = vmax.f32 %v4530_v25, 0.0  ;;  %v4645_v40 = vadd.f32 %v4644_v38, %v4399_v44 }
 0xbd1   : > { %v4685_v43 = vmax.f32 %v4643_v34, 0.0  ;;  %v4684_v32 = vmax.f32 %v4532_v52, 0.0  ;;  %v4535_v47 = vpop.f32.mrb[160].mxu0  ;;  %v4419_v52 = vpop.permute.xlu1 %4418 }
 0xbd2   : > { %v8548_v45 = vpack.c.bf16 %v4683_v13, %v4679_v33  ;;  %v4686_v29 = vmax.f32 %v4645_v40, 0.0  ;;  %v4648_v51 = vpop.f32.mrb[160].mxu1  ;;  %v4537_v53 = vpop.f32.mrb[161].mxu0  ;;  %v4536_v48 = vadd.f32 %v4535_v47, %v4404_v36 }
 0xbd3   : > { %v8564_v58 = vpack.c.bf16 %v4685_v43, %v4681_v42  ;;  %v8546_v54 = vpack.c.bf16 %v4684_v32, %v4680_v62  ;;  %v4650_v12 = vpop.f32.mrb[161].mxu1  ;;  %v4649_v2 = vadd.f32 %v4648_v51, %v4404_v36  ;;  %v4538_v0 = vadd.f32 %v4537_v53, %v4404_v36 }
 0xbd4   : > { %v8562_v57 = vpack.c.bf16 %v4686_v29, %v4682_v23  ;;  %v4651_v9 = vadd.f32 %v4650_v12, %v4404_v36  ;;  %v4687_v11 = vmax.f32 %v4536_v48, 0.0 }
 0xbd5   : > { %v4541_v3 = vpop.f32.mrb[162].mxu0  ;;  %8547 = vmatprep.subr.bf16.mxu0 %v8546_v54  ;;  %v4689_v61 = vmax.f32 %v4649_v2, 0.0  ;;  %v4688_v35 = vmax.f32 %v4538_v0, 0.0 }
 0xbd6   : > { %v4542_v4 = vadd.f32 %v4541_v3, %v4409_v55  ;;  %v4654_v17 = vpop.f32.mrb[162].mxu1  ;;  %8563 = vmatprep.subr.bf16.mxu1 %v8562_v57  ;;  %v4543_v15 = vpop.f32.mrb[163].mxu0  ;;  %8549 = vmatpush1.bf16.msra.mxu0 %v8548_v45  ;;  %v4690_v1 = vmax.f32 %v4651_v9, 0.0  ;;  %v7972_v3 = vld [vmem:[%s11034_s6 + $0x80] sm:$0xff]  ;;  %v7973_v9 = vld [vmem:[%s11034_s6 + $0x88] sm:$0xff] }
 0xbd7   : > { %v4655_v18 = vadd.f32 %v4654_v17, %v4409_v55  ;;  %v4544_v26 = vadd.f32 %v4543_v15, %v4409_v55  ;;  %v4656_v27 = vpop.f32.mrb[163].mxu1  ;;  %8565 = vmatpush1.bf16.msra.mxu1 %v8564_v58  ;;  %v7975_v17 = vld [vmem:[%s11034_s6 + $0x98] sm:$0xff]  ;;  %v7976_v15 = vld [vmem:[%s11034_s6 + $0xa0] sm:$0xff] }
 0xbd8   : > { %v4691_v39 = vmax.f32 %v4542_v4, 0.0  ;;  %v4657_v50 = vadd.f32 %v4656_v27, %v4409_v55  ;;  %v7974_v4 = vld [vmem:[%s11034_s6 + $0x90] sm:$0xff]  ;;  %v7979_v27 = vld [vmem:[%s11034_s6 + $0xb8] sm:$0xff] }
 0xbd9   : > { %v4693_v20 = vmax.f32 %v4655_v18, 0.0  ;;  %v4692_v6 = vmax.f32 %v4544_v26, 0.0  ;;  %v4547_v19 = vpop.f32.mrb[164].mxu0  ;;  %v7977_v18 = vld [vmem:[%s11034_s6 + $0xa8] sm:$0xff]  ;;  %v7978_v26 = vld [vmem:[%s11034_s6 + $0xb0] sm:$0xff] }
 0xbda   : > { %v8552_v41 = vpack.c.bf16 %v4691_v39, %v4687_v11  ;;  %v4694_v44 = vmax.f32 %v4657_v50, 0.0  ;;  %v4660_v59 = vpop.f32.mrb[164].mxu1  ;;  %v4549_v10 = vpop.f32.mrb[165].mxu0  ;;  %v4548_v34 = vadd.f32 %v4547_v19, %v4414_v8 }
 0xbdb   : > { %v8568_v49 = vpack.c.bf16 %v4693_v20, %v4689_v61  ;;  %v8550_v25 = vpack.c.bf16 %v4692_v6, %v4688_v35  ;;  %v4662_v28 = vpop.f32.mrb[165].mxu1  ;;  %v4661_v38 = vadd.f32 %v4660_v59, %v4414_v8  ;;  %v4550_v33 = vadd.f32 %v4549_v10, %v4414_v8  ;;  %v4724_v61 = vpop.permute.xlu0 %4723 }
 0xbdc   : > { %v8566_v31 = vpack.c.bf16 %v4694_v44, %v4690_v1  ;;  %v4663_v40 = vadd.f32 %v4662_v28, %v4414_v8  ;;  %v4695_v45 = vmax.f32 %v4548_v34, 0.0  ;;  %v4729_v6 = vpop.permute.xlu1 %4728 }
 0xbdd   : > { %v4553_v13 = vpop.f32.mrb[166].mxu0  ;;  %8551 = vmatprep.subr.bf16.mxu0 %v8550_v25  ;;  %v4697_v53 = vmax.f32 %v4661_v38, 0.0  ;;  %v4696_v36 = vmax.f32 %v4550_v33, 0.0 }
 0xbde   : > { %v4554_v42 = vadd.f32 %v4553_v13, %v4419_v52  ;;  %v4666_v62 = vpop.f32.mrb[166].mxu1  ;;  %8567 = vmatprep.subr.bf16.mxu1 %v8566_v31  ;;  %v4555_v43 = vpop.f32.mrb[167].mxu0  ;;  %8553 = vmatpush1.bf16.msra.mxu0 %v8552_v41  ;;  %v4698_v12 = vmax.f32 %v4663_v40, 0.0 }
 0xbdf   : > { %v4667_v32 = vadd.f32 %v4666_v62, %v4419_v52  ;;  %v4556_v47 = vadd.f32 %v4555_v43, %v4419_v52  ;;  %v4668_v23 = vpop.f32.mrb[167].mxu1  ;;  %8569 = vmatpush1.bf16.msra.mxu1 %v8568_v49 }
 0xbe0   : > { %v4699_v29 = vmax.f32 %v4554_v42, 0.0  ;;  %v4669_v51 = vadd.f32 %v4668_v23, %v4419_v52 }
 0xbe1   : > { %v4701_v58 = vmax.f32 %v4667_v32, 0.0  ;;  %v4700_v54 = vmax.f32 %v4556_v47, 0.0 }
 0xbe2   : > { %v8556_v57 = vpack.c.bf16 %v4699_v29, %v4695_v45  ;;  %v4702_v48 = vmax.f32 %v4669_v51, 0.0  ;;  %v4734_v45 = vpop.permute.xlu0 %4733 }
 0xbe3   : > { %v8572_v55 = vpack.c.bf16 %v4701_v58, %v4697_v53  ;;  %v8554_v2 = vpack.c.bf16 %v4700_v54, %v4696_v36  ;;  %v4739_v54 = vpop.permute.xlu1 %4738 }
 0xbe4   : > { %v8570_v0 = vpack.c.bf16 %v4702_v48, %v4698_v12 }
 0xbe5   : > { %8555 = vmatprep.subr.bf16.mxu0 %v8554_v2 }
 0xbe6   : > { %8571 = vmatprep.subr.bf16.mxu1 %v8570_v0  ;;  %8557 = vmatpush1.bf16.msra.mxu0 %v8556_v57 }
 0xbe7   : > { %8573 = vmatpush1.bf16.msra.mxu1 %v8572_v55 }
 0xbe9   : > { %7988 = vmatmul.mubr.msk.f32.vlgmr.msra.gmra.mrb[168].mxu0 %vm984_vm2, %v7972_v3 }
 0xbea   : > { %7996 = vmatmul.mubr.msk.f32.vlgmr.msra.gmra.mrb[168].mxu1 %vm984_vm2, %v7972_v3  ;;  %4855 = vmatprep.mubr.f32.mxu0 %v9007_v5 }
 0xbeb   : > { %4968 = vmatprep.mubr.f32.mxu1 %v9007_v5 }
 0xbed   : > { %7989 = vmatmul.mubr.msk.f32.gmra.mrb[170].mxu0 %vm984_vm2, %v7973_v9 }
 0xbee   : > { %7997 = vmatmul.mubr.msk.f32.gmra.mrb[170].mxu1 %vm984_vm2, %v7973_v9  ;;  %4861 = vmatprep.mubr.f32.mxu0 %v9007_v5 }
 0xbef   : > { %4974 = vmatprep.mubr.f32.mxu1 %v9007_v5 }
 0xbf1   : > { %7990 = vmatmul.mubr.msk.f32.gmra.mrb[172].mxu0 %vm984_vm2, %v7974_v4 }
 0xbf2   : > { %7998 = vmatmul.mubr.msk.f32.gmra.mrb[172].mxu1 %vm984_vm2, %v7974_v4  ;;  %4867 = vmatprep.mubr.f32.mxu0 %v9007_v5 }
 0xbf3   : > { %4980 = vmatprep.mubr.f32.mxu1 %v9007_v5 }
 0xbf5   : > { %7991 = vmatmul.mubr.msk.f32.gmra.mrb[174].mxu0 %vm984_vm2, %v7975_v17 }
 0xbf6   : > { %7999 = vmatmul.mubr.msk.f32.gmra.mrb[174].mxu1 %vm984_vm2, %v7975_v17  ;;  %4873 = vmatprep.mubr.f32.mxu0 %v9007_v5 }
 0xbf7   : > { %4986 = vmatprep.mubr.f32.mxu1 %v9007_v5 }
 0xbf9   : > { %7992 = vmatmul.mubr.msk.f32.gmra.mrb[176].mxu0 %vm984_vm2, %v7976_v15 }
 0xbfa   : > { %8000 = vmatmul.mubr.msk.f32.gmra.mrb[176].mxu1 %vm984_vm2, %v7976_v15  ;;  %4879 = vmatprep.mubr.f32.mxu0 %v9007_v5 }
 0xbfb   : > { %4992 = vmatprep.mubr.f32.mxu1 %v9007_v5 }
 0xbfd   : > { %7993 = vmatmul.mubr.msk.f32.gmra.mrb[178].mxu0 %vm984_vm2, %v7977_v18 }
 0xbfe   : > { %8001 = vmatmul.mubr.msk.f32.gmra.mrb[178].mxu1 %vm984_vm2, %v7977_v18  ;;  %4885 = vmatprep.mubr.f32.mxu0 %v9007_v5 }
 0xbff   : > { %4998 = vmatprep.mubr.f32.mxu1 %v9007_v5 }
 0xc01   : > { %7994 = vmatmul.mubr.msk.f32.gmra.mrb[180].mxu0 %vm984_vm2, %v7978_v26 }
 0xc02   : > { %8002 = vmatmul.mubr.msk.f32.gmra.mrb[180].mxu1 %vm984_vm2, %v7978_v26  ;;  %4891 = vmatprep.mubr.f32.mxu0 %v9007_v5 }
 0xc03   : > { %5004 = vmatprep.mubr.f32.mxu1 %v9007_v5 }
 0xc05   : > { %7995 = vmatmul.mubr.msk.f32.gmra.mrb[182].mxu0 %vm984_vm2, %v7979_v27 }
 0xc06   : > { %8003 = vmatmul.mubr.msk.f32.gmra.mrb[182].mxu1 %vm984_vm2, %v7979_v27  ;;  %5189 = vmatprep.mubr.f32.mxu0 %v9007_v5 }
 0xc07   : > { %5302 = vmatprep.mubr.f32.mxu1 %v9007_v5 }
 0xcbc   : > { %v4851_v11 = vpop.f32.mrb[168].mxu0 }
 0xcbd   : > { %v4964_v39 = vpop.f32.mrb[168].mxu1  ;;  %v4853_v50 = vpop.f32.mrb[169].mxu0  ;;  %v4852_v20 = vadd.f32 %v4851_v11, %v4724_v61 }
 0xcbe   : > { %v4966_v35 = vpop.f32.mrb[169].mxu1  ;;  %v4965_v19 = vadd.f32 %v4964_v39, %v4724_v61  ;;  %v4854_v1 = vadd.f32 %v4853_v50, %v4724_v61 }
 0xcbf   : > { %v4967_v44 = vadd.f32 %v4966_v35, %v4724_v61  ;;  %v5011_v31 = vmax.f32 %v4852_v20, 0.0 }
 0xcc0   : > { %v4857_v41 = vpop.f32.mrb[170].mxu0  ;;  %v5013_v38 = vmax.f32 %v4965_v19, 0.0  ;;  %v5012_v33 = vmax.f32 %v4854_v1, 0.0 }
 0xcc1   : > { %v4858_v59 = vadd.f32 %v4857_v41, %v4729_v6  ;;  %v4970_v10 = vpop.f32.mrb[170].mxu1  ;;  %v4859_v8 = vpop.f32.mrb[171].mxu0  ;;  %v5014_v62 = vmax.f32 %v4967_v44, 0.0 }
 0xcc2   : > { %v4971_v49 = vadd.f32 %v4970_v10, %v4729_v6  ;;  %v4860_v25 = vadd.f32 %v4859_v8, %v4729_v6  ;;  %v4972_v28 = vpop.f32.mrb[171].mxu1  ;;  %v4744_v41 = vpop.permute.xlu0 %4743 }
 0xcc3   : > { %v5015_v34 = vmax.f32 %v4858_v59, 0.0  ;;  %v4973_v52 = vadd.f32 %v4972_v28, %v4729_v6 }
 0xcc4   : > { %v5017_v13 = vmax.f32 %v4971_v49, 0.0  ;;  %v5016_v40 = vmax.f32 %v4860_v25, 0.0  ;;  %v4863_v42 = vpop.f32.mrb[172].mxu0  ;;  %v4749_v25 = vpop.permute.xlu1 %4748 }
 0xcc5   : > { %v8576_v43 = vpack.c.bf16 %v5015_v34, %v5011_v31  ;;  %v5018_v32 = vmax.f32 %v4973_v52, 0.0  ;;  %v4976_v47 = vpop.f32.mrb[172].mxu1  ;;  %v4865_v23 = vpop.f32.mrb[173].mxu0  ;;  %v4864_v58 = vadd.f32 %v4863_v42, %v4734_v45 }
 0xcc6   : > { %v8592_v29 = vpack.c.bf16 %v5017_v13, %v5013_v38  ;;  %v8574_v51 = vpack.c.bf16 %v5016_v40, %v5012_v33  ;;  %v4978_v53 = vpop.f32.mrb[173].mxu1  ;;  %v4977_v12 = vadd.f32 %v4976_v47, %v4734_v45  ;;  %v4866_v57 = vadd.f32 %v4865_v23, %v4734_v45 }
 0xcc7   : > { %v8590_v36 = vpack.c.bf16 %v5018_v32, %v5014_v62  ;;  %v4979_v55 = vadd.f32 %v4978_v53, %v4734_v45  ;;  %v5019_v15 = vmax.f32 %v4864_v58, 0.0 }
 0xcc8   : > { %v4869_v48 = vpop.f32.mrb[174].mxu0  ;;  %8575 = vmatprep.subr.bf16.mxu0 %v8574_v51  ;;  %v5021_v27 = vmax.f32 %v4977_v12, 0.0  ;;  %v5020_v11 = vmax.f32 %v4866_v57, 0.0 }
 0xcc9   : > { %v4870_v2 = vadd.f32 %v4869_v48, %v4739_v54  ;;  %v4982_v0 = vpop.f32.mrb[174].mxu1  ;;  %8591 = vmatprep.subr.bf16.mxu1 %v8590_v36  ;;  %v4871_v3 = vpop.f32.mrb[175].mxu0  ;;  %8577 = vmatpush1.bf16.msra.mxu0 %v8576_v43  ;;  %v5022_v35 = vmax.f32 %v4979_v55, 0.0 }
 0xcca   : > { %v4983_v9 = vadd.f32 %v4982_v0, %v4739_v54  ;;  %v4872_v4 = vadd.f32 %v4871_v3, %v4739_v54  ;;  %v4984_v17 = vpop.f32.mrb[175].mxu1  ;;  %8593 = vmatpush1.bf16.msra.mxu1 %v8592_v29  ;;  %v4754_v48 = vpop.permute.xlu0 %4753 }
 0xccb   : > { %v5023_v18 = vmax.f32 %v4870_v2, 0.0  ;;  %v4985_v26 = vadd.f32 %v4984_v17, %v4739_v54 }
 0xccc   : > { %v5025_v39 = vmax.f32 %v4983_v9, 0.0  ;;  %v5024_v50 = vmax.f32 %v4872_v4, 0.0  ;;  %v4875_v61 = vpop.f32.mrb[176].mxu0  ;;  %v4759_v4 = vpop.permute.xlu1 %4758 }
 0xccd   : > { %v8580_v20 = vpack.c.bf16 %v5023_v18, %v5019_v15  ;;  %v5026_v6 = vmax.f32 %v4985_v26, 0.0  ;;  %v4988_v19 = vpop.f32.mrb[176].mxu1  ;;  %v4877_v1 = vpop.f32.mrb[177].mxu0  ;;  %v4876_v49 = vadd.f32 %v4875_v61, %v4744_v41 }
 0xcce   : > { %v8596_v44 = vpack.c.bf16 %v5025_v39, %v5021_v27  ;;  %v8578_v59 = vpack.c.bf16 %v5024_v50, %v5020_v11  ;;  %v4990_v10 = vpop.f32.mrb[177].mxu1  ;;  %v4989_v28 = vadd.f32 %v4988_v19, %v4744_v41  ;;  %v4878_v31 = vadd.f32 %v4877_v1, %v4744_v41 }
 0xccf   : > { %v8594_v8 = vpack.c.bf16 %v5026_v6, %v5022_v35  ;;  %v4991_v52 = vadd.f32 %v4990_v10, %v4744_v41  ;;  %v5027_v43 = vmax.f32 %v4876_v49, 0.0 }
 0xcd0   : > { %v4881_v34 = vpop.f32.mrb[178].mxu0  ;;  %8579 = vmatprep.subr.bf16.mxu0 %v8578_v59  ;;  %v5029_v23 = vmax.f32 %v4989_v28, 0.0  ;;  %v5028_v45 = vmax.f32 %v4878_v31, 0.0 }
 0xcd1   : > { %v4882_v38 = vadd.f32 %v4881_v34, %v4749_v25  ;;  %v4994_v33 = vpop.f32.mrb[178].mxu1  ;;  %8595 = vmatprep.subr.bf16.mxu1 %v8594_v8  ;;  %v4883_v13 = vpop.f32.mrb[179].mxu0  ;;  %8581 = vmatpush1.bf16.msra.mxu0 %v8580_v20  ;;  %v5030_v36 = vmax.f32 %v4991_v52, 0.0  ;;  %v8004_v34 = vld [vmem:[%s11036_s8 + $0x80] sm:$0xff]  ;;  %v8005_v52 = vld [vmem:[%s11036_s8 + $0x88] sm:$0xff] }
 0xcd2   : > { %v4995_v40 = vadd.f32 %v4994_v33, %v4749_v25  ;;  %v4884_v42 = vadd.f32 %v4883_v13, %v4749_v25  ;;  %v4996_v62 = vpop.f32.mrb[179].mxu1  ;;  %8597 = vmatpush1.bf16.msra.mxu1 %v8596_v44  ;;  %v8007_v33 = vld [vmem:[%s11036_s8 + $0x98] sm:$0xff]  ;;  %v8008_v13 = vld [vmem:[%s11036_s8 + $0xa0] sm:$0xff] }
 0xcd3   : > { %v5031_v32 = vmax.f32 %v4882_v38, 0.0  ;;  %v4997_v47 = vadd.f32 %v4996_v62, %v4749_v25  ;;  %v8006_v38 = vld [vmem:[%s11036_s8 + $0x90] sm:$0xff]  ;;  %v8011_v62 = vld [vmem:[%s11036_s8 + $0xb8] sm:$0xff] }
 0xcd4   : > { %v5033_v29 = vmax.f32 %v4995_v40, 0.0  ;;  %v5032_v51 = vmax.f32 %v4884_v42, 0.0  ;;  %v4887_v53 = vpop.f32.mrb[180].mxu0  ;;  %v8009_v40 = vld [vmem:[%s11036_s8 + $0xa8] sm:$0xff]  ;;  %v8010_v42 = vld [vmem:[%s11036_s8 + $0xb0] sm:$0xff] }
 0xcd5   : > { %v8584_v58 = vpack.c.bf16 %v5031_v32, %v5027_v43  ;;  %v5034_v54 = vmax.f32 %v4997_v47, 0.0  ;;  %v5000_v12 = vpop.f32.mrb[180].mxu1  ;;  %v4889_v57 = vpop.f32.mrb[181].mxu0  ;;  %v4888_v9 = vadd.f32 %v4887_v53, %v4754_v48 }
 0xcd6   : > { %v8600_v55 = vpack.c.bf16 %v5033_v29, %v5029_v23  ;;  %v8582_v2 = vpack.c.bf16 %v5032_v51, %v5028_v45  ;;  %v5002_v0 = vpop.f32.mrb[181].mxu1  ;;  %v5001_v17 = vadd.f32 %v5000_v12, %v4754_v48  ;;  %v4890_v15 = vadd.f32 %v4889_v57, %v4754_v48  ;;  %v5064_v23 = vpop.permute.xlu0 %5063 }
 0xcd7   : > { %v8598_v3 = vpack.c.bf16 %v5034_v54, %v5030_v36  ;;  %v5003_v26 = vadd.f32 %v5002_v0, %v4754_v48  ;;  %v5035_v20 = vmax.f32 %v4888_v9, 0.0  ;;  %v5069_v51 = vpop.permute.xlu1 %5068 }
 0xcd8   : > { %v4893_v18 = vpop.f32.mrb[182].mxu0  ;;  %8583 = vmatprep.subr.bf16.mxu0 %v8582_v2  ;;  %v5037_v1 = vmax.f32 %v5001_v17, 0.0  ;;  %v5036_v41 = vmax.f32 %v4890_v15, 0.0 }
 0xcd9   : > { %v4894_v27 = vadd.f32 %v4893_v18, %v4759_v4  ;;  %v5006_v11 = vpop.f32.mrb[182].mxu1  ;;  %8599 = vmatprep.subr.bf16.mxu1 %v8598_v3  ;;  %v4895_v39 = vpop.f32.mrb[183].mxu0  ;;  %8585 = vmatpush1.bf16.msra.mxu0 %v8584_v58  ;;  %v5038_v10 = vmax.f32 %v5003_v26, 0.0 }
 0xcda   : > { %v5007_v50 = vadd.f32 %v5006_v11, %v4759_v4  ;;  %v4896_v61 = vadd.f32 %v4895_v39, %v4759_v4  ;;  %v5008_v35 = vpop.f32.mrb[183].mxu1  ;;  %8601 = vmatpush1.bf16.msra.mxu1 %v8600_v55 }
 0xcdb   : > { %v5039_v6 = vmax.f32 %v4894_v27, 0.0  ;;  %v5009_v19 = vadd.f32 %v5008_v35, %v4759_v4 }
 0xcdc   : > { %v5041_v44 = vmax.f32 %v5007_v50, 0.0  ;;  %v5040_v59 = vmax.f32 %v4896_v61, 0.0 }
 0xcdd   : > { %v8588_v8 = vpack.c.bf16 %v5039_v6, %v5035_v20  ;;  %v5042_v49 = vmax.f32 %v5009_v19, 0.0  ;;  %v5074_v20 = vpop.permute.xlu0 %5073 }
 0xcde   : > { %v8604_v25 = vpack.c.bf16 %v5041_v44, %v5037_v1  ;;  %v8586_v28 = vpack.c.bf16 %v5040_v59, %v5036_v41  ;;  %v5079_v59 = vpop.permute.xlu1 %5078 }
 0xcdf   : > { %v8602_v31 = vpack.c.bf16 %v5042_v49, %v5038_v10 }
 0xce0   : > { %8587 = vmatprep.subr.bf16.mxu0 %v8586_v28 }
 0xce1   : > { %8603 = vmatprep.subr.bf16.mxu1 %v8602_v31  ;;  %8589 = vmatpush1.bf16.msra.mxu0 %v8588_v8 }
 0xce2   : > { %8605 = vmatpush1.bf16.msra.mxu1 %v8604_v25 }
 0xce4   : > { %8020 = vmatmul.mubr.msk.f32.vlgmr.msra.gmra.mrb[184].mxu0 %vm984_vm2, %v8004_v34 }
 0xce5   : > { %8028 = vmatmul.mubr.msk.f32.vlgmr.msra.gmra.mrb[184].mxu1 %vm984_vm2, %v8004_v34  ;;  %5195 = vmatprep.mubr.f32.mxu0 %v9007_v5 }
 0xce6   : > { %5308 = vmatprep.mubr.f32.mxu1 %v9007_v5 }
 0xce8   : > { %8021 = vmatmul.mubr.msk.f32.gmra.mrb[186].mxu0 %vm984_vm2, %v8005_v52 }
 0xce9   : > { %8029 = vmatmul.mubr.msk.f32.gmra.mrb[186].mxu1 %vm984_vm2, %v8005_v52  ;;  %5201 = vmatprep.mubr.f32.mxu0 %v9007_v5 }
 0xcea   : > { %5314 = vmatprep.mubr.f32.mxu1 %v9007_v5 }
 0xcec   : > { %8022 = vmatmul.mubr.msk.f32.gmra.mrb[188].mxu0 %vm984_vm2, %v8006_v38 }
 0xced   : > { %8030 = vmatmul.mubr.msk.f32.gmra.mrb[188].mxu1 %vm984_vm2, %v8006_v38  ;;  %5207 = vmatprep.mubr.f32.mxu0 %v9007_v5 }
 0xcee   : > { %5320 = vmatprep.mubr.f32.mxu1 %v9007_v5 }
 0xcf0   : > { %8023 = vmatmul.mubr.msk.f32.gmra.mrb[190].mxu0 %vm984_vm2, %v8007_v33 }
 0xcf1   : > { %8031 = vmatmul.mubr.msk.f32.gmra.mrb[190].mxu1 %vm984_vm2, %v8007_v33  ;;  %5213 = vmatprep.mubr.f32.mxu0 %v9007_v5 }
 0xcf2   : > { %5326 = vmatprep.mubr.f32.mxu1 %v9007_v5 }
 0xcf4   : > { %8024 = vmatmul.mubr.msk.f32.gmra.mrb[192].mxu0 %vm984_vm2, %v8008_v13 }
 0xcf5   : > { %8032 = vmatmul.mubr.msk.f32.gmra.mrb[192].mxu1 %vm984_vm2, %v8008_v13  ;;  %5219 = vmatprep.mubr.f32.mxu0 %v9007_v5 }
 0xcf6   : > { %5332 = vmatprep.mubr.f32.mxu1 %v9007_v5 }
 0xcf8   : > { %8025 = vmatmul.mubr.msk.f32.gmra.mrb[194].mxu0 %vm984_vm2, %v8009_v40 }
 0xcf9   : > { %8033 = vmatmul.mubr.msk.f32.gmra.mrb[194].mxu1 %vm984_vm2, %v8009_v40  ;;  %5225 = vmatprep.mubr.f32.mxu0 %v9007_v5 }
 0xcfa   : > { %5338 = vmatprep.mubr.f32.mxu1 %v9007_v5 }
 0xcfc   : > { %8026 = vmatmul.mubr.msk.f32.gmra.mrb[196].mxu0 %vm984_vm2, %v8010_v42 }
 0xcfd   : > { %8034 = vmatmul.mubr.msk.f32.gmra.mrb[196].mxu1 %vm984_vm2, %v8010_v42  ;;  %5231 = vmatprep.mubr.f32.mxu0 %v9007_v5 }
 0xcfe   : > { %5344 = vmatprep.mubr.f32.mxu1 %v9007_v5 }
 0xd00   : > { %8027 = vmatmul.mubr.msk.f32.gmra.mrb[198].mxu0 %vm984_vm2, %v8011_v62 }
 0xd01   : > { %8035 = vmatmul.mubr.msk.f32.gmra.mrb[198].mxu1 %vm984_vm2, %v8011_v62  ;;  %5459 = vmatprep.mubr.f32.mxu0 %v9007_v5 }
 0xd02   : > { %5530 = vmatprep.mubr.f32.mxu1 %v9007_v5 }
 0xdb7   : > { %v5191_v43 = vpop.f32.mrb[184].mxu0 }
 0xdb8   : > { %v5304_v32 = vpop.f32.mrb[184].mxu1  ;;  %v5193_v47 = vpop.f32.mrb[185].mxu0  ;;  %v5192_v29 = vadd.f32 %v5191_v43, %v5064_v23 }
 0xdb9   : > { %v5306_v45 = vpop.f32.mrb[185].mxu1  ;;  %v5305_v53 = vadd.f32 %v5304_v32, %v5064_v23  ;;  %v5194_v36 = vadd.f32 %v5193_v47, %v5064_v23 }
 0xdba   : > { %v5307_v54 = vadd.f32 %v5306_v45, %v5064_v23  ;;  %v5351_v3 = vmax.f32 %v5192_v29, 0.0 }
 0xdbb   : > { %v5197_v58 = vpop.f32.mrb[186].mxu0  ;;  %v5353_v17 = vmax.f32 %v5305_v53, 0.0  ;;  %v5352_v15 = vmax.f32 %v5194_v36, 0.0 }
 0xdbc   : > { %v5198_v12 = vadd.f32 %v5197_v58, %v5069_v51  ;;  %v5310_v57 = vpop.f32.mrb[186].mxu1  ;;  %v5199_v48 = vpop.f32.mrb[187].mxu0  ;;  %v5354_v11 = vmax.f32 %v5307_v54, 0.0 }
 0xdbd   : > { %v5311_v55 = vadd.f32 %v5310_v57, %v5069_v51  ;;  %v5200_v2 = vadd.f32 %v5199_v48, %v5069_v51  ;;  %v5312_v0 = vpop.f32.mrb[187].mxu1  ;;  %v5084_v58 = vpop.permute.xlu0 %5083 }
 0xdbe   : > { %v5355_v9 = vmax.f32 %v5198_v12, 0.0  ;;  %v5313_v4 = vadd.f32 %v5312_v0, %v5069_v51 }
 0xdbf   : > { %v5357_v18 = vmax.f32 %v5311_v55, 0.0  ;;  %v5356_v26 = vmax.f32 %v5200_v2, 0.0  ;;  %v5203_v27 = vpop.f32.mrb[188].mxu0  ;;  %v5089_v2 = vpop.permute.xlu1 %5088 }
 0xdc0   : > { %v10618_v39 = vpack.c.bf16 %v5355_v9, %v5351_v3  ;;  %v5358_v50 = vmax.f32 %v5313_v4, 0.0  ;;  %v5316_v61 = vpop.f32.mrb[188].mxu1  ;;  %v5205_v35 = vpop.f32.mrb[189].mxu0  ;;  %v5204_v44 = vadd.f32 %v5203_v27, %v5074_v20 }
 0xdc1   : > { %v10620_v6 = vpack.c.bf16 %v5357_v18, %v5353_v17  ;;  %v10622_v19 = vpack.c.bf16 %v5356_v26, %v5352_v15  ;;  %v5318_v1 = vpop.f32.mrb[189].mxu1  ;;  %v5317_v10 = vadd.f32 %v5316_v61, %v5074_v20  ;;  %v5206_v8 = vadd.f32 %v5205_v35, %v5074_v20 }
 0xdc2   : > { %v10624_v41 = vpack.c.bf16 %v5358_v50, %v5354_v11  ;;  %v5319_v25 = vadd.f32 %v5318_v1, %v5074_v20  ;;  %v5359_v13 = vmax.f32 %v5204_v44, 0.0 }
 0xdc3   : > { %v5209_v49 = vpop.f32.mrb[190].mxu0  ;;  %8607 = vmatprep.subr.bf16.mxu0 %v10622_v19  ;;  %v5361_v62 = vmax.f32 %v5317_v10, 0.0  ;;  %v5360_v43 = vmax.f32 %v5206_v8, 0.0 }
 0xdc4   : > { %v5210_v28 = vadd.f32 %v5209_v49, %v5079_v59  ;;  %v5322_v31 = vpop.f32.mrb[190].mxu1  ;;  %8623 = vmatprep.subr.bf16.mxu1 %v10624_v41  ;;  %v5211_v34 = vpop.f32.mrb[191].mxu0  ;;  %8609 = vmatpush1.bf16.msra.mxu0 %v10618_v39  ;;  %v5362_v45 = vmax.f32 %v5319_v25, 0.0 }
 0xdc5   : > { %v5323_v52 = vadd.f32 %v5322_v31, %v5079_v59  ;;  %v5212_v38 = vadd.f32 %v5211_v34, %v5079_v59  ;;  %v5324_v33 = vpop.f32.mrb[191].mxu1  ;;  %8625 = vmatpush1.bf16.msra.mxu1 %v10620_v6  ;;  %v5094_v34 = vpop.permute.xlu0 %5093 }
 0xdc6   : > { %v5363_v40 = vmax.f32 %v5210_v28, 0.0  ;;  %v5325_v42 = vadd.f32 %v5324_v33, %v5079_v59 }
 0xdc7   : > { %v5365_v32 = vmax.f32 %v5323_v52, 0.0  ;;  %v5364_v47 = vmax.f32 %v5212_v38, 0.0  ;;  %v5215_v23 = vpop.f32.mrb[192].mxu0 }
 0xdc8   : > { %v10630_v29 = vpack.c.bf16 %v5363_v40, %v5359_v13  ;;  %v5366_v51 = vmax.f32 %v5325_v42, 0.0  ;;  %v5328_v53 = vpop.f32.mrb[192].mxu1  ;;  %v5217_v36 = vpop.f32.mrb[193].mxu0  ;;  %v5216_v55 = vadd.f32 %v5215_v23, %v5084_v58 }
 0xdc9   : > { %v10632_v54 = vpack.c.bf16 %v5365_v32, %v5361_v62  ;;  %v10634_v12 = vpack.c.bf16 %v5364_v47, %v5360_v43  ;;  %v5330_v57 = vpop.f32.mrb[193].mxu1  ;;  %v5329_v0 = vadd.f32 %v5328_v53, %v5084_v58  ;;  %v5218_v3 = vadd.f32 %v5217_v36, %v5084_v58  ;;  %v5099_v42 = vpop.permute.xlu1 %5098 }
 0xdca   : > { %v10636_v48 = vpack.c.bf16 %v5366_v51, %v5362_v45  ;;  %v5331_v4 = vadd.f32 %v5330_v57, %v5084_v58  ;;  %v5367_v50 = vmax.f32 %v5216_v55, 0.0 }
 0xdcb   : > { %v5221_v9 = vpop.f32.mrb[194].mxu0  ;;  %8611 = vmatprep.subr.bf16.mxu0 %v10634_v12  ;;  %v5369_v20 = vmax.f32 %v5329_v0, 0.0  ;;  %v5368_v1 = vmax.f32 %v5218_v3, 0.0 }
 0xdcc   : > { %v5222_v17 = vadd.f32 %v5221_v9, %v5089_v2  ;;  %v5334_v15 = vpop.f32.mrb[194].mxu1  ;;  %8627 = vmatprep.subr.bf16.mxu1 %v10636_v48  ;;  %v5223_v18 = vpop.f32.mrb[195].mxu0  ;;  %8613 = vmatpush1.bf16.msra.mxu0 %v10630_v29  ;;  %v5370_v8 = vmax.f32 %v5331_v4, 0.0 }
 0xdcd   : > { %v5335_v26 = vadd.f32 %v5334_v15, %v5089_v2  ;;  %v5224_v27 = vadd.f32 %v5223_v18, %v5089_v2  ;;  %v5336_v11 = vpop.f32.mrb[195].mxu1  ;;  %8629 = vmatpush1.bf16.msra.mxu1 %v10632_v54 }
 0xdce   : > { %v5371_v61 = vmax.f32 %v5222_v17, 0.0  ;;  %v5337_v35 = vadd.f32 %v5336_v11, %v5089_v2 }
 0xdcf   : > { %v5373_v44 = vmax.f32 %v5335_v26, 0.0  ;;  %v5372_v59 = vmax.f32 %v5224_v27, 0.0  ;;  %v5227_v10 = vpop.f32.mrb[196].mxu0 }
 0xdd0   : > { %v8616_v49 = vpack.c.bf16 %v5371_v61, %v5367_v50  ;;  %v5374_v25 = vmax.f32 %v5337_v35, 0.0  ;;  %v5340_v28 = vpop.f32.mrb[196].mxu1  ;;  %v5229_v31 = vpop.f32.mrb[197].mxu0  ;;  %v5228_v40 = vadd.f32 %v5227_v10, %v5094_v34  ;;  %v8036_v50 = vld [vmem:[%s11038_s10 + $0x8] sm:$0xf] }
 0xdd1   : > { %v8632_v52 = vpack.c.bf16 %v5373_v44, %v5369_v20  ;;  %v8614_v38 = vpack.c.bf16 %v5372_v59, %v5368_v1  ;;  %v5342_v33 = vpop.f32.mrb[197].mxu1  ;;  %v5341_v62 = vadd.f32 %v5340_v28, %v5094_v34  ;;  %v5230_v43 = vadd.f32 %v5229_v31, %v5094_v34  ;;  %v5552_v31 = vpop.permute.xlu1 %5551 }
 0xdd2   : > { %v8630_v13 = vpack.c.bf16 %v5374_v25, %v5370_v8  ;;  %v5343_v47 = vadd.f32 %v5342_v33, %v5094_v34  ;;  %v5375_v57 = vmax.f32 %v5228_v40, 0.0  ;;  %v4007_v44 = vadd.f32 %v10366_v30, %v10046_v60 }
 0xdd3   : > { %v5233_v32 = vpop.f32.mrb[198].mxu0  ;;  %8615 = vmatprep.subr.bf16.mxu0 %v8614_v38  ;;  %v5377_v0 = vmax.f32 %v5341_v62, 0.0  ;;  %v5376_v3 = vmax.f32 %v5230_v43, 0.0  ;;  %v4009_v8 = vadd.f32 %v10368_v56, %v10048_v46  ;;  %v4010_v34 = vadd.f32 %v10374_v24, %v10054_v37 }
 0xdd4   : > { %v5234_v23 = vadd.f32 %v5233_v32, %v5099_v42  ;;  %v5346_v45 = vpop.f32.mrb[198].mxu1  ;;  %8631 = vmatprep.subr.bf16.mxu1 %v8630_v13  ;;  %v5235_v51 = vpop.f32.mrb[199].mxu0  ;;  %8617 = vmatpush1.bf16.msra.mxu0 %v8616_v49  ;;  %v5378_v17 = vmax.f32 %v5343_v47, 0.0 }
 0xdd5   : > { %v5347_v53 = vadd.f32 %v5346_v45, %v5099_v42  ;;  %v5236_v36 = vadd.f32 %v5235_v51, %v5099_v42  ;;  %v5348_v58 = vpop.f32.mrb[199].mxu1  ;;  %8633 = vmatpush1.bf16.msra.mxu1 %v8632_v52 }
 0xdd6   : > { %v5379_v55 = vmax.f32 %v5234_v23, 0.0  ;;  %v5349_v2 = vadd.f32 %v5348_v58, %v5099_v42 }
 0xdd7   : > { %v5381_v9 = vmax.f32 %v5347_v53, 0.0  ;;  %v5380_v4 = vmax.f32 %v5236_v36, 0.0 }
 0xdd8   : > { %v8620_v15 = vpack.c.bf16 %v5379_v55, %v5375_v57  ;;  %v5382_v18 = vmax.f32 %v5349_v2, 0.0 }
 0xdd9   : > { %v8636_v26 = vpack.c.bf16 %v5381_v9, %v5377_v0  ;;  %v8618_v27 = vpack.c.bf16 %v5380_v4, %v5376_v3 }
 0xdda   : > { %v8634_v11 = vpack.c.bf16 %v5382_v18, %v5378_v17 }
 0xddb   : > { %8619 = vmatprep.subr.bf16.mxu0 %v8618_v27 }
 0xddc   : > { %8635 = vmatprep.subr.bf16.mxu1 %v8634_v11  ;;  %8621 = vmatpush1.bf16.msra.mxu0 %v8620_v15 }
 0xddd   : > { %8637 = vmatpush1.bf16.msra.mxu1 %v8636_v26  ;;  %8639 = vmatprep.subr.bf16.mxu0 %v10622_v19 }
 0xdde   : > { %8655 = vmatprep.subr.bf16.mxu1 %v10624_v41 }
 0xddf   : > { %8038 = vmatmul.mubr.msk.f32.vlgmr.msra.gmra.mrb[200].mxu0 %vm984_vm2, %v8036_v50 }
 0xde0   : > { %8039 = vmatmul.mubr.msk.f32.vlgmr.msra.gmra.mrb[200].mxu1 %vm984_vm2, %v8036_v50  ;;  %8641 = vmatpush1.bf16.msra.mxu0 %v10618_v39  ;;  %v8040_v39 = vld [vmem:[%s11040_s12 + $0x8] sm:$0xf]  ;;  %v8047_v50 = vld [vmem:[%s11030_s2 + $0xd8] sm:$0xff] }
 0xde1   : > { %8657 = vmatpush1.bf16.msra.mxu1 %v10620_v6  ;;  %8643 = vmatprep.subr.bf16.mxu0 %v10634_v12  ;;  %v5390_v6 = vpop.permute.xlu0 %5389 }
 0xde2   : > { %8659 = vmatprep.subr.bf16.mxu1 %v10636_v48  ;;  %5621 = vmatprep.mubr.f32.mxu0 %v9007_v5 }
 0xde3   : > { %5692 = vmatprep.mubr.f32.mxu1 %v9007_v5 }
 0xde4   : > { %8645 = vmatpush1.bf16.msra.mxu0 %v10630_v29 }
 0xde5   : > { %8661 = vmatpush1.bf16.msra.mxu1 %v10632_v54  ;;  %8647 = vmatprep.subr.bf16.mxu0 %v8614_v38 }
 0xde6   : > { %8663 = vmatprep.subr.bf16.mxu1 %v8630_v13 }
 0xde8   : > { %8649 = vmatpush1.bf16.msra.mxu0 %v8616_v49  ;;  %v4008_v49 = vadd.f32 %v10371_v14, %v10051_v16 }
 0xde9   : > { %8665 = vmatpush1.bf16.msra.mxu1 %v8632_v52  ;;  %8651 = vmatprep.subr.bf16.mxu0 %v8618_v27 }
 0xdea   : > { %8667 = vmatprep.subr.bf16.mxu1 %v8634_v11  ;;  %v8044_v11 = vld [vmem:[%s11030_s2 + $0xc0] sm:$0xff] }
 0xdec   : > { %8653 = vmatpush1.bf16.msra.mxu0 %v8620_v15 }
 0xded   : > { %8669 = vmatpush1.bf16.msra.mxu1 %v8636_v26 }
 0xdef   : > { %8042 = vmatmul.mubr.msk.f32.vlgmr.msra.gmra.mrb[202].mxu0 %vm984_vm2, %v8040_v39 }
 0xdf0   : > { %8043 = vmatmul.mubr.msk.f32.vlgmr.msra.gmra.mrb[202].mxu1 %vm984_vm2, %v8040_v39  ;;  %5893 = vmatprep.mubr.f32.mxu0 %v9007_v5  ;;  %v8048_v39 = vld [vmem:[%s11030_s2 + $0xe0] sm:$0xff] }
 0xdf1   : > { %6006 = vmatprep.mubr.f32.mxu1 %v9007_v5 }
 0xeb2   : > { %v5461_v19 = vpop.f32.mrb[200].mxu0 }
 0xeb3   : > { %v5462_v41 = vadd.f32 %v5461_v19, %v5390_v6  ;;  %v5532_v29 = vpop.f32.mrb[200].mxu1  ;;  %v5463_v54 = vpop.f32.mrb[201].mxu0  ;;  %v8050_v19 = vld [vmem:[%s11030_s2 + $0xf0] sm:$0xff] }
 0xeb4   : > { %v5533_v12 = vadd.f32 %v5532_v29, %v5390_v6  ;;  %v5464_v48 = vadd.f32 %v5463_v54, %v5390_v6  ;;  %v5534_v61 = vpop.f32.mrb[201].mxu1 }
 0xeb5   : > { %8908 = vtanh.f32 %v5462_v41  ;;  %v5535_v35 = vadd.f32 %v5534_v61, %v5390_v6  ;;  %v8049_v6 = vld [vmem:[%s11030_s2 + $0xe8] sm:$0xff]  ;;  %v8051_v41 = vld [vmem:[%s11030_s2 + $0xf8] sm:$0xff] }
 0xeb6   : > { %8910 = vtanh.f32 %v5533_v12 }
 0xeb7   : > { %8912 = vtanh.f32 %v5464_v48  ;;  %v5756_v48 = vpop.permute.xlu0 %5755 }
 0xeb8   : > { %8914 = vtanh.f32 %v5535_v35 }
 0xebf   : > { %v8909_v20 = vpop.eup %8908 }
 0xec0   : > { %v8911_v1 = vpop.eup %8910  ;;  %v5541_v59 = vmul.f32 3.0, %v8909_v20  ;;  %v5761_v20 = vpop.permute.xlu1 %5760 }
 0xec1   : > { %v8913_v10 = vpop.eup %8912  ;;  %v5543_v25 = vmul.f32 3.0, %v8911_v1 }
 0xec2   : > { %v8915_v28 = vpop.eup %8914  ;;  %v5703_v52 = vmul.f32 1.442695, %v5541_v59  ;;  %v10672_v38 = vadd.f32 %v5541_v59, %v4007_v44  ;;  %v5542_v33 = vmul.f32 3.0, %v8913_v10  ;;  %v5623_v13 = vpop.f32.mrb[202].mxu0 }
 0xec3   : > { %v5707_v60 = vmul.f32 1.442695, %v5543_v25  ;;  %v10674_v30 = vadd.f32 %v5543_v25, %v4009_v8  ;;  %v5544_v40 = vmul.f32 3.0, %v8915_v28  ;;  %v5624_v42 = vadd.f32 %v5623_v13, %v5552_v31  ;;  %v5694_v46 = vpop.f32.mrb[202].mxu1  ;;  %v5625_v56 = vpop.f32.mrb[203].mxu0 }
 0xec4   : > { %8916 = vpow2.f32 %v5703_v52  ;;  %v5705_v16 = vmul.f32 1.442695, %v5542_v33  ;;  %v10676_v14 = vadd.f32 %v5542_v33, %v4008_v49  ;;  %v5695_v62 = vadd.f32 %v5694_v46, %v5552_v31  ;;  %v5696_v43 = vpop.f32.mrb[203].mxu1 }
 0xec5   : > { %8918 = vpow2.f32 %v5707_v60  ;;  %v5709_v37 = vmul.f32 1.442695, %v5544_v40  ;;  %v10678_v24 = vadd.f32 %v5544_v40, %v4010_v34  ;;  %v5699_v32 = vmul.f32 3.0, %v5624_v42 }
 0xec6   : > { %8920 = vpow2.f32 %v5705_v16  ;;  %v5701_v47 = vmul.f32 3.0, %v5695_v62  ;;  %v5626_v23 = vadd.f32 %v5625_v56, %v5552_v31  ;;  %v5697_v45 = vadd.f32 %v5696_v43, %v5552_v31 }
 0xec7   : > { %8922 = vpow2.f32 %v5709_v37 }
 0xec8   : > { %v5700_v51 = vmul.f32 3.0, %v5626_v23  ;;  %v5702_v53 = vmul.f32 3.0, %v5697_v45 }
 0xeca   : > { %v5725_v36 = vcombine.low %v5699_v32, %v5700_v51  ;;  %v5726_v58 = vcombine.low %v5701_v47, %v5702_v53  ;;  %v5766_v47 = vpop.permute.xlu0 %5765 }
 0xece   : > { %v8917_v57 = vpop.eup %8916 }
 0xecf   : > { %v8919_v55 = vpop.eup %8918 }
 0xed0   : > { %v8921_v2 = vpop.eup %8920 }
 0xed1   : > { %v8923_v0 = vpop.eup %8922  ;;  %v5715_v3 = vcombine.low %v8917_v57, %v8921_v2 }
 0xed2   : > { %v5716_v9 = vcombine.low %v8919_v55, %v8923_v0 }
 0xed3   : > { %v5719_v4 = vmul.f32 %v5715_v3, %v10066_v63  ;;  %v8045_v63 = vld [vmem:[%s11030_s2 + $0xc8] sm:$0xff] }
 0xed4   : > { %v5720_v17 = vmul.f32 %v5716_v9, %v10068_v7  ;;  %v8046_v7 = vld [vmem:[%s11030_s2 + $0xd0] sm:$0xff] }
 0xed5   : > { %v5729_v15 = vadd.f32 %v5725_v36, %v5719_v4 }
 0xed6   : > { %v5730_v18 = vadd.f32 %v5726_v58, %v5720_v17  ;;  %v5771_v58 = vpop.permute.xlu1 %5770 }
 0xed7   : > { %7461 = vst [vmem:[%s569_s30] sm:$0xff] %v5729_v15  ;;  %v5795_v26 = vcombine.high %v5729_v15, %v5729_v15 }
 0xed8   : > { %7462 = vst [vmem:[%s569_s30 + $0x8] sm:$0xff] %v5730_v18  ;;  %v5796_v27 = vcombine.high %v5730_v18, %v5730_v18 }
 0xed9   : > { %8060 = vmatprep.subr.msk.mxu0 %vm661_vm0, %v5795_v26 }
 0xeda   : > { %8070 = vmatprep.subr.msk.mxu1 %vm661_vm0, %v5796_v27  ;;  %8061 = vmatpush1.msk.msra.mxu0 %vm661_vm0, %v5729_v15 }
 0xedb   : > { %8071 = vmatpush1.msk.msra.mxu1 %vm661_vm0, %v5730_v18  ;;  %8062 = vmatmul.mubr.msk.f32.vlgmr.msra.gmra.mrb[204].mxu0 %vm636_vm1, %v8044_v11 }
 0xedc   : > { %8072 = vmatmul.mubr.msk.f32.vlgmr.msra.gmra.mrb[204].mxu1 %vm636_vm1, %v8044_v11  ;;  %5899 = vmatprep.mubr.f32.mxu0 %v9007_v5 }
 0xedd   : > { %6012 = vmatprep.mubr.f32.mxu1 %v9007_v5 }
 0xedf   : > { %8063 = vmatmul.mubr.msk.f32.gmra.mrb[206].mxu0 %vm636_vm1, %v8045_v63 }
 0xee0   : > { %8073 = vmatmul.mubr.msk.f32.gmra.mrb[206].mxu1 %vm636_vm1, %v8045_v63  ;;  %5905 = vmatprep.mubr.f32.mxu0 %v9007_v5 }
 0xee1   : > { %6018 = vmatprep.mubr.f32.mxu1 %v9007_v5 }
 0xee3   : > { %8064 = vmatmul.mubr.msk.f32.gmra.mrb[208].mxu0 %vm636_vm1, %v8046_v7 }
 0xee4   : > { %8074 = vmatmul.mubr.msk.f32.gmra.mrb[208].mxu1 %vm636_vm1, %v8046_v7  ;;  %5911 = vmatprep.mubr.f32.mxu0 %v9007_v5 }
 0xee5   : > { %6024 = vmatprep.mubr.f32.mxu1 %v9007_v5 }
 0xee7   : > { %8065 = vmatmul.mubr.msk.f32.gmra.mrb[210].mxu0 %vm636_vm1, %v8047_v50 }
 0xee8   : > { %8075 = vmatmul.mubr.msk.f32.gmra.mrb[210].mxu1 %vm636_vm1, %v8047_v50  ;;  %5917 = vmatprep.mubr.f32.mxu0 %v9007_v5 }
 0xee9   : > { %6030 = vmatprep.mubr.f32.mxu1 %v9007_v5 }
 0xeeb   : > { %8066 = vmatmul.mubr.msk.f32.gmra.mrb[212].mxu0 %vm636_vm1, %v8048_v39 }
 0xeec   : > { %8076 = vmatmul.mubr.msk.f32.gmra.mrb[212].mxu1 %vm636_vm1, %v8048_v39  ;;  %5923 = vmatprep.mubr.f32.mxu0 %v9007_v5 }
 0xeed   : > { %6036 = vmatprep.mubr.f32.mxu1 %v9007_v5 }
 0xeef   : > { %8067 = vmatmul.mubr.msk.f32.gmra.mrb[214].mxu0 %vm636_vm1, %v8049_v6 }
 0xef0   : > { %8077 = vmatmul.mubr.msk.f32.gmra.mrb[214].mxu1 %vm636_vm1, %v8049_v6  ;;  %5929 = vmatprep.mubr.f32.mxu0 %v9007_v5 }
 0xef1   : > { %6042 = vmatprep.mubr.f32.mxu1 %v9007_v5 }
 0xef3   : > { %8068 = vmatmul.mubr.msk.f32.gmra.mrb[216].mxu0 %vm636_vm1, %v8050_v19 }
 0xef4   : > { %8078 = vmatmul.mubr.msk.f32.gmra.mrb[216].mxu1 %vm636_vm1, %v8050_v19  ;;  %5935 = vmatprep.mubr.f32.mxu0 %v9007_v5 }
 0xef5   : > { %6048 = vmatprep.mubr.f32.mxu1 %v9007_v5 }
 0xef7   : > { %8069 = vmatmul.mubr.msk.f32.gmra.mrb[218].mxu0 %vm636_vm1, %v8051_v41 }
 0xef8   : > { %8079 = vmatmul.mubr.msk.f32.gmra.mrb[218].mxu1 %vm636_vm1, %v8051_v41  ;;  %6233 = vmatprep.mubr.f32.mxu0 %v9007_v5 }
 0xef9   : > { %6346 = vmatprep.mubr.f32.mxu1 %v9007_v5 }
 0xfae   : > { %v5895_v29 = vpop.f32.mrb[204].mxu0 }
 0xfaf   : > { %v6008_v54 = vpop.f32.mrb[204].mxu1  ;;  %v5897_v12 = vpop.f32.mrb[205].mxu0  ;;  %v5896_v35 = vadd.f32 %v5895_v29, %v5756_v48 }
 0xfb0   : > { %v6010_v61 = vpop.f32.mrb[205].mxu1  ;;  %v6009_v1 = vadd.f32 %v6008_v54, %v5756_v48  ;;  %v5898_v44 = vadd.f32 %v5897_v12, %v5756_v48 }
 0xfb1   : > { %v6011_v10 = vadd.f32 %v6010_v61, %v5756_v48  ;;  %v6055_v52 = vmax.f32 %v5896_v35, 0.0  ;;  %v5776_v48 = vpop.permute.xlu0 %5775 }
 0xfb2   : > { %v5901_v59 = vpop.f32.mrb[206].mxu0  ;;  %v6057_v60 = vmax.f32 %v6009_v1, 0.0  ;;  %v6056_v40 = vmax.f32 %v5898_v44, 0.0 }
 0xfb3   : > { %v5902_v8 = vadd.f32 %v5901_v59, %v5761_v20  ;;  %v6014_v49 = vpop.f32.mrb[206].mxu1  ;;  %v5903_v25 = vpop.f32.mrb[207].mxu0  ;;  %v6058_v16 = vmax.f32 %v6011_v10, 0.0 }
 0xfb4   : > { %v6015_v28 = vadd.f32 %v6014_v49, %v5761_v20  ;;  %v5904_v31 = vadd.f32 %v5903_v25, %v5761_v20  ;;  %v6016_v34 = vpop.f32.mrb[207].mxu1  ;;  %v5781_v59 = vpop.permute.xlu1 %5780 }
 0xfb5   : > { %v6059_v33 = vmax.f32 %v5902_v8, 0.0  ;;  %v6017_v13 = vadd.f32 %v6016_v34, %v5761_v20 }
 0xfb6   : > { %v6061_v42 = vmax.f32 %v6015_v28, 0.0  ;;  %v6060_v46 = vmax.f32 %v5904_v31, 0.0  ;;  %v5907_v56 = vpop.f32.mrb[208].mxu0 }
 0xfb7   : > { %v8672_v62 = vpack.c.bf16 %v6059_v33, %v6055_v52  ;;  %v6062_v43 = vmax.f32 %v6017_v13, 0.0  ;;  %v6020_v37 = vpop.f32.mrb[208].mxu1  ;;  %v5909_v32 = vpop.f32.mrb[209].mxu0  ;;  %v5908_v36 = vadd.f32 %v5907_v56, %v5766_v47 }
 0xfb8   : > { %v8688_v23 = vpack.c.bf16 %v6061_v42, %v6057_v60  ;;  %v8670_v45 = vpack.c.bf16 %v6060_v46, %v6056_v40  ;;  %v6022_v51 = vpop.f32.mrb[209].mxu1  ;;  %v6021_v57 = vadd.f32 %v6020_v37, %v5766_v47  ;;  %v5910_v55 = vadd.f32 %v5909_v32, %v5766_v47 }
 0xfb9   : > { %v8686_v53 = vpack.c.bf16 %v6062_v43, %v6058_v16  ;;  %v6023_v0 = vadd.f32 %v6022_v51, %v5766_v47  ;;  %v6063_v26 = vmax.f32 %v5908_v36, 0.0  ;;  %v5786_v51 = vpop.permute.xlu0 %5785 }
 0xfba   : > { %v5913_v2 = vpop.f32.mrb[210].mxu0  ;;  %8671 = vmatprep.subr.bf16.mxu0 %v8670_v45  ;;  %v6065_v63 = vmax.f32 %v6021_v57, 0.0  ;;  %v6064_v7 = vmax.f32 %v5910_v55, 0.0 }
 0xfbb   : > { %v5914_v3 = vadd.f32 %v5913_v2, %v5771_v58  ;;  %v6026_v9 = vpop.f32.mrb[210].mxu1  ;;  %8687 = vmatprep.subr.bf16.mxu1 %v8686_v53  ;;  %v5915_v4 = vpop.f32.mrb[211].mxu0  ;;  %8673 = vmatpush1.bf16.msra.mxu0 %v8672_v62  ;;  %v6066_v19 = vmax.f32 %v6023_v0, 0.0 }
 0xfbc   : > { %v6027_v17 = vadd.f32 %v6026_v9, %v5771_v58  ;;  %v5916_v15 = vadd.f32 %v5915_v4, %v5771_v58  ;;  %v6028_v18 = vpop.f32.mrb[211].mxu1  ;;  %8689 = vmatpush1.bf16.msra.mxu1 %v8688_v23  ;;  %v5791_v2 = vpop.permute.xlu1 %5790 }
 0xfbd   : > { %v6067_v27 = vmax.f32 %v5914_v3, 0.0  ;;  %v6029_v11 = vadd.f32 %v6028_v18, %v5771_v58 }
 0xfbe   : > { %v6069_v50 = vmax.f32 %v6027_v17, 0.0  ;;  %v6068_v39 = vmax.f32 %v5916_v15, 0.0  ;;  %v5919_v6 = vpop.f32.mrb[212].mxu0 }
 0xfbf   : > { %v8676_v41 = vpack.c.bf16 %v6067_v27, %v6063_v26  ;;  %v6070_v29 = vmax.f32 %v6029_v11, 0.0  ;;  %v6032_v54 = vpop.f32.mrb[212].mxu1  ;;  %v5921_v12 = vpop.f32.mrb[213].mxu0  ;;  %v5920_v44 = vadd.f32 %v5919_v6, %v5776_v48 }
 0xfc0   : > { %v8692_v61 = vpack.c.bf16 %v6069_v50, %v6065_v63  ;;  %v8674_v35 = vpack.c.bf16 %v6068_v39, %v6064_v7  ;;  %v6034_v20 = vpop.f32.mrb[213].mxu1  ;;  %v6033_v10 = vadd.f32 %v6032_v54, %v5776_v48  ;;  %v5922_v8 = vadd.f32 %v5921_v12, %v5776_v48 }
 0xfc1   : > { %v8690_v1 = vpack.c.bf16 %v6070_v29, %v6066_v19  ;;  %v6035_v25 = vadd.f32 %v6034_v20, %v5776_v48  ;;  %v6071_v60 = vmax.f32 %v5920_v44, 0.0  ;;  %v8080_v20 = vld [vmem:[%s11032_s4 + $0xc0] sm:$0xff]  ;;  %v8082_v44 = vld [vmem:[%s11032_s4 + $0xd0] sm:$0xff] }
 0xfc2   : > { %v5925_v49 = vpop.f32.mrb[214].mxu0  ;;  %8675 = vmatprep.subr.bf16.mxu0 %v8674_v35  ;;  %v6073_v46 = vmax.f32 %v6033_v10, 0.0  ;;  %v6072_v56 = vmax.f32 %v5922_v8, 0.0  ;;  %v8084_v10 = vld [vmem:[%s11032_s4 + $0xe0] sm:$0xff]  ;;  %v8085_v8 = vld [vmem:[%s11032_s4 + $0xe8] sm:$0xff] }
 0xfc3   : > { %v5926_v28 = vadd.f32 %v5925_v49, %v5781_v59  ;;  %v6038_v31 = vpop.f32.mrb[214].mxu1  ;;  %8691 = vmatprep.subr.bf16.mxu1 %v8690_v1  ;;  %v5927_v34 = vpop.f32.mrb[215].mxu0  ;;  %8677 = vmatpush1.bf16.msra.mxu0 %v8676_v41  ;;  %v6074_v37 = vmax.f32 %v6035_v25, 0.0  ;;  %v8081_v1 = vld [vmem:[%s11032_s4 + $0xc8] sm:$0xff]  ;;  %v8086_v49 = vld [vmem:[%s11032_s4 + $0xf0] sm:$0xff]  ;;  %v8087_v25 = vld [vmem:[%s11032_s4 + $0xf8] sm:$0xff] }
 0xfc4   : > { %v6039_v52 = vadd.f32 %v6038_v31, %v5781_v59  ;;  %v5928_v33 = vadd.f32 %v5927_v34, %v5781_v59  ;;  %v6040_v13 = vpop.f32.mrb[215].mxu1  ;;  %8693 = vmatpush1.bf16.msra.mxu1 %v8692_v61 }
 0xfc5   : > { %v6075_v40 = vmax.f32 %v5926_v28, 0.0  ;;  %v6041_v42 = vadd.f32 %v6040_v13, %v5781_v59  ;;  %v8083_v59 = vld [vmem:[%s11032_s4 + $0xd8] sm:$0xff] }
 0xfc6   : > { %v6077_v16 = vmax.f32 %v6039_v52, 0.0  ;;  %v6076_v62 = vmax.f32 %v5928_v33, 0.0  ;;  %v5931_v43 = vpop.f32.mrb[216].mxu0  ;;  %v6108_v52 = vpop.permute.xlu0 %6107 }
 0xfc7   : > { %v8680_v32 = vpack.c.bf16 %v6075_v40, %v6071_v60  ;;  %v6078_v47 = vmax.f32 %v6041_v42, 0.0  ;;  %v6044_v23 = vpop.f32.mrb[216].mxu1  ;;  %v5933_v45 = vpop.f32.mrb[217].mxu0  ;;  %v5932_v55 = vadd.f32 %v5931_v43, %v5786_v51 }
 0xfc8   : > { %v8696_v53 = vpack.c.bf16 %v6077_v16, %v6073_v46  ;;  %v8678_v36 = vpack.c.bf16 %v6076_v62, %v6072_v56  ;;  %v6046_v58 = vpop.f32.mrb[217].mxu1  ;;  %v6045_v0 = vadd.f32 %v6044_v23, %v5786_v51  ;;  %v5934_v3 = vadd.f32 %v5933_v45, %v5786_v51  ;;  %v6113_v60 = vpop.permute.xlu1 %6112 }
 0xfc9   : > { %v8694_v57 = vpack.c.bf16 %v6078_v47, %v6074_v37  ;;  %v6047_v4 = vadd.f32 %v6046_v58, %v5786_v51  ;;  %v6079_v63 = vmax.f32 %v5932_v55, 0.0 }
 0xfca   : > { %v5937_v9 = vpop.f32.mrb[218].mxu0  ;;  %8679 = vmatprep.subr.bf16.mxu0 %v8678_v36  ;;  %v6081_v39 = vmax.f32 %v6045_v0, 0.0  ;;  %v6080_v6 = vmax.f32 %v5934_v3, 0.0 }
 0xfcb   : > { %v5938_v17 = vadd.f32 %v5937_v9, %v5791_v2  ;;  %v6050_v15 = vpop.f32.mrb[218].mxu1  ;;  %8695 = vmatprep.subr.bf16.mxu1 %v8694_v57  ;;  %v5939_v18 = vpop.f32.mrb[219].mxu0  ;;  %8681 = vmatpush1.bf16.msra.mxu0 %v8680_v32  ;;  %v6082_v29 = vmax.f32 %v6047_v4, 0.0 }
 0xfcc   : > { %v6051_v26 = vadd.f32 %v6050_v15, %v5791_v2  ;;  %v5940_v27 = vadd.f32 %v5939_v18, %v5791_v2  ;;  %v6052_v11 = vpop.f32.mrb[219].mxu1  ;;  %8697 = vmatpush1.bf16.msra.mxu1 %v8696_v53 }
 0xfcd   : > { %v6083_v7 = vmax.f32 %v5938_v17, 0.0  ;;  %v6053_v50 = vadd.f32 %v6052_v11, %v5791_v2  ;;  %v6118_v17 = vpop.permute.xlu0 %6117 }
 0xfce   : > { %v6085_v19 = vmax.f32 %v6051_v26, 0.0  ;;  %v6084_v41 = vmax.f32 %v5940_v27, 0.0 }
 0xfcf   : > { %v8684_v54 = vpack.c.bf16 %v6083_v7, %v6079_v63  ;;  %v6086_v12 = vmax.f32 %v6053_v50, 0.0  ;;  %v6123_v63 = vpop.permute.xlu1 %6122 }
 0xfd0   : > { %v8700_v48 = vpack.c.bf16 %v6085_v19, %v6081_v39  ;;  %v8682_v61 = vpack.c.bf16 %v6084_v41, %v6080_v6 }
 0xfd1   : > { %v8698_v35 = vpack.c.bf16 %v6086_v12, %v6082_v29 }
 0xfd2   : > { %8683 = vmatprep.subr.bf16.mxu0 %v8682_v61 }
 0xfd3   : > { %8699 = vmatprep.subr.bf16.mxu1 %v8698_v35  ;;  %8685 = vmatpush1.bf16.msra.mxu0 %v8684_v54 }
 0xfd4   : > { %8701 = vmatpush1.bf16.msra.mxu1 %v8700_v48 }
 0xfd6   : > { %8096 = vmatmul.mubr.msk.f32.vlgmr.msra.gmra.mrb[220].mxu0 %vm984_vm2, %v8080_v20 }
 0xfd7   : > { %8104 = vmatmul.mubr.msk.f32.vlgmr.msra.gmra.mrb[220].mxu1 %vm984_vm2, %v8080_v20  ;;  %6239 = vmatprep.mubr.f32.mxu0 %v9007_v5 }
 0xfd8   : > { %6352 = vmatprep.mubr.f32.mxu1 %v9007_v5 }
 0xfda   : > { %8097 = vmatmul.mubr.msk.f32.gmra.mrb[222].mxu0 %vm984_vm2, %v8081_v1 }
 0xfdb   : > { %8105 = vmatmul.mubr.msk.f32.gmra.mrb[222].mxu1 %vm984_vm2, %v8081_v1  ;;  %6245 = vmatprep.mubr.f32.mxu0 %v9007_v5 }
 0xfdc   : > { %6358 = vmatprep.mubr.f32.mxu1 %v9007_v5 }
 0xfde   : > { %8098 = vmatmul.mubr.msk.f32.gmra.mrb[224].mxu0 %vm984_vm2, %v8082_v44 }
 0xfdf   : > { %8106 = vmatmul.mubr.msk.f32.gmra.mrb[224].mxu1 %vm984_vm2, %v8082_v44  ;;  %6251 = vmatprep.mubr.f32.mxu0 %v9007_v5 }
 0xfe0   : > { %6364 = vmatprep.mubr.f32.mxu1 %v9007_v5 }
 0xfe2   : > { %8099 = vmatmul.mubr.msk.f32.gmra.mrb[226].mxu0 %vm984_vm2, %v8083_v59 }
 0xfe3   : > { %8107 = vmatmul.mubr.msk.f32.gmra.mrb[226].mxu1 %vm984_vm2, %v8083_v59  ;;  %6257 = vmatprep.mubr.f32.mxu0 %v9007_v5 }
 0xfe4   : > { %6370 = vmatprep.mubr.f32.mxu1 %v9007_v5 }
 0xfe6   : > { %8100 = vmatmul.mubr.msk.f32.gmra.mrb[228].mxu0 %vm984_vm2, %v8084_v10 }
 0xfe7   : > { %8108 = vmatmul.mubr.msk.f32.gmra.mrb[228].mxu1 %vm984_vm2, %v8084_v10  ;;  %6263 = vmatprep.mubr.f32.mxu0 %v9007_v5 }
 0xfe8   : > { %6376 = vmatprep.mubr.f32.mxu1 %v9007_v5 }
 0xfea   : > { %8101 = vmatmul.mubr.msk.f32.gmra.mrb[230].mxu0 %vm984_vm2, %v8085_v8 }
 0xfeb   : > { %8109 = vmatmul.mubr.msk.f32.gmra.mrb[230].mxu1 %vm984_vm2, %v8085_v8  ;;  %6269 = vmatprep.mubr.f32.mxu0 %v9007_v5 }
 0xfec   : > { %6382 = vmatprep.mubr.f32.mxu1 %v9007_v5 }
 0xfee   : > { %8102 = vmatmul.mubr.msk.f32.gmra.mrb[232].mxu0 %vm984_vm2, %v8086_v49 }
 0xfef   : > { %8110 = vmatmul.mubr.msk.f32.gmra.mrb[232].mxu1 %vm984_vm2, %v8086_v49  ;;  %6275 = vmatprep.mubr.f32.mxu0 %v9007_v5 }
 0xff0   : > { %6388 = vmatprep.mubr.f32.mxu1 %v9007_v5 }
 0xff2   : > { %8103 = vmatmul.mubr.msk.f32.gmra.mrb[234].mxu0 %vm984_vm2, %v8087_v25 }
 0xff3   : > { %8111 = vmatmul.mubr.msk.f32.gmra.mrb[234].mxu1 %vm984_vm2, %v8087_v25  ;;  %6573 = vmatprep.mubr.f32.mxu0 %v9007_v5 }
 0xff4   : > { %6686 = vmatprep.mubr.f32.mxu1 %v9007_v5 }
0x10a9   : > { %v6235_v28 = vpop.f32.mrb[220].mxu0 }
0x10aa   : > { %v6348_v31 = vpop.f32.mrb[220].mxu1  ;;  %v6237_v34 = vpop.f32.mrb[221].mxu0  ;;  %v6236_v13 = vadd.f32 %v6235_v28, %v6108_v52 }
0x10ab   : > { %v6350_v33 = vpop.f32.mrb[221].mxu1  ;;  %v6349_v40 = vadd.f32 %v6348_v31, %v6108_v52  ;;  %v6238_v42 = vadd.f32 %v6237_v34, %v6108_v52 }
0x10ac   : > { %v6351_v56 = vadd.f32 %v6350_v33, %v6108_v52  ;;  %v6395_v23 = vmax.f32 %v6236_v13, 0.0  ;;  %v6128_v52 = vpop.permute.xlu0 %6127 }
0x10ad   : > { %v6241_v46 = vpop.f32.mrb[222].mxu0  ;;  %v6397_v53 = vmax.f32 %v6349_v40, 0.0  ;;  %v6396_v36 = vmax.f32 %v6238_v42, 0.0 }
0x10ae   : > { %v6242_v16 = vadd.f32 %v6241_v46, %v6113_v60  ;;  %v6354_v62 = vpop.f32.mrb[222].mxu1  ;;  %v6243_v43 = vpop.f32.mrb[223].mxu0  ;;  %v6398_v2 = vmax.f32 %v6351_v56, 0.0 }
0x10af   : > { %v6355_v37 = vadd.f32 %v6354_v62, %v6113_v60  ;;  %v6244_v32 = vadd.f32 %v6243_v43, %v6113_v60  ;;  %v6356_v47 = vpop.f32.mrb[223].mxu1  ;;  %v6133_v46 = vpop.permute.xlu1 %6132 }
0x10b0   : > { %v6399_v45 = vmax.f32 %v6242_v16, 0.0  ;;  %v6357_v51 = vadd.f32 %v6356_v47, %v6113_v60 }
0x10b1   : > { %v6401_v58 = vmax.f32 %v6355_v37, 0.0  ;;  %v6400_v57 = vmax.f32 %v6244_v32, 0.0  ;;  %v6247_v55 = vpop.f32.mrb[224].mxu0 }
0x10b2   : > { %v8704_v0 = vpack.c.bf16 %v6399_v45, %v6395_v23  ;;  %v6402_v3 = vmax.f32 %v6357_v51, 0.0  ;;  %v6360_v9 = vpop.f32.mrb[224].mxu1  ;;  %v6249_v4 = vpop.f32.mrb[225].mxu0  ;;  %v6248_v11 = vadd.f32 %v6247_v55, %v6118_v17 }
0x10b3   : > { %v8720_v15 = vpack.c.bf16 %v6401_v58, %v6397_v53  ;;  %v8702_v18 = vpack.c.bf16 %v6400_v57, %v6396_v36  ;;  %v6362_v26 = vpop.f32.mrb[225].mxu1  ;;  %v6361_v7 = vadd.f32 %v6360_v9, %v6118_v17  ;;  %v6250_v50 = vadd.f32 %v6249_v4, %v6118_v17 }
0x10b4   : > { %v8718_v27 = vpack.c.bf16 %v6402_v3, %v6398_v2  ;;  %v6363_v6 = vadd.f32 %v6362_v26, %v6118_v17  ;;  %v6403_v61 = vmax.f32 %v6248_v11, 0.0  ;;  %v6138_v26 = vpop.permute.xlu0 %6137 }
0x10b5   : > { %v6253_v39 = vpop.f32.mrb[226].mxu0  ;;  %8703 = vmatprep.subr.bf16.mxu0 %v8702_v18  ;;  %v6405_v1 = vmax.f32 %v6361_v7, 0.0  ;;  %v6404_v44 = vmax.f32 %v6250_v50, 0.0 }
0x10b6   : > { %v6254_v19 = vadd.f32 %v6253_v39, %v6123_v63  ;;  %v6366_v41 = vpop.f32.mrb[226].mxu1  ;;  %8719 = vmatprep.subr.bf16.mxu1 %v8718_v27  ;;  %v6255_v29 = vpop.f32.mrb[227].mxu0  ;;  %8705 = vmatpush1.bf16.msra.mxu0 %v8704_v0  ;;  %v6406_v49 = vmax.f32 %v6363_v6, 0.0 }
0x10b7   : > { %v6367_v54 = vadd.f32 %v6366_v41, %v6123_v63  ;;  %v6256_v12 = vadd.f32 %v6255_v29, %v6123_v63  ;;  %v6368_v48 = vpop.f32.mrb[227].mxu1  ;;  %8721 = vmatpush1.bf16.msra.mxu1 %v8720_v15  ;;  %v6143_v39 = vpop.permute.xlu1 %6142 }
0x10b8   : > { %v6407_v35 = vmax.f32 %v6254_v19, 0.0  ;;  %v6369_v20 = vadd.f32 %v6368_v48, %v6123_v63 }
0x10b9   : > { %v6409_v59 = vmax.f32 %v6367_v54, 0.0  ;;  %v6408_v10 = vmax.f32 %v6256_v12, 0.0  ;;  %v6259_v8 = vpop.f32.mrb[228].mxu0 }
0x10ba   : > { %v8708_v25 = vpack.c.bf16 %v6407_v35, %v6403_v61  ;;  %v6410_v28 = vmax.f32 %v6369_v20, 0.0  ;;  %v6372_v31 = vpop.f32.mrb[228].mxu1  ;;  %v6261_v34 = vpop.f32.mrb[229].mxu0  ;;  %v6260_v42 = vadd.f32 %v6259_v8, %v6128_v52 }
0x10bb   : > { %v8724_v33 = vpack.c.bf16 %v6409_v59, %v6405_v1  ;;  %v8706_v13 = vpack.c.bf16 %v6408_v10, %v6404_v44  ;;  %v6374_v60 = vpop.f32.mrb[229].mxu1  ;;  %v6373_v56 = vadd.f32 %v6372_v31, %v6128_v52  ;;  %v6262_v16 = vadd.f32 %v6261_v34, %v6128_v52 }
0x10bc   : > { %v8722_v40 = vpack.c.bf16 %v6410_v28, %v6406_v49  ;;  %v6375_v43 = vadd.f32 %v6374_v60, %v6128_v52  ;;  %v6411_v53 = vmax.f32 %v6260_v42, 0.0  ;;  %v8112_v60 = vld [vmem:[%s11034_s6 + $0xc0] sm:$0xff]  ;;  %v8114_v42 = vld [vmem:[%s11034_s6 + $0xd0] sm:$0xff] }
0x10bd   : > { %v6265_v62 = vpop.f32.mrb[230].mxu0  ;;  %8707 = vmatprep.subr.bf16.mxu0 %v8706_v13  ;;  %v6413_v57 = vmax.f32 %v6373_v56, 0.0  ;;  %v6412_v55 = vmax.f32 %v6262_v16, 0.0  ;;  %v8116_v56 = vld [vmem:[%s11034_s6 + $0xe0] sm:$0xff]  ;;  %v8117_v16 = vld [vmem:[%s11034_s6 + $0xe8] sm:$0xff] }
0x10be   : > { %v6266_v37 = vadd.f32 %v6265_v62, %v6133_v46  ;;  %v6378_v32 = vpop.f32.mrb[230].mxu1  ;;  %8723 = vmatprep.subr.bf16.mxu1 %v8722_v40  ;;  %v6267_v47 = vpop.f32.mrb[231].mxu0  ;;  %8709 = vmatpush1.bf16.msra.mxu0 %v8708_v25  ;;  %v6414_v9 = vmax.f32 %v6375_v43, 0.0  ;;  %v8113_v40 = vld [vmem:[%s11034_s6 + $0xc8] sm:$0xff]  ;;  %v8118_v62 = vld [vmem:[%s11034_s6 + $0xf0] sm:$0xff]  ;;  %v8119_v43 = vld [vmem:[%s11034_s6 + $0xf8] sm:$0xff] }
0x10bf   : > { %v6379_v23 = vadd.f32 %v6378_v32, %v6133_v46  ;;  %v6268_v45 = vadd.f32 %v6267_v47, %v6133_v46  ;;  %v6380_v51 = vpop.f32.mrb[231].mxu1  ;;  %8725 = vmatpush1.bf16.msra.mxu1 %v8724_v33 }
0x10c0   : > { %v6415_v36 = vmax.f32 %v6266_v37, 0.0  ;;  %v6381_v58 = vadd.f32 %v6380_v51, %v6133_v46  ;;  %v8115_v46 = vld [vmem:[%s11034_s6 + $0xd8] sm:$0xff] }
0x10c1   : > { %v6417_v2 = vmax.f32 %v6379_v23, 0.0  ;;  %v6416_v0 = vmax.f32 %v6268_v45, 0.0  ;;  %v6271_v3 = vpop.f32.mrb[232].mxu0  ;;  %v6448_v23 = vpop.permute.xlu0 %6447 }
0x10c2   : > { %v8712_v4 = vpack.c.bf16 %v6415_v36, %v6411_v53  ;;  %v6418_v17 = vmax.f32 %v6381_v58, 0.0  ;;  %v6384_v15 = vpop.f32.mrb[232].mxu1  ;;  %v6273_v18 = vpop.f32.mrb[233].mxu0  ;;  %v6272_v50 = vadd.f32 %v6271_v3, %v6138_v26 }
0x10c3   : > { %v8728_v27 = vpack.c.bf16 %v6417_v2, %v6413_v57  ;;  %v8710_v11 = vpack.c.bf16 %v6416_v0, %v6412_v55  ;;  %v6386_v63 = vpop.f32.mrb[233].mxu1  ;;  %v6385_v6 = vadd.f32 %v6384_v15, %v6138_v26  ;;  %v6274_v19 = vadd.f32 %v6273_v18, %v6138_v26  ;;  %v6453_v53 = vpop.permute.xlu1 %6452 }
0x10c4   : > { %v8726_v7 = vpack.c.bf16 %v6418_v17, %v6414_v9  ;;  %v6387_v29 = vadd.f32 %v6386_v63, %v6138_v26  ;;  %v6419_v1 = vmax.f32 %v6272_v50, 0.0 }
0x10c5   : > { %v6277_v41 = vpop.f32.mrb[234].mxu0  ;;  %8711 = vmatprep.subr.bf16.mxu0 %v8710_v11  ;;  %v6421_v10 = vmax.f32 %v6385_v6, 0.0  ;;  %v6420_v8 = vmax.f32 %v6274_v19, 0.0 }
0x10c6   : > { %v6278_v54 = vadd.f32 %v6277_v41, %v6143_v39  ;;  %v6390_v12 = vpop.f32.mrb[234].mxu1  ;;  %8727 = vmatprep.subr.bf16.mxu1 %v8726_v7  ;;  %v6279_v48 = vpop.f32.mrb[235].mxu0  ;;  %8713 = vmatpush1.bf16.msra.mxu0 %v8712_v4  ;;  %v6422_v28 = vmax.f32 %v6387_v29, 0.0 }
0x10c7   : > { %v6391_v61 = vadd.f32 %v6390_v12, %v6143_v39  ;;  %v6280_v35 = vadd.f32 %v6279_v48, %v6143_v39  ;;  %v6392_v20 = vpop.f32.mrb[235].mxu1  ;;  %8729 = vmatpush1.bf16.msra.mxu1 %v8728_v27 }
0x10c8   : > { %v6423_v44 = vmax.f32 %v6278_v54, 0.0  ;;  %v6393_v59 = vadd.f32 %v6392_v20, %v6143_v39  ;;  %v6458_v54 = vpop.permute.xlu0 %6457 }
0x10c9   : > { %v6425_v49 = vmax.f32 %v6391_v61, 0.0  ;;  %v6424_v25 = vmax.f32 %v6280_v35, 0.0 }
0x10ca   : > { %v8716_v31 = vpack.c.bf16 %v6423_v44, %v6419_v1  ;;  %v6426_v34 = vmax.f32 %v6393_v59, 0.0  ;;  %v6463_v1 = vpop.permute.xlu1 %6462 }
0x10cb   : > { %v8732_v52 = vpack.c.bf16 %v6425_v49, %v6421_v10  ;;  %v8714_v33 = vpack.c.bf16 %v6424_v25, %v6420_v8 }
0x10cc   : > { %v8730_v13 = vpack.c.bf16 %v6426_v34, %v6422_v28 }
0x10cd   : > { %8715 = vmatprep.subr.bf16.mxu0 %v8714_v33 }
0x10ce   : > { %8731 = vmatprep.subr.bf16.mxu1 %v8730_v13  ;;  %8717 = vmatpush1.bf16.msra.mxu0 %v8716_v31 }
0x10cf   : > { %8733 = vmatpush1.bf16.msra.mxu1 %v8732_v52 }
0x10d1   : > { %8128 = vmatmul.mubr.msk.f32.vlgmr.msra.gmra.mrb[236].mxu0 %vm984_vm2, %v8112_v60 }
0x10d2   : > { %8136 = vmatmul.mubr.msk.f32.vlgmr.msra.gmra.mrb[236].mxu1 %vm984_vm2, %v8112_v60  ;;  %6579 = vmatprep.mubr.f32.mxu0 %v9007_v5 }
0x10d3   : > { %6692 = vmatprep.mubr.f32.mxu1 %v9007_v5 }
0x10d5   : > { %8129 = vmatmul.mubr.msk.f32.gmra.mrb[238].mxu0 %vm984_vm2, %v8113_v40 }
0x10d6   : > { %8137 = vmatmul.mubr.msk.f32.gmra.mrb[238].mxu1 %vm984_vm2, %v8113_v40  ;;  %6585 = vmatprep.mubr.f32.mxu0 %v9007_v5 }
0x10d7   : > { %6698 = vmatprep.mubr.f32.mxu1 %v9007_v5 }
0x10d9   : > { %8130 = vmatmul.mubr.msk.f32.gmra.mrb[240].mxu0 %vm984_vm2, %v8114_v42 }
0x10da   : > { %8138 = vmatmul.mubr.msk.f32.gmra.mrb[240].mxu1 %vm984_vm2, %v8114_v42  ;;  %6591 = vmatprep.mubr.f32.mxu0 %v9007_v5 }
0x10db   : > { %6704 = vmatprep.mubr.f32.mxu1 %v9007_v5 }
0x10dd   : > { %8131 = vmatmul.mubr.msk.f32.gmra.mrb[242].mxu0 %vm984_vm2, %v8115_v46 }
0x10de   : > { %8139 = vmatmul.mubr.msk.f32.gmra.mrb[242].mxu1 %vm984_vm2, %v8115_v46  ;;  %6597 = vmatprep.mubr.f32.mxu0 %v9007_v5 }
0x10df   : > { %6710 = vmatprep.mubr.f32.mxu1 %v9007_v5 }
0x10e1   : > { %8132 = vmatmul.mubr.msk.f32.gmra.mrb[244].mxu0 %vm984_vm2, %v8116_v56 }
0x10e2   : > { %8140 = vmatmul.mubr.msk.f32.gmra.mrb[244].mxu1 %vm984_vm2, %v8116_v56  ;;  %6603 = vmatprep.mubr.f32.mxu0 %v9007_v5 }
0x10e3   : > { %6716 = vmatprep.mubr.f32.mxu1 %v9007_v5 }
0x10e5   : > { %8133 = vmatmul.mubr.msk.f32.gmra.mrb[246].mxu0 %vm984_vm2, %v8117_v16 }
0x10e6   : > { %8141 = vmatmul.mubr.msk.f32.gmra.mrb[246].mxu1 %vm984_vm2, %v8117_v16  ;;  %6609 = vmatprep.mubr.f32.mxu0 %v9007_v5 }
0x10e7   : > { %6722 = vmatprep.mubr.f32.mxu1 %v9007_v5 }
0x10e9   : > { %8134 = vmatmul.mubr.msk.f32.gmra.mrb[248].mxu0 %vm984_vm2, %v8118_v62 }
0x10ea   : > { %8142 = vmatmul.mubr.msk.f32.gmra.mrb[248].mxu1 %vm984_vm2, %v8118_v62  ;;  %6615 = vmatprep.mubr.f32.mxu0 %v9007_v5 }
0x10eb   : > { %6728 = vmatprep.mubr.f32.mxu1 %v9007_v5 }
0x10ed   : > { %8135 = vmatmul.mubr.msk.f32.gmra.mrb[250].mxu0 %vm984_vm2, %v8119_v43 }
0x10ee   : > { %8143 = vmatmul.mubr.msk.f32.gmra.mrb[250].mxu1 %vm984_vm2, %v8119_v43  ;;  %6913 = vmatprep.mubr.f32.mxu0 %v9007_v5 }
0x10ef   : > { %7026 = vmatprep.mubr.f32.mxu1 %v9007_v5 }
0x11a4   : > { %v6575_v37 = vpop.f32.mrb[236].mxu0 }
0x11a5   : > { %v6688_v32 = vpop.f32.mrb[236].mxu1  ;;  %v6577_v47 = vpop.f32.mrb[237].mxu0  ;;  %v6576_v51 = vadd.f32 %v6575_v37, %v6448_v23 }
0x11a6   : > { %v6690_v45 = vpop.f32.mrb[237].mxu1  ;;  %v6689_v36 = vadd.f32 %v6688_v32, %v6448_v23  ;;  %v6578_v58 = vadd.f32 %v6577_v47, %v6448_v23 }
0x11a7   : > { %v6691_v55 = vadd.f32 %v6690_v45, %v6448_v23  ;;  %v6735_v15 = vmax.f32 %v6576_v51, 0.0  ;;  %v6468_v23 = vpop.permute.xlu0 %6467 }
0x11a8   : > { %v6581_v57 = vpop.f32.mrb[238].mxu0  ;;  %v6737_v27 = vmax.f32 %v6689_v36, 0.0  ;;  %v6736_v11 = vmax.f32 %v6578_v58, 0.0 }
0x11a9   : > { %v6582_v2 = vadd.f32 %v6581_v57, %v6453_v53  ;;  %v6694_v0 = vpop.f32.mrb[238].mxu1  ;;  %v6583_v3 = vpop.f32.mrb[239].mxu0  ;;  %v6738_v39 = vmax.f32 %v6691_v55, 0.0 }
0x11aa   : > { %v6695_v9 = vadd.f32 %v6694_v0, %v6453_v53  ;;  %v6584_v4 = vadd.f32 %v6583_v3, %v6453_v53  ;;  %v6696_v17 = vpop.f32.mrb[239].mxu1  ;;  %v6473_v57 = vpop.permute.xlu1 %6472 }
0x11ab   : > { %v6739_v18 = vmax.f32 %v6582_v2, 0.0  ;;  %v6697_v26 = vadd.f32 %v6696_v17, %v6453_v53 }
0x11ac   : > { %v6741_v63 = vmax.f32 %v6695_v9, 0.0  ;;  %v6740_v7 = vmax.f32 %v6584_v4, 0.0  ;;  %v6587_v50 = vpop.f32.mrb[240].mxu0 }
0x11ad   : > { %v8736_v6 = vpack.c.bf16 %v6739_v18, %v6735_v15  ;;  %v6742_v19 = vmax.f32 %v6697_v26, 0.0  ;;  %v6700_v41 = vpop.f32.mrb[240].mxu1  ;;  %v6589_v29 = vpop.f32.mrb[241].mxu0  ;;  %v6588_v20 = vadd.f32 %v6587_v50, %v6458_v54 }
0x11ae   : > { %v8752_v12 = vpack.c.bf16 %v6741_v63, %v6737_v27  ;;  %v8734_v48 = vpack.c.bf16 %v6740_v7, %v6736_v11  ;;  %v6702_v61 = vpop.f32.mrb[241].mxu1  ;;  %v6701_v44 = vadd.f32 %v6700_v41, %v6458_v54  ;;  %v6590_v59 = vadd.f32 %v6589_v29, %v6458_v54 }
0x11af   : > { %v8750_v35 = vpack.c.bf16 %v6742_v19, %v6738_v39  ;;  %v6703_v8 = vadd.f32 %v6702_v61, %v6458_v54  ;;  %v6743_v33 = vmax.f32 %v6588_v20, 0.0  ;;  %v6478_v61 = vpop.permute.xlu0 %6477 }
0x11b0   : > { %v6593_v10 = vpop.f32.mrb[242].mxu0  ;;  %8735 = vmatprep.subr.bf16.mxu0 %v8734_v48  ;;  %v6745_v40 = vmax.f32 %v6701_v44, 0.0  ;;  %v6744_v42 = vmax.f32 %v6590_v59, 0.0 }
0x11b1   : > { %v6594_v49 = vadd.f32 %v6593_v10, %v6463_v1  ;;  %v6706_v25 = vpop.f32.mrb[242].mxu1  ;;  %8751 = vmatprep.subr.bf16.mxu1 %v8750_v35  ;;  %v6595_v28 = vpop.f32.mrb[243].mxu0  ;;  %8737 = vmatpush1.bf16.msra.mxu0 %v8736_v6  ;;  %v6746_v62 = vmax.f32 %v6703_v8, 0.0 }
0x11b2   : > { %v6707_v31 = vadd.f32 %v6706_v25, %v6463_v1  ;;  %v6596_v34 = vadd.f32 %v6595_v28, %v6463_v1  ;;  %v6708_v52 = vpop.f32.mrb[243].mxu1  ;;  %8753 = vmatpush1.bf16.msra.mxu1 %v8752_v12  ;;  %v6483_v10 = vpop.permute.xlu1 %6482 }
0x11b3   : > { %v6747_v13 = vmax.f32 %v6594_v49, 0.0  ;;  %v6709_v60 = vadd.f32 %v6708_v52, %v6463_v1 }
0x11b4   : > { %v6749_v46 = vmax.f32 %v6707_v31, 0.0  ;;  %v6748_v56 = vmax.f32 %v6596_v34, 0.0  ;;  %v6599_v16 = vpop.f32.mrb[244].mxu0 }
0x11b5   : > { %v8740_v43 = vpack.c.bf16 %v6747_v13, %v6743_v33  ;;  %v6750_v37 = vmax.f32 %v6709_v60, 0.0  ;;  %v6712_v32 = vpop.f32.mrb[244].mxu1  ;;  %v6601_v47 = vpop.f32.mrb[245].mxu0  ;;  %v6600_v58 = vadd.f32 %v6599_v16, %v6468_v23 }
0x11b6   : > { %v8756_v45 = vpack.c.bf16 %v6749_v46, %v6745_v40  ;;  %v8738_v51 = vpack.c.bf16 %v6748_v56, %v6744_v42  ;;  %v6714_v53 = vpop.f32.mrb[245].mxu1  ;;  %v6713_v55 = vadd.f32 %v6712_v32, %v6468_v23  ;;  %v6602_v2 = vadd.f32 %v6601_v47, %v6468_v23 }
0x11b7   : > { %v8754_v36 = vpack.c.bf16 %v6750_v37, %v6746_v62  ;;  %v6715_v3 = vadd.f32 %v6714_v53, %v6468_v23  ;;  %v6751_v27 = vmax.f32 %v6600_v58, 0.0  ;;  %v8144_v53 = vld [vmem:[%s11036_s8 + $0xc0] sm:$0xff]  ;;  %v8146_v58 = vld [vmem:[%s11036_s8 + $0xd0] sm:$0xff] }
0x11b8   : > { %v6605_v0 = vpop.f32.mrb[246].mxu0  ;;  %8739 = vmatprep.subr.bf16.mxu0 %v8738_v51  ;;  %v6753_v7 = vmax.f32 %v6713_v55, 0.0  ;;  %v6752_v50 = vmax.f32 %v6602_v2, 0.0  ;;  %v8148_v55 = vld [vmem:[%s11036_s8 + $0xe0] sm:$0xff]  ;;  %v8149_v2 = vld [vmem:[%s11036_s8 + $0xe8] sm:$0xff] }
0x11b9   : > { %v6606_v9 = vadd.f32 %v6605_v0, %v6473_v57  ;;  %v6718_v4 = vpop.f32.mrb[246].mxu1  ;;  %8755 = vmatprep.subr.bf16.mxu1 %v8754_v36  ;;  %v6607_v17 = vpop.f32.mrb[247].mxu0  ;;  %8741 = vmatpush1.bf16.msra.mxu0 %v8740_v43  ;;  %v6754_v41 = vmax.f32 %v6715_v3, 0.0  ;;  %v8145_v36 = vld [vmem:[%s11036_s8 + $0xc8] sm:$0xff]  ;;  %v8150_v0 = vld [vmem:[%s11036_s8 + $0xf0] sm:$0xff]  ;;  %v8151_v3 = vld [vmem:[%s11036_s8 + $0xf8] sm:$0xff] }
0x11ba   : > { %v6719_v15 = vadd.f32 %v6718_v4, %v6473_v57  ;;  %v6608_v18 = vadd.f32 %v6607_v17, %v6473_v57  ;;  %v6720_v26 = vpop.f32.mrb[247].mxu1  ;;  %8757 = vmatpush1.bf16.msra.mxu1 %v8756_v45 }
0x11bb   : > { %v6755_v11 = vmax.f32 %v6606_v9, 0.0  ;;  %v6721_v63 = vadd.f32 %v6720_v26, %v6473_v57  ;;  %v8147_v57 = vld [vmem:[%s11036_s8 + $0xd8] sm:$0xff] }
0x11bc   : > { %v6757_v39 = vmax.f32 %v6719_v15, 0.0  ;;  %v6756_v6 = vmax.f32 %v6608_v18, 0.0  ;;  %v6611_v19 = vpop.f32.mrb[248].mxu0  ;;  %v6788_v15 = vpop.permute.xlu0 %6787 }
0x11bd   : > { %v8744_v29 = vpack.c.bf16 %v6755_v11, %v6751_v27  ;;  %v6758_v54 = vmax.f32 %v6721_v63, 0.0  ;;  %v6724_v12 = vpop.f32.mrb[248].mxu1  ;;  %v6613_v48 = vpop.f32.mrb[249].mxu0  ;;  %v6612_v59 = vadd.f32 %v6611_v19, %v6478_v61 }
0x11be   : > { %v8760_v35 = vpack.c.bf16 %v6757_v39, %v6753_v7  ;;  %v8742_v20 = vpack.c.bf16 %v6756_v6, %v6752_v50  ;;  %v6726_v1 = vpop.f32.mrb[249].mxu1  ;;  %v6725_v8 = vadd.f32 %v6724_v12, %v6478_v61  ;;  %v6614_v49 = vadd.f32 %v6613_v48, %v6478_v61  ;;  %v6793_v27 = vpop.permute.xlu1 %6792 }
0x11bf   : > { %v8758_v44 = vpack.c.bf16 %v6758_v54, %v6754_v41  ;;  %v6727_v28 = vadd.f32 %v6726_v1, %v6478_v61  ;;  %v6759_v40 = vmax.f32 %v6612_v59, 0.0 }
0x11c0   : > { %v6617_v25 = vpop.f32.mrb[250].mxu0  ;;  %8743 = vmatprep.subr.bf16.mxu0 %v8742_v20  ;;  %v6761_v56 = vmax.f32 %v6725_v8, 0.0  ;;  %v6760_v16 = vmax.f32 %v6614_v49, 0.0 }
0x11c1   : > { %v6618_v31 = vadd.f32 %v6617_v25, %v6483_v10  ;;  %v6730_v34 = vpop.f32.mrb[250].mxu1  ;;  %8759 = vmatprep.subr.bf16.mxu1 %v8758_v44  ;;  %v6619_v52 = vpop.f32.mrb[251].mxu0  ;;  %8745 = vmatpush1.bf16.msra.mxu0 %v8744_v29  ;;  %v6762_v37 = vmax.f32 %v6727_v28, 0.0 }
0x11c2   : > { %v6731_v33 = vadd.f32 %v6730_v34, %v6483_v10  ;;  %v6620_v13 = vadd.f32 %v6619_v52, %v6483_v10  ;;  %v6732_v60 = vpop.f32.mrb[251].mxu1  ;;  %8761 = vmatpush1.bf16.msra.mxu1 %v8760_v35 }
0x11c3   : > { %v6763_v42 = vmax.f32 %v6618_v31, 0.0  ;;  %v6733_v46 = vadd.f32 %v6732_v60, %v6483_v10  ;;  %v6798_v31 = vpop.permute.xlu0 %6797 }
0x11c4   : > { %v6765_v62 = vmax.f32 %v6731_v33, 0.0  ;;  %v6764_v43 = vmax.f32 %v6620_v13, 0.0 }
0x11c5   : > { %v8748_v32 = vpack.c.bf16 %v6763_v42, %v6759_v40  ;;  %v6766_v47 = vmax.f32 %v6733_v46, 0.0  ;;  %v6803_v40 = vpop.permute.xlu1 %6802 }
0x11c6   : > { %v8764_v23 = vpack.c.bf16 %v6765_v62, %v6761_v56  ;;  %v8746_v45 = vpack.c.bf16 %v6764_v43, %v6760_v16 }
0x11c7   : > { %v8762_v51 = vpack.c.bf16 %v6766_v47, %v6762_v37 }
0x11c8   : > { %8747 = vmatprep.subr.bf16.mxu0 %v8746_v45 }
0x11c9   : > { %8763 = vmatprep.subr.bf16.mxu1 %v8762_v51  ;;  %8749 = vmatpush1.bf16.msra.mxu0 %v8748_v32 }
0x11ca   : > { %8765 = vmatpush1.bf16.msra.mxu1 %v8764_v23 }
0x11cc   : > { %8160 = vmatmul.mubr.msk.f32.vlgmr.msra.gmra.mrb[252].mxu0 %vm984_vm2, %v8144_v53 }
0x11cd   : > { %8168 = vmatmul.mubr.msk.f32.vlgmr.msra.gmra.mrb[252].mxu1 %vm984_vm2, %v8144_v53  ;;  %6919 = vmatprep.mubr.f32.mxu0 %v9007_v5 }
0x11ce   : > { %7032 = vmatprep.mubr.f32.mxu1 %v9007_v5 }
0x11d0   : > { %8161 = vmatmul.mubr.msk.f32.gmra.mrb[254].mxu0 %vm984_vm2, %v8145_v36 }
0x11d1   : > { %8169 = vmatmul.mubr.msk.f32.gmra.mrb[254].mxu1 %vm984_vm2, %v8145_v36  ;;  %6925 = vmatprep.mubr.f32.mxu0 %v9007_v5 }
0x11d2   : > { %7038 = vmatprep.mubr.f32.mxu1 %v9007_v5 }
0x11d4   : > { %8162 = vmatmul.mubr.msk.f32.gmra.mrb[0].mxu0 %vm984_vm2, %v8146_v58 }
0x11d5   : > { %8170 = vmatmul.mubr.msk.f32.gmra.mrb[0].mxu1 %vm984_vm2, %v8146_v58  ;;  %6931 = vmatprep.mubr.f32.mxu0 %v9007_v5 }
0x11d6   : > { %7044 = vmatprep.mubr.f32.mxu1 %v9007_v5 }
0x11d8   : > { %8163 = vmatmul.mubr.msk.f32.gmra.mrb[2].mxu0 %vm984_vm2, %v8147_v57 }
0x11d9   : > { %8171 = vmatmul.mubr.msk.f32.gmra.mrb[2].mxu1 %vm984_vm2, %v8147_v57  ;;  %6937 = vmatprep.mubr.f32.mxu0 %v9007_v5 }
0x11da   : > { %7050 = vmatprep.mubr.f32.mxu1 %v9007_v5 }
0x11dc   : > { %8164 = vmatmul.mubr.msk.f32.gmra.mrb[4].mxu0 %vm984_vm2, %v8148_v55 }
0x11dd   : > { %8172 = vmatmul.mubr.msk.f32.gmra.mrb[4].mxu1 %vm984_vm2, %v8148_v55  ;;  %6943 = vmatprep.mubr.f32.mxu0 %v9007_v5 }
0x11de   : > { %7056 = vmatprep.mubr.f32.mxu1 %v9007_v5 }
0x11e0   : > { %8165 = vmatmul.mubr.msk.f32.gmra.mrb[6].mxu0 %vm984_vm2, %v8149_v2 }
0x11e1   : > { %8173 = vmatmul.mubr.msk.f32.gmra.mrb[6].mxu1 %vm984_vm2, %v8149_v2  ;;  %6949 = vmatprep.mubr.f32.mxu0 %v9007_v5 }
0x11e2   : > { %7062 = vmatprep.mubr.f32.mxu1 %v9007_v5 }
0x11e4   : > { %8166 = vmatmul.mubr.msk.f32.gmra.mrb[8].mxu0 %vm984_vm2, %v8150_v0 }
0x11e5   : > { %8174 = vmatmul.mubr.msk.f32.gmra.mrb[8].mxu1 %vm984_vm2, %v8150_v0  ;;  %6955 = vmatprep.mubr.f32.mxu0 %v9007_v5 }
0x11e6   : > { %7068 = vmatprep.mubr.f32.mxu1 %v9007_v5 }
0x11e8   : > { %8167 = vmatmul.mubr.msk.f32.gmra.mrb[10].mxu0 %vm984_vm2, %v8151_v3 }
0x11e9   : > { %8175 = vmatmul.mubr.msk.f32.gmra.mrb[10].mxu1 %vm984_vm2, %v8151_v3  ;;  %7183 = vmatprep.mubr.f32.mxu0 %v9007_v5 }
0x11ea   : > { %7254 = vmatprep.mubr.f32.mxu1 %v9007_v5 }
0x129f   : > { %v6915_v9 = vpop.f32.mrb[252].mxu0 }
0x12a0   : > { %v7028_v4 = vpop.f32.mrb[252].mxu1  ;;  %v6917_v17 = vpop.f32.mrb[253].mxu0  ;;  %v6916_v26 = vadd.f32 %v6915_v9, %v6788_v15 }
0x12a1   : > { %v7030_v18 = vpop.f32.mrb[253].mxu1  ;;  %v7029_v11 = vadd.f32 %v7028_v4, %v6788_v15  ;;  %v6918_v63 = vadd.f32 %v6917_v17, %v6788_v15 }
0x12a2   : > { %v7031_v50 = vadd.f32 %v7030_v18, %v6788_v15  ;;  %v7075_v12 = vmax.f32 %v6916_v26, 0.0  ;;  %v6808_v15 = vpop.permute.xlu0 %6807 }
0x12a3   : > { %v6921_v7 = vpop.f32.mrb[254].mxu0  ;;  %v7077_v35 = vmax.f32 %v7029_v11, 0.0  ;;  %v7076_v20 = vmax.f32 %v6918_v63, 0.0 }
0x12a4   : > { %v6922_v39 = vadd.f32 %v6921_v7, %v6793_v27  ;;  %v7034_v6 = vpop.f32.mrb[254].mxu1  ;;  %v6923_v19 = vpop.f32.mrb[255].mxu0  ;;  %v7078_v10 = vmax.f32 %v7031_v50, 0.0 }
0x12a5   : > { %v7035_v41 = vadd.f32 %v7034_v6, %v6793_v27  ;;  %v6924_v29 = vadd.f32 %v6923_v19, %v6793_v27  ;;  %v7036_v54 = vpop.f32.mrb[255].mxu1  ;;  %v6813_v7 = vpop.permute.xlu1 %6812 }
0x12a6   : > { %v7079_v48 = vmax.f32 %v6922_v39, 0.0  ;;  %v7037_v61 = vadd.f32 %v7036_v54, %v6793_v27 }
0x12a7   : > { %v7081_v1 = vmax.f32 %v7035_v41, 0.0  ;;  %v7080_v44 = vmax.f32 %v6924_v29, 0.0  ;;  %v6927_v59 = vpop.f32.mrb[0].mxu0 }
0x12a8   : > { %v10914_v8 = vpack.c.bf16 %v7079_v48, %v7075_v12  ;;  %v7082_v49 = vmax.f32 %v7037_v61, 0.0  ;;  %v7040_v25 = vpop.f32.mrb[0].mxu1  ;;  %v6929_v28 = vpop.f32.mrb[1].mxu0  ;;  %v6928_v60 = vadd.f32 %v6927_v59, %v6798_v31 }
0x12a9   : > { %v10916_v34 = vpack.c.bf16 %v7081_v1, %v7077_v35  ;;  %v10918_v52 = vpack.c.bf16 %v7080_v44, %v7076_v20  ;;  %v7042_v33 = vpop.f32.mrb[1].mxu1  ;;  %v7041_v42 = vadd.f32 %v7040_v25, %v6798_v31  ;;  %v6930_v46 = vadd.f32 %v6929_v28, %v6798_v31 }
0x12aa   : > { %v10920_v13 = vpack.c.bf16 %v7082_v49, %v7078_v10  ;;  %v7043_v16 = vadd.f32 %v7042_v33, %v6798_v31  ;;  %v7083_v45 = vmax.f32 %v6928_v60, 0.0 }
0x12ab   : > { %v6933_v56 = vpop.f32.mrb[2].mxu0  ;;  %8767 = vmatprep.subr.bf16.mxu0 %v10918_v52  ;;  %v7085_v36 = vmax.f32 %v7041_v42, 0.0  ;;  %v7084_v58 = vmax.f32 %v6930_v46, 0.0  ;;  %v6818_v42 = vpop.permute.xlu0 %6817 }
0x12ac   : > { %v6934_v62 = vadd.f32 %v6933_v56, %v6803_v40  ;;  %v7046_v43 = vpop.f32.mrb[2].mxu1  ;;  %8783 = vmatprep.subr.bf16.mxu1 %v10920_v13  ;;  %v6935_v37 = vpop.f32.mrb[3].mxu0  ;;  %8769 = vmatpush1.bf16.msra.mxu0 %v10914_v8  ;;  %v7086_v0 = vmax.f32 %v7043_v16, 0.0 }
0x12ad   : > { %v7047_v32 = vadd.f32 %v7046_v43, %v6803_v40  ;;  %v6936_v47 = vadd.f32 %v6935_v37, %v6803_v40  ;;  %v7048_v23 = vpop.f32.mrb[3].mxu1  ;;  %8785 = vmatpush1.bf16.msra.mxu1 %v10916_v34  ;;  %v6823_v37 = vpop.permute.xlu1 %6822 }
0x12ae   : > { %v7087_v51 = vmax.f32 %v6934_v62, 0.0  ;;  %v7049_v53 = vadd.f32 %v7048_v23, %v6803_v40 }
0x12af   : > { %v7089_v57 = vmax.f32 %v7047_v32, 0.0  ;;  %v7088_v55 = vmax.f32 %v6936_v47, 0.0  ;;  %v6939_v2 = vpop.f32.mrb[4].mxu0 }
0x12b0   : > { %v10926_v3 = vpack.c.bf16 %v7087_v51, %v7083_v45  ;;  %v7090_v9 = vmax.f32 %v7049_v53, 0.0  ;;  %v7052_v4 = vpop.f32.mrb[4].mxu1  ;;  %v6941_v17 = vpop.f32.mrb[5].mxu0  ;;  %v6940_v63 = vadd.f32 %v6939_v2, %v6808_v15 }
0x12b1   : > { %v10928_v18 = vpack.c.bf16 %v7089_v57, %v7085_v36  ;;  %v10930_v26 = vpack.c.bf16 %v7088_v55, %v7084_v58  ;;  %v7054_v27 = vpop.f32.mrb[5].mxu1  ;;  %v7053_v50 = vadd.f32 %v7052_v4, %v6808_v15  ;;  %v6942_v39 = vadd.f32 %v6941_v17, %v6808_v15 }
0x12b2   : > { %v10932_v11 = vpack.c.bf16 %v7090_v9, %v7086_v0  ;;  %v7055_v19 = vadd.f32 %v7054_v27, %v6808_v15  ;;  %v7091_v35 = vmax.f32 %v6940_v63, 0.0 }
0x12b3   : > { %v6945_v6 = vpop.f32.mrb[6].mxu0  ;;  %8771 = vmatprep.subr.bf16.mxu0 %v10930_v26  ;;  %v7093_v44 = vmax.f32 %v7053_v50, 0.0  ;;  %v7092_v59 = vmax.f32 %v6942_v39, 0.0 }
0x12b4   : > { %v6946_v41 = vadd.f32 %v6945_v6, %v6813_v7  ;;  %v7058_v29 = vpop.f32.mrb[6].mxu1  ;;  %8787 = vmatprep.subr.bf16.mxu1 %v10932_v11  ;;  %v6947_v54 = vpop.f32.mrb[7].mxu0  ;;  %8773 = vmatpush1.bf16.msra.mxu0 %v10926_v3  ;;  %v7094_v28 = vmax.f32 %v7055_v19, 0.0 }
0x12b5   : > { %v7059_v12 = vadd.f32 %v7058_v29, %v6813_v7  ;;  %v6948_v48 = vadd.f32 %v6947_v54, %v6813_v7  ;;  %v7060_v61 = vpop.f32.mrb[7].mxu1  ;;  %8789 = vmatpush1.bf16.msra.mxu1 %v10928_v18 }
0x12b6   : > { %v7095_v20 = vmax.f32 %v6946_v41, 0.0  ;;  %v7061_v1 = vadd.f32 %v7060_v61, %v6813_v7  ;;  %v8176_v41 = vld [vmem:[%s11038_s10 + $0xc] sm:$0xf] }
0x12b7   : > { %v7097_v10 = vmax.f32 %v7059_v12, 0.0  ;;  %v7096_v49 = vmax.f32 %v6948_v48, 0.0  ;;  %v6951_v25 = vpop.f32.mrb[8].mxu0 }
0x12b8   : > { %v8776_v31 = vpack.c.bf16 %v7095_v20, %v7091_v35  ;;  %v7098_v33 = vmax.f32 %v7061_v1, 0.0  ;;  %v7064_v60 = vpop.f32.mrb[8].mxu1  ;;  %v6953_v40 = vpop.f32.mrb[9].mxu0  ;;  %v6952_v43 = vadd.f32 %v6951_v25, %v6818_v42  ;;  %v9008_v20 = vmov 1966171168  }
0x12b9   : > { %v8792_v46 = vpack.c.bf16 %v7097_v10, %v7093_v44  ;;  %v8774_v56 = vpack.c.bf16 %v7096_v49, %v7092_v59  ;;  %v7066_v16 = vpop.f32.mrb[9].mxu1  ;;  %v7065_v32 = vadd.f32 %v7064_v60, %v6818_v42  ;;  %v6954_v47 = vadd.f32 %v6953_v40, %v6818_v42  ;;  %v7276_v59 = vpop.permute.xlu1 %7275 }
0x12ba   : > { %v8790_v62 = vpack.c.bf16 %v7098_v33, %v7094_v28  ;;  %v7067_v45 = vadd.f32 %v7066_v16, %v6818_v42  ;;  %v7099_v2 = vmax.f32 %v6952_v43, 0.0  ;;  %v10958_v1 = vunpack.c.l.s4 %v9008_v20 }
0x12bb   : > { %v6957_v23 = vpop.f32.mrb[10].mxu0  ;;  %8775 = vmatprep.subr.bf16.mxu0 %v8774_v56  ;;  %v7101_v4 = vmax.f32 %v7065_v32, 0.0  ;;  %v7100_v17 = vmax.f32 %v6954_v47, 0.0 }
0x12bc   : > { %v6958_v51 = vadd.f32 %v6957_v23, %v6823_v37  ;;  %v7070_v53 = vpop.f32.mrb[10].mxu1  ;;  %8791 = vmatprep.subr.bf16.mxu1 %v8790_v62  ;;  %v6959_v36 = vpop.f32.mrb[11].mxu0  ;;  %8777 = vmatpush1.bf16.msra.mxu0 %v8776_v31  ;;  %v7102_v63 = vmax.f32 %v7067_v45, 0.0 }
0x12bd   : > { %v7071_v58 = vadd.f32 %v7070_v53, %v6823_v37  ;;  %v6960_v57 = vadd.f32 %v6959_v36, %v6823_v37  ;;  %v7072_v55 = vpop.f32.mrb[11].mxu1  ;;  %8793 = vmatpush1.bf16.msra.mxu1 %v8792_v46 }
0x12be   : > { %v7103_v0 = vmax.f32 %v6958_v51, 0.0  ;;  %v7073_v9 = vadd.f32 %v7072_v55, %v6823_v37 }
0x12bf   : > { %v7105_v15 = vmax.f32 %v7071_v58, 0.0  ;;  %v7104_v27 = vmax.f32 %v6960_v57, 0.0 }
0x12c0   : > { %v8780_v7 = vpack.c.bf16 %v7103_v0, %v7099_v2  ;;  %v7106_v50 = vmax.f32 %v7073_v9, 0.0 }
0x12c1   : > { %v8796_v39 = vpack.c.bf16 %v7105_v15, %v7101_v4  ;;  %v8778_v6 = vpack.c.bf16 %v7104_v27, %v7100_v17 }
0x12c2   : > { %v8794_v19 = vpack.c.bf16 %v7106_v50, %v7102_v63 }
0x12c3   : > { %8779 = vmatprep.subr.bf16.mxu0 %v8778_v6 }
0x12c4   : > { %8795 = vmatprep.subr.bf16.mxu1 %v8794_v19  ;;  %8781 = vmatpush1.bf16.msra.mxu0 %v8780_v7 }
0x12c5   : > { %8797 = vmatpush1.bf16.msra.mxu1 %v8796_v39  ;;  %8799 = vmatprep.subr.bf16.mxu0 %v10918_v52 }
0x12c6   : > { %8815 = vmatprep.subr.bf16.mxu1 %v10920_v13 }
0x12c7   : > { %8178 = vmatmul.mubr.msk.f32.vlgmr.msra.gmra.mrb[12].mxu0 %vm984_vm2, %v8176_v41 }
0x12c8   : > { %8179 = vmatmul.mubr.msk.f32.vlgmr.msra.gmra.mrb[12].mxu1 %vm984_vm2, %v8176_v41  ;;  %8801 = vmatpush1.bf16.msra.mxu0 %v10914_v8  ;;  %v8180_v8 = vld [vmem:[%s11040_s12 + $0xc] sm:$0xf] }
0x12c9   : > { %8817 = vmatpush1.bf16.msra.mxu1 %v10916_v34  ;;  %8803 = vmatprep.subr.bf16.mxu0 %v10930_v26 }
0x12ca   : > { %8819 = vmatprep.subr.bf16.mxu1 %v10932_v11  ;;  %7345 = vmatprep.mubr.f32.mxu0 %v9007_v5 }
0x12cb   : > { %7416 = vmatprep.mubr.f32.mxu1 %v9007_v5  ;;  %v7114_v5 = vpop.permute.xlu0 %7113 }
0x12cc   : > { %8805 = vmatpush1.bf16.msra.mxu0 %v10926_v3 }
0x12cd   : > { %8821 = vmatpush1.bf16.msra.mxu1 %v10928_v18  ;;  %8807 = vmatprep.subr.bf16.mxu0 %v8774_v56 }
0x12ce   : > { %8823 = vmatprep.subr.bf16.mxu1 %v8790_v62 }
0x12d0   : > { %8809 = vmatpush1.bf16.msra.mxu0 %v8776_v31  ;;  %v7500_v31 = vlaneseq }
0x12d1   : > { %8825 = vmatpush1.bf16.msra.mxu1 %v8792_v46  ;;  %8811 = vmatprep.subr.bf16.mxu0 %v8778_v6 }
0x12d2   : > { %8827 = vmatprep.subr.bf16.mxu1 %v8794_v19  ;;  %v7499_v19 = vunpack.c.0.s8 %v10958_v1  ;;  %v7501_v41 = vshrl.u32 %v7500_v31, 7  ;;  %vm7522_vm3 = vcmp.lt.s32.totalorder %v7500_v31, 512 }
0x12d4   : > { %8813 = vmatpush1.bf16.msra.mxu0 %v8780_v7 }
0x12d5   : > { %8829 = vmatpush1.bf16.msra.mxu1 %v8796_v39 }
0x12d7   : > { %8182 = vmatmul.mubr.msk.f32.vlgmr.msra.gmra.mrb[14].mxu0 %vm984_vm2, %v8180_v8 }
0x12d8   : > { %8183 = vmatmul.mubr.msk.f32.vlgmr.msra.gmra.mrb[14].mxu1 %vm984_vm2, %v8180_v8 }
0x139a   : > { %v7185_v34 = vpop.f32.mrb[12].mxu0 }
0x139b   : > { %v7186_v52 = vadd.f32 %v7185_v34, %v7114_v5  ;;  %v7256_v13 = vpop.f32.mrb[12].mxu1  ;;  %v7187_v3 = vpop.f32.mrb[13].mxu0 }
0x139c   : > { %v7257_v18 = vadd.f32 %v7256_v13, %v7114_v5  ;;  %v7188_v26 = vadd.f32 %v7187_v3, %v7114_v5  ;;  %v7258_v11 = vpop.f32.mrb[13].mxu1 }
0x139d   : > { %8924 = vtanh.f32 %v7186_v52  ;;  %v7259_v29 = vadd.f32 %v7258_v11, %v7114_v5 }
0x139e   : > { %8926 = vtanh.f32 %v7257_v18 }
0x139f   : > { %8928 = vtanh.f32 %v7188_v26 }
0x13a0   : > { %8930 = vtanh.f32 %v7259_v29 }
0x13a7   : > { %v8925_v54 = vpop.eup %8924 }
0x13a8   : > { %v8927_v12 = vpop.eup %8926  ;;  %v7265_v48 = vmul.f32 3.0, %v8925_v54 }
0x13a9   : > { %v8929_v61 = vpop.eup %8928  ;;  %v7267_v35 = vmul.f32 3.0, %v8927_v12  ;;  %v7502_v12 = vsub.s32 %v7499_v19, %v7501_v41 }
0x13aa   : > { %v8931_v44 = vpop.eup %8930  ;;  %v7427_v10 = vmul.f32 1.442695, %v7265_v48  ;;  %v7455_v49 = vadd.f32 %v7265_v48, %v10672_v38  ;;  %v7266_v25 = vmul.f32 3.0, %v8929_v61  ;;  %v7347_v28 = vpop.f32.mrb[14].mxu0 }
0x13ab   : > { %v7431_v33 = vmul.f32 1.442695, %v7267_v35  ;;  %v7457_v60 = vadd.f32 %v7267_v35, %v10674_v30  ;;  %v7268_v40 = vmul.f32 3.0, %v8931_v44  ;;  %v7348_v42 = vadd.f32 %v7347_v28, %v7276_v59  ;;  %v7418_v46 = vpop.f32.mrb[14].mxu1  ;;  %v7349_v56 = vpop.f32.mrb[15].mxu0 }
0x13ac   : > { %8932 = vpow2.f32 %v7427_v10  ;;  %v7463_v16 = vsel %vm661_vm0, %v7455_v49, 0.0  ;;  %v7429_v62 = vmul.f32 1.442695, %v7266_v25  ;;  %v7456_v43 = vadd.f32 %v7266_v25, %v10676_v14  ;;  %v7420_v37 = vpop.f32.mrb[15].mxu1 }
0x13ad   : > { %v7464_v32 = vrot.slane %v7463_v16, 4  ;;  %8934 = vpow2.f32 %v7431_v33  ;;  %v7477_v38 = vsel %vm661_vm0, %v7457_v60, 0.0  ;;  %v7433_v47 = vmul.f32 1.442695, %v7268_v40 }
0x13ae   : > { %v7478_v23 = vrot.slane %v7477_v38, 4  ;;  %8936 = vpow2.f32 %v7429_v62  ;;  %v7470_v30 = vsel %vm661_vm0, %v7456_v43, 0.0  ;;  %v7458_v45 = vadd.f32 %v7268_v40, %v10678_v24 }
0x13af   : > { %v7465_v51 = vadd.f32 %v7464_v32, %v7463_v16  ;;  %v7471_v53 = vrot.slane %v7470_v30, 4  ;;  %8938 = vpow2.f32 %v7433_v47  ;;  %v7423_v36 = vmul.f32 3.0, %v7348_v42 }
0x13b0   : > { %v7479_v58 = vadd.f32 %v7478_v23, %v7477_v38  ;;  %v7484_v57 = vsel %vm661_vm0, %v7458_v45, 0.0  ;;  %v7419_v14 = vadd.f32 %v7418_v46, %v7276_v59  ;;  %v7350_v55 = vadd.f32 %v7349_v56, %v7276_v59 }
0x13b1   : > { %v7466_v2 = vrot.slane %v7465_v51, 2  ;;  %v7472_v0 = vadd.f32 %v7471_v53, %v7470_v30  ;;  %v7485_v9 = vrot.slane %v7484_v57, 4  ;;  %v7421_v4 = vadd.f32 %v7420_v37, %v7276_v59 }
0x13b2   : > { %v7480_v17 = vrot.slane %v7479_v58, 2  ;;  %v7425_v15 = vmul.f32 3.0, %v7419_v14  ;;  %v7424_v27 = vmul.f32 3.0, %v7350_v55 }
0x13b3   : > { %v7467_v63 = vadd.f32 %v7466_v2, %v7465_v51  ;;  %v7473_v7 = vrot.slane %v7472_v0, 2  ;;  %v7486_v50 = vadd.f32 %v7485_v9, %v7484_v57  ;;  %v7426_v24 = vmul.f32 3.0, %v7421_v4 }
0x13b4   : > { %v7481_v39 = vadd.f32 %v7480_v17, %v7479_v58  ;;  %v7449_v6 = vcombine.low %v7423_v36, %v7424_v27 }
0x13b5   : > { %v7468_v8 = vrot.slane %v7467_v63, 1  ;;  %v7474_v5 = vadd.f32 %v7473_v7, %v7472_v0  ;;  %v7487_v34 = vrot.slane %v7486_v50, 2  ;;  %v7450_v52 = vcombine.low %v7425_v15, %v7426_v24 }
0x13b6   : > { %v8933_v13 = vpop.eup %8932  ;;  %v7482_v3 = vrot.slane %v7481_v39, 1 }
0x13b7   : > { %v8935_v18 = vpop.eup %8934  ;;  %v7469_v26 = vadd.f32 %v7468_v8, %v7467_v63  ;;  %v7475_v11 = vrot.slane %v7474_v5, 1  ;;  %v7488_v29 = vadd.f32 %v7487_v34, %v7486_v50 }
0x13b8   : > { %v8937_v54 = vpop.eup %8936  ;;  %v7483_v61 = vadd.f32 %v7482_v3, %v7481_v39 }
0x13b9   : > { %v8939_v48 = vpop.eup %8938  ;;  %v7476_v35 = vadd.f32 %v7475_v11, %v7474_v5  ;;  %v7489_v20 = vrot.slane %v7488_v29, 1  ;;  %v7439_v1 = vcombine.low %v8933_v13, %v8937_v54 }
0x13ba   : > { %v7440_v44 = vcombine.low %v8935_v18, %v8939_v48 }
0x13bb   : > { %v7490_v59 = vadd.f32 %v7489_v20, %v7488_v29  ;;  %v7443_v10 = vmul.f32 %v7439_v1, %v10380_v21  ;;  %v7495_v49 = vcombine.low %v7469_v26, %v7476_v35 }
0x13bc   : > { %v7444_v25 = vmul.f32 %v7440_v44, %v10382_v22 }
0x13bd   : > { %v7453_v28 = vadd.f32 %v7449_v6, %v7443_v10  ;;  %v7496_v33 = vcombine.low %v7483_v61, %v7490_v59  ;;  %v7503_v60 = vrot.slane %v7495_v49, %v7502_v12 }
0x13be   : > { %v7454_v40 = vadd.f32 %v7450_v52, %v7444_v25 }
0x13bf   : > { %7459 = vst [vmem:[%s563_s20] sm:$0xff] %v7453_v28  ;;  %v7510_v42 = vrot.slane %v7496_v33, %v7502_v12 }
0x13c0   : > { %7460 = vst [vmem:[%s563_s20 + $0x8] sm:$0xff] %v7454_v40 }
0x13c1   : > { %v7511_v21 = vcombine.low %v7503_v60, %v7510_v42 }
0x13c3   : > { %v7518_v46 = vrot.slane %v7511_v21, %v7502_v12 }
0x13c5   : > { %7524 = vst.msk [vmem:[%s546_s23] sm:$0xf] %vm7522_vm3, %v7518_v46 }
0x13c6   : > { %8955 = shalt.err (!%p8952_p3)
}
0x13c7   : > { %s8956_s27 = scalar_lea.hbm %s10984_s26, 64  ;;  %s8960_s23 = scalar_lea.hbm %s11044_s16, 128 }
0x13c8   : > { %p8957_p4 = scmp.ne.s32.totalorder %s10984_s26, %s8956_s27  ;;  %p8961_p9 = scmp.lt.u32.totalorder %s10984_s26, %s11044_s16 }
0x13c9   : > { %p8962_p10 = scmp.lt.u32.totalorder %s8960_s23, %s8956_s27  ;;  %p8964_p12 = scmp.lt.u32.totalorder %s8956_s27, %s10984_s26 }
0x13ca   : > { %p8958_p7 = pnand %p8957_p4, %p9133_p5 }
0x13cb   : > { %p8963_p11 = por %p8962_p10, %p8961_p9 }
0x13cc   : > { %p8959_p8 = pneg %p8958_p7 }
0x13cd   : > { %p8965_p13 = por %p8964_p12, %p8963_p11 }
0x13cf   : > { %p8966_p0 = pnand %p8965_p13, %p8959_p8 }
0x13d1   : > { %8969 = shalt.err (!%p8966_p0)
}
0x13d2   : > { %8830 = dma.vmem_to_hbm [thread:$0]  (%p9133_p5), %s10986_s24, 64, %s10984_s26, %s7536_s29  }
0x13d3 PF: > { %s11061_s25 = sld [smem:[#allocation7_spill]]  ;;  %s11062_s28 = sld [smem:[#allocation5_spill]] }
0x13d9   : > { %p8836_p1 = scmp.ge.s32.totalorder %s11061_s25, 2  ;;  %s7586_s17 = sand.u32 1, %s11062_s28  }
0x13da   : > { %s7587_s20 = scalar_lea.sflag [#allocation3], %s7586_s17 }
0x13db   : > { %p8833_p2 = pnand %p8836_p1, %p9137_p6 }
0x13dd   : > { %8987 = dma.done.wait (!%p8833_p2), %s7587_s20, 64  }
0x13de   : > { %8989 = vsyncadd (!%p8833_p2), %s7587_s20, 4294967232  ;;  %s11064_s24 = sld [smem:[#allocation8_spill]]  ;;  %s11065_s27 = sld [smem:[#allocation6_spill]] }
0x13df   : > { %s11066_s23 = sld [smem:[#allocation9_spill]]  ;;  %s11067_s21 = smov %s8996_s22 }
0x13e4   : > { %p27_p3 = scmp.ge.s32.totalorder %s11064_s24, 4   ;;  %s11068_s22 = smov %s11065_s27 }
0x13e6   :  { %29 = sbr.rel (!%p27_p3) target bundleno = 5 (0x5), region = 174 }
0x13ed   :  { %7592 = vsyncpa [#allocation3], 1 }
0x13ee   :  { %7594 = vsyncpa [#allocation3 + $0x1], 1 }

</bundles_post_ra>
